<compile_context>
chip_gen: v7x
topology: tpu7x:2x2x1
jax: 0.10.0
libtpu: 0.0.40
codegen_flags: <defaults>
</compile_context>

<pallas_src>
import jax
import jax.numpy as jnp
from jax import lax
from jax.experimental import pallas as pl
from jax.experimental.pallas import tpu as pltpu

EPS = 1e-5  # PyTorch InstanceNorm2d default eps
HIDDEN = 64


def _cnn_kernel(x_ref,
                w1_ref, b1_ref, w2_ref, b2_ref, w3_ref, b3_ref,
                w4_ref, b4_ref, w5_ref, b5_ref, w6_ref, b6_ref,
                o_ref):
    # x_ref: (B, Cin, P)   o_ref: (B, Cout, P)
    B = x_ref.shape[0]

    def norm_block(h, w_ref, b_ref):
        # 1x1 conv == channel matmul (Cout, Cin) @ (Cin, P), plus bias (Cout, 1)
        y = jnp.dot(w_ref[...], h, preferred_element_type=jnp.float32)
        y = y + b_ref[...]
        # InstanceNorm2d (no affine): per-channel stats over spatial (lane) axis
        mean = jnp.mean(y, axis=1, keepdims=True)          # (Cout, 1)
        d = y - mean                                       # centered, computed once
        var = jnp.mean(d * d, axis=1, keepdims=True)       # (Cout, 1)
        # normalize + ReLU
        return jnp.maximum(d * lax.rsqrt(var + EPS), 0.0)

    for b in range(B):  # B is small & static; fully unrolled
        h = x_ref[b]                                       # (Cin, P) f32
        h = norm_block(h, w1_ref, b1_ref)
        h = norm_block(h, w2_ref, b2_ref)
        h = norm_block(h, w3_ref, b3_ref)
        h = norm_block(h, w4_ref, b4_ref)
        h = norm_block(h, w5_ref, b5_ref)
        # final 1x1 conv, no norm / activation
        out = jnp.dot(w6_ref[...], h, preferred_element_type=jnp.float32)
        out = out + b6_ref[...]
        o_ref[b] = out                                     # lane-dense (Cout, P) store


def _choose_batch_and_vmem(N, Cin, Cout, P):
    """Largest per-step batch B (divisor of N) whose working set fits a safe budget,
    plus an explicit VMEM scoped limit valid on v5e/v6e/v7x."""
    bp = 4  # f32 bytes
    weight_bytes = (Cin * HIDDEN + 4 * HIDDEN * HIDDEN + HIDDEN * Cout
                    + 5 * HIDDEN + Cout) * bp

    def est(B):
        io = 2 * B * (Cin + Cout) * P * bp          # double-buffered input/output blocks
        act = 4 * HIDDEN * P * bp                   # live f32 intermediates (per sample)
        return io + act + 2 * weight_bytes

    budget = 20 << 20                               # conservative across generations
    B = 1
    for cand in range(1, N + 1):
        if N % cand == 0 and est(cand) <= budget:
            B = cand
    # explicit scoped-VMEM limit: above v5e's 16 MiB default, below v7x's 64 MiB physical
    vmem_limit = int(min(max(2 * est(B), 32 << 20), 56 << 20))
    return B, vmem_limit


def cnn_forward(x_nchw, params):
    """x_nchw: (N, Cin, H, W) float32.
    params: list of (w, b) with w (Cout, Cin), b (Cout, 1)."""
    N, Cin, H, W = x_nchw.shape
    P = H * W
    # NCHW -> (N, Cin, P): pure reshape, no transpose.
    x = x_nchw.reshape(N, Cin, P)

    (w1, b1), (w2, b2), (w3, b3), (w4, b4), (w5, b5), (w6, b6) = params
    Cout = w6.shape[0]
    flat_params = [w1, b1, w2, b2, w3, b3, w4, b4, w5, b5, w6, b6]

    B, vmem_limit = _choose_batch_and_vmem(N, Cin, Cout, P)

    def const_spec(arr):
        nd = arr.ndim
        return pl.BlockSpec(arr.shape, lambda g, _nd=nd: (0,) * _nd)

    in_specs = [pl.BlockSpec((B, Cin, P), lambda g: (g, 0, 0))]
    in_specs += [const_spec(p) for p in flat_params]

    out = pl.pallas_call(
        _cnn_kernel,
        out_shape=jax.ShapeDtypeStruct((N, Cout, P), jnp.float32),
        grid_spec=pltpu.PrefetchScalarGridSpec(
            num_scalar_prefetch=0,
            grid=(N // B,),
            in_specs=in_specs,
            out_specs=pl.BlockSpec((B, Cout, P), lambda g: (g, 0, 0)),
        ),
        compiler_params=pltpu.CompilerParams(
            dimension_semantics=("parallel",),
            vmem_limit_bytes=vmem_limit),
    )(x, *flat_params)

    # (N, Cout, P) -> NCHW: free reshape, no transpose.
    return out.reshape(N, Cout, H, W)


def init_params(key, in_channels, out_channels):
    """Deterministic synthetic params. Conv2d(k=1) weight (Cout, Cin, 1, 1)
    stored as (Cout, Cin); bias stored as (Cout, 1)."""
    dims = [(in_channels, HIDDEN)] + [(HIDDEN, HIDDEN)] * 4 + [(HIDDEN, out_channels)]
    params = []
    for i, (ci, co) in enumerate(dims):
        kw, kb = jax.random.split(jax.random.fold_in(key, i))
        bound = 1.0 / jnp.sqrt(ci)  # matches PyTorch default bound for k=1 conv
        w = jax.random.uniform(kw, (co, ci), jnp.float32, -bound, bound)
        b = jax.random.uniform(kb, (co, 1), jnp.float32, -bound, bound)
        params.append((w, b))
    return params


def cnn_reference(x_nchw, params):
    """Pure-JAX reference mirroring the PyTorch semantics, for a sanity check."""
    N, Cin, H, W = x_nchw.shape
    h = x_nchw.reshape(N, Cin, H * W)
    for i, (w, b) in enumerate(params):
        y = jnp.einsum("oc,ncp->nop", w, h) + b[None]
        if i < 5:
            mean = jnp.mean(y, axis=2, keepdims=True)
            var = jnp.mean((y - mean) ** 2, axis=2, keepdims=True)
            y = (y - mean) / jnp.sqrt(var + EPS)
            y = jnp.maximum(y, 0.0)
        h = y
    Cout = params[-1][0].shape[0]
    return h.reshape(N, Cout, H, W)


if __name__ == "__main__":
    key = jax.random.PRNGKey(0)
    N, Cin, H, W = 2, 4, 16, 16
    Cout = 2

    kx, kp = jax.random.split(key)
    x = jax.random.normal(kx, (N, Cin, H, W), jnp.float32)
    params = init_params(kp, Cin, Cout)

    out = cnn_forward(x, params)
    out = jax.block_until_ready(out)

    ref = cnn_reference(x, params)
    assert out.shape == (N, Cout, H, W)
    assert jnp.allclose(out, ref, atol=1e-4, rtol=1e-4)

    print("KERNEL_OK")
</pallas_src>

<mosaic_0001>
module attributes {stable_mosaic.version = 11 : i64} {
  func.func @_cnn_kernel(%arg0: i32, %arg1: memref<2x4x256xf32, #tpu.memory_space<vmem>>, %arg2: memref<64x4xf32, #tpu.memory_space<vmem>>, %arg3: memref<64x1xf32, #tpu.memory_space<vmem>>, %arg4: memref<64x64xf32, #tpu.memory_space<vmem>>, %arg5: memref<64x1xf32, #tpu.memory_space<vmem>>, %arg6: memref<64x64xf32, #tpu.memory_space<vmem>>, %arg7: memref<64x1xf32, #tpu.memory_space<vmem>>, %arg8: memref<64x64xf32, #tpu.memory_space<vmem>>, %arg9: memref<64x1xf32, #tpu.memory_space<vmem>>, %arg10: memref<64x64xf32, #tpu.memory_space<vmem>>, %arg11: memref<64x1xf32, #tpu.memory_space<vmem>>, %arg12: memref<2x64xf32, #tpu.memory_space<vmem>>, %arg13: memref<2x1xf32, #tpu.memory_space<vmem>>, %arg14: memref<2x2x256xf32, #tpu.memory_space<vmem>>) attributes {dimension_semantics = [#tpu.dimension_semantics<parallel>], iteration_bounds = array<i64: 1>, scalar_prefetch = 0 : i64, scratch_operands = 0 : i64, tpu.core_type = #tpu.core_type<tc>, window_params = [{transform_indices = @transform_0, window_bounds = array<i64: 2, 4, 256>}, {pipeline_mode = #tpu.pipeline_mode<synchronous>, transform_indices = @transform_1, window_bounds = array<i64: 64, 4>}, {pipeline_mode = #tpu.pipeline_mode<synchronous>, transform_indices = @transform_2, window_bounds = array<i64: 64, 1>}, {pipeline_mode = #tpu.pipeline_mode<synchronous>, transform_indices = @transform_3, window_bounds = array<i64: 64, 64>}, {pipeline_mode = #tpu.pipeline_mode<synchronous>, transform_indices = @transform_4, window_bounds = array<i64: 64, 1>}, {pipeline_mode = #tpu.pipeline_mode<synchronous>, transform_indices = @transform_5, window_bounds = array<i64: 64, 64>}, {pipeline_mode = #tpu.pipeline_mode<synchronous>, transform_indices = @transform_6, window_bounds = array<i64: 64, 1>}, {pipeline_mode = #tpu.pipeline_mode<synchronous>, transform_indices = @transform_7, window_bounds = array<i64: 64, 64>}, {pipeline_mode = #tpu.pipeline_mode<synchronous>, transform_indices = @transform_8, window_bounds = array<i64: 64, 1>}, {pipeline_mode = #tpu.pipeline_mode<synchronous>, transform_indices = @transform_9, window_bounds = array<i64: 64, 64>}, {pipeline_mode = #tpu.pipeline_mode<synchronous>, transform_indices = @transform_10, window_bounds = array<i64: 64, 1>}, {pipeline_mode = #tpu.pipeline_mode<synchronous>, transform_indices = @transform_11, window_bounds = array<i64: 2, 64>}, {pipeline_mode = #tpu.pipeline_mode<synchronous>, transform_indices = @transform_12, window_bounds = array<i64: 2, 1>}, {transform_indices = @transform_13, window_bounds = array<i64: 2, 2, 256>}]} {
    %c0 = arith.constant 0 : index
    %c0_0 = arith.constant 0 : index
    %c0_1 = arith.constant 0 : index
    %0 = vector.load %arg1[%c0, %c0_0, %c0_1] : memref<2x4x256xf32, #tpu.memory_space<vmem>>, vector<1x4x256xf32>
    %1 = vector.shape_cast %0 : vector<1x4x256xf32> to vector<4x256xf32>
    %c0_2 = arith.constant 0 : index
    %c0_3 = arith.constant 0 : index
    %2 = vector.load %arg2[%c0_2, %c0_3] : memref<64x4xf32, #tpu.memory_space<vmem>>, vector<64x4xf32>
    %cst = arith.constant dense<0.000000e+00> : vector<64x256xf32>
    %3 = tpu.matmul %2, %1, %cst {dimension_numbers = #tpu.dot_dimension_numbers<[1], [0], [0], [1], [0, 0, 1, 1], [], []>} : vector<64x4xf32>, vector<4x256xf32>, vector<64x256xf32> -> vector<64x256xf32>
    %c0_4 = arith.constant 0 : index
    %c0_5 = arith.constant 0 : index
    %4 = vector.load %arg3[%c0_4, %c0_5] : memref<64x1xf32, #tpu.memory_space<vmem>>, vector<64x1xf32>
    %5 = vector.broadcast %4 : vector<64x1xf32> to vector<64x256xf32>
    %6 = arith.addf %3, %5 : vector<64x256xf32>
    %cst_6 = arith.constant dense<0.000000e+00> : vector<64xf32>
    %7 = vector.multi_reduction <add>, %6, %cst_6 [1] : vector<64x256xf32> to vector<64xf32>
    %8 = vector.shape_cast %7 : vector<64xf32> to vector<64x1xf32>
    %cst_7 = arith.constant 2.560000e+02 : f32
    %9 = vector.broadcast %cst_7 : f32 to vector<64x1xf32>
    %10 = arith.divf %8, %9 : vector<64x1xf32>
    %11 = vector.broadcast %10 : vector<64x1xf32> to vector<64x256xf32>
    %12 = arith.subf %6, %11 : vector<64x256xf32>
    %13 = arith.mulf %12, %12 : vector<64x256xf32>
    %cst_8 = arith.constant dense<0.000000e+00> : vector<64xf32>
    %14 = vector.multi_reduction <add>, %13, %cst_8 [1] : vector<64x256xf32> to vector<64xf32>
    %15 = vector.shape_cast %14 : vector<64xf32> to vector<64x1xf32>
    %cst_9 = arith.constant 2.560000e+02 : f32
    %16 = vector.broadcast %cst_9 : f32 to vector<64x1xf32>
    %17 = arith.divf %15, %16 : vector<64x1xf32>
    %cst_10 = arith.constant 9.99999974E-6 : f32
    %18 = vector.broadcast %cst_10 : f32 to vector<64x1xf32>
    %19 = arith.addf %17, %18 : vector<64x1xf32>
    %20 = math.rsqrt %19 : vector<64x1xf32>
    %21 = vector.broadcast %20 : vector<64x1xf32> to vector<64x256xf32>
    %22 = arith.mulf %12, %21 : vector<64x256xf32>
    %cst_11 = arith.constant 0.000000e+00 : f32
    %23 = vector.broadcast %cst_11 : f32 to vector<64x256xf32>
    %24 = arith.maximumf %22, %23 : vector<64x256xf32>
    %c0_12 = arith.constant 0 : index
    %c0_13 = arith.constant 0 : index
    %25 = vector.load %arg4[%c0_12, %c0_13] : memref<64x64xf32, #tpu.memory_space<vmem>>, vector<64x64xf32>
    %cst_14 = arith.constant dense<0.000000e+00> : vector<64x256xf32>
    %26 = tpu.matmul %25, %24, %cst_14 {dimension_numbers = #tpu.dot_dimension_numbers<[1], [0], [0], [1], [0, 0, 1, 1], [], []>} : vector<64x64xf32>, vector<64x256xf32>, vector<64x256xf32> -> vector<64x256xf32>
    %c0_15 = arith.constant 0 : index
    %c0_16 = arith.constant 0 : index
    %27 = vector.load %arg5[%c0_15, %c0_16] : memref<64x1xf32, #tpu.memory_space<vmem>>, vector<64x1xf32>
    %28 = vector.broadcast %27 : vector<64x1xf32> to vector<64x256xf32>
    %29 = arith.addf %26, %28 : vector<64x256xf32>
    %cst_17 = arith.constant dense<0.000000e+00> : vector<64xf32>
    %30 = vector.multi_reduction <add>, %29, %cst_17 [1] : vector<64x256xf32> to vector<64xf32>
    %31 = vector.shape_cast %30 : vector<64xf32> to vector<64x1xf32>
    %cst_18 = arith.constant 2.560000e+02 : f32
    %32 = vector.broadcast %cst_18 : f32 to vector<64x1xf32>
    %33 = arith.divf %31, %32 : vector<64x1xf32>
    %34 = vector.broadcast %33 : vector<64x1xf32> to vector<64x256xf32>
    %35 = arith.subf %29, %34 : vector<64x256xf32>
    %36 = arith.mulf %35, %35 : vector<64x256xf32>
    %cst_19 = arith.constant dense<0.000000e+00> : vector<64xf32>
    %37 = vector.multi_reduction <add>, %36, %cst_19 [1] : vector<64x256xf32> to vector<64xf32>
    %38 = vector.shape_cast %37 : vector<64xf32> to vector<64x1xf32>
    %cst_20 = arith.constant 2.560000e+02 : f32
    %39 = vector.broadcast %cst_20 : f32 to vector<64x1xf32>
    %40 = arith.divf %38, %39 : vector<64x1xf32>
    %cst_21 = arith.constant 9.99999974E-6 : f32
    %41 = vector.broadcast %cst_21 : f32 to vector<64x1xf32>
    %42 = arith.addf %40, %41 : vector<64x1xf32>
    %43 = math.rsqrt %42 : vector<64x1xf32>
    %44 = vector.broadcast %43 : vector<64x1xf32> to vector<64x256xf32>
    %45 = arith.mulf %35, %44 : vector<64x256xf32>
    %cst_22 = arith.constant 0.000000e+00 : f32
    %46 = vector.broadcast %cst_22 : f32 to vector<64x256xf32>
    %47 = arith.maximumf %45, %46 : vector<64x256xf32>
    %c0_23 = arith.constant 0 : index
    %c0_24 = arith.constant 0 : index
    %48 = vector.load %arg6[%c0_23, %c0_24] : memref<64x64xf32, #tpu.memory_space<vmem>>, vector<64x64xf32>
    %cst_25 = arith.constant dense<0.000000e+00> : vector<64x256xf32>
    %49 = tpu.matmul %48, %47, %cst_25 {dimension_numbers = #tpu.dot_dimension_numbers<[1], [0], [0], [1], [0, 0, 1, 1], [], []>} : vector<64x64xf32>, vector<64x256xf32>, vector<64x256xf32> -> vector<64x256xf32>
    %c0_26 = arith.constant 0 : index
    %c0_27 = arith.constant 0 : index
    %50 = vector.load %arg7[%c0_26, %c0_27] : memref<64x1xf32, #tpu.memory_space<vmem>>, vector<64x1xf32>
    %51 = vector.broadcast %50 : vector<64x1xf32> to vector<64x256xf32>
    %52 = arith.addf %49, %51 : vector<64x256xf32>
    %cst_28 = arith.constant dense<0.000000e+00> : vector<64xf32>
    %53 = vector.multi_reduction <add>, %52, %cst_28 [1] : vector<64x256xf32> to vector<64xf32>
    %54 = vector.shape_cast %53 : vector<64xf32> to vector<64x1xf32>
    %cst_29 = arith.constant 2.560000e+02 : f32
    %55 = vector.broadcast %cst_29 : f32 to vector<64x1xf32>
    %56 = arith.divf %54, %55 : vector<64x1xf32>
    %57 = vector.broadcast %56 : vector<64x1xf32> to vector<64x256xf32>
    %58 = arith.subf %52, %57 : vector<64x256xf32>
    %59 = arith.mulf %58, %58 : vector<64x256xf32>
    %cst_30 = arith.constant dense<0.000000e+00> : vector<64xf32>
    %60 = vector.multi_reduction <add>, %59, %cst_30 [1] : vector<64x256xf32> to vector<64xf32>
    %61 = vector.shape_cast %60 : vector<64xf32> to vector<64x1xf32>
    %cst_31 = arith.constant 2.560000e+02 : f32
    %62 = vector.broadcast %cst_31 : f32 to vector<64x1xf32>
    %63 = arith.divf %61, %62 : vector<64x1xf32>
    %cst_32 = arith.constant 9.99999974E-6 : f32
    %64 = vector.broadcast %cst_32 : f32 to vector<64x1xf32>
    %65 = arith.addf %63, %64 : vector<64x1xf32>
    %66 = math.rsqrt %65 : vector<64x1xf32>
    %67 = vector.broadcast %66 : vector<64x1xf32> to vector<64x256xf32>
    %68 = arith.mulf %58, %67 : vector<64x256xf32>
    %cst_33 = arith.constant 0.000000e+00 : f32
    %69 = vector.broadcast %cst_33 : f32 to vector<64x256xf32>
    %70 = arith.maximumf %68, %69 : vector<64x256xf32>
    %c0_34 = arith.constant 0 : index
    %c0_35 = arith.constant 0 : index
    %71 = vector.load %arg8[%c0_34, %c0_35] : memref<64x64xf32, #tpu.memory_space<vmem>>, vector<64x64xf32>
    %cst_36 = arith.constant dense<0.000000e+00> : vector<64x256xf32>
    %72 = tpu.matmul %71, %70, %cst_36 {dimension_numbers = #tpu.dot_dimension_numbers<[1], [0], [0], [1], [0, 0, 1, 1], [], []>} : vector<64x64xf32>, vector<64x256xf32>, vector<64x256xf32> -> vector<64x256xf32>
    %c0_37 = arith.constant 0 : index
    %c0_38 = arith.constant 0 : index
    %73 = vector.load %arg9[%c0_37, %c0_38] : memref<64x1xf32, #tpu.memory_space<vmem>>, vector<64x1xf32>
    %74 = vector.broadcast %73 : vector<64x1xf32> to vector<64x256xf32>
    %75 = arith.addf %72, %74 : vector<64x256xf32>
    %cst_39 = arith.constant dense<0.000000e+00> : vector<64xf32>
    %76 = vector.multi_reduction <add>, %75, %cst_39 [1] : vector<64x256xf32> to vector<64xf32>
    %77 = vector.shape_cast %76 : vector<64xf32> to vector<64x1xf32>
    %cst_40 = arith.constant 2.560000e+02 : f32
    %78 = vector.broadcast %cst_40 : f32 to vector<64x1xf32>
    %79 = arith.divf %77, %78 : vector<64x1xf32>
    %80 = vector.broadcast %79 : vector<64x1xf32> to vector<64x256xf32>
    %81 = arith.subf %75, %80 : vector<64x256xf32>
    %82 = arith.mulf %81, %81 : vector<64x256xf32>
    %cst_41 = arith.constant dense<0.000000e+00> : vector<64xf32>
    %83 = vector.multi_reduction <add>, %82, %cst_41 [1] : vector<64x256xf32> to vector<64xf32>
    %84 = vector.shape_cast %83 : vector<64xf32> to vector<64x1xf32>
    %cst_42 = arith.constant 2.560000e+02 : f32
    %85 = vector.broadcast %cst_42 : f32 to vector<64x1xf32>
    %86 = arith.divf %84, %85 : vector<64x1xf32>
    %cst_43 = arith.constant 9.99999974E-6 : f32
    %87 = vector.broadcast %cst_43 : f32 to vector<64x1xf32>
    %88 = arith.addf %86, %87 : vector<64x1xf32>
    %89 = math.rsqrt %88 : vector<64x1xf32>
    %90 = vector.broadcast %89 : vector<64x1xf32> to vector<64x256xf32>
    %91 = arith.mulf %81, %90 : vector<64x256xf32>
    %cst_44 = arith.constant 0.000000e+00 : f32
    %92 = vector.broadcast %cst_44 : f32 to vector<64x256xf32>
    %93 = arith.maximumf %91, %92 : vector<64x256xf32>
    %c0_45 = arith.constant 0 : index
    %c0_46 = arith.constant 0 : index
    %94 = vector.load %arg10[%c0_45, %c0_46] : memref<64x64xf32, #tpu.memory_space<vmem>>, vector<64x64xf32>
    %cst_47 = arith.constant dense<0.000000e+00> : vector<64x256xf32>
    %95 = tpu.matmul %94, %93, %cst_47 {dimension_numbers = #tpu.dot_dimension_numbers<[1], [0], [0], [1], [0, 0, 1, 1], [], []>} : vector<64x64xf32>, vector<64x256xf32>, vector<64x256xf32> -> vector<64x256xf32>
    %c0_48 = arith.constant 0 : index
    %c0_49 = arith.constant 0 : index
    %96 = vector.load %arg11[%c0_48, %c0_49] : memref<64x1xf32, #tpu.memory_space<vmem>>, vector<64x1xf32>
    %97 = vector.broadcast %96 : vector<64x1xf32> to vector<64x256xf32>
    %98 = arith.addf %95, %97 : vector<64x256xf32>
    %cst_50 = arith.constant dense<0.000000e+00> : vector<64xf32>
    %99 = vector.multi_reduction <add>, %98, %cst_50 [1] : vector<64x256xf32> to vector<64xf32>
    %100 = vector.shape_cast %99 : vector<64xf32> to vector<64x1xf32>
    %cst_51 = arith.constant 2.560000e+02 : f32
    %101 = vector.broadcast %cst_51 : f32 to vector<64x1xf32>
    %102 = arith.divf %100, %101 : vector<64x1xf32>
    %103 = vector.broadcast %102 : vector<64x1xf32> to vector<64x256xf32>
    %104 = arith.subf %98, %103 : vector<64x256xf32>
    %105 = arith.mulf %104, %104 : vector<64x256xf32>
    %cst_52 = arith.constant dense<0.000000e+00> : vector<64xf32>
    %106 = vector.multi_reduction <add>, %105, %cst_52 [1] : vector<64x256xf32> to vector<64xf32>
    %107 = vector.shape_cast %106 : vector<64xf32> to vector<64x1xf32>
    %cst_53 = arith.constant 2.560000e+02 : f32
    %108 = vector.broadcast %cst_53 : f32 to vector<64x1xf32>
    %109 = arith.divf %107, %108 : vector<64x1xf32>
    %cst_54 = arith.constant 9.99999974E-6 : f32
    %110 = vector.broadcast %cst_54 : f32 to vector<64x1xf32>
    %111 = arith.addf %109, %110 : vector<64x1xf32>
    %112 = math.rsqrt %111 : vector<64x1xf32>
    %113 = vector.broadcast %112 : vector<64x1xf32> to vector<64x256xf32>
    %114 = arith.mulf %104, %113 : vector<64x256xf32>
    %cst_55 = arith.constant 0.000000e+00 : f32
    %115 = vector.broadcast %cst_55 : f32 to vector<64x256xf32>
    %116 = arith.maximumf %114, %115 : vector<64x256xf32>
    %c0_56 = arith.constant 0 : index
    %c0_57 = arith.constant 0 : index
    %117 = vector.load %arg12[%c0_56, %c0_57] : memref<2x64xf32, #tpu.memory_space<vmem>>, vector<2x64xf32>
    %cst_58 = arith.constant dense<0.000000e+00> : vector<2x256xf32>
    %118 = tpu.matmul %117, %116, %cst_58 {dimension_numbers = #tpu.dot_dimension_numbers<[1], [0], [0], [1], [0, 0, 1, 1], [], []>} : vector<2x64xf32>, vector<64x256xf32>, vector<2x256xf32> -> vector<2x256xf32>
    %c0_59 = arith.constant 0 : index
    %c0_60 = arith.constant 0 : index
    %119 = vector.load %arg13[%c0_59, %c0_60] : memref<2x1xf32, #tpu.memory_space<vmem>>, vector<2x1xf32>
    %120 = vector.broadcast %119 : vector<2x1xf32> to vector<2x256xf32>
    %121 = arith.addf %118, %120 : vector<2x256xf32>
    %c0_61 = arith.constant 0 : index
    %c0_62 = arith.constant 0 : index
    %c0_63 = arith.constant 0 : index
    %122 = vector.load %arg14[%c0_61, %c0_62, %c0_63] : memref<2x2x256xf32, #tpu.memory_space<vmem>>, vector<1x2x256xf32>
    %123 = vector.shape_cast %122 : vector<1x2x256xf32> to vector<2x256xf32>
    %124 = vector.shape_cast %121 : vector<2x256xf32> to vector<1x2x256xf32>
    tpu.vector_store %arg14[%c0_61, %c0_62, %c0_63], %124 {strides = array<i32>} : memref<2x2x256xf32, #tpu.memory_space<vmem>>, vector<1x2x256xf32>,
    %c1 = arith.constant 1 : index
    %c0_64 = arith.constant 0 : index
    %c0_65 = arith.constant 0 : index
    %125 = vector.load %arg1[%c1, %c0_64, %c0_65] : memref<2x4x256xf32, #tpu.memory_space<vmem>>, vector<1x4x256xf32>
    %126 = vector.shape_cast %125 : vector<1x4x256xf32> to vector<4x256xf32>
    %c0_66 = arith.constant 0 : index
    %c0_67 = arith.constant 0 : index
    %127 = vector.load %arg2[%c0_66, %c0_67] : memref<64x4xf32, #tpu.memory_space<vmem>>, vector<64x4xf32>
    %cst_68 = arith.constant dense<0.000000e+00> : vector<64x256xf32>
    %128 = tpu.matmul %127, %126, %cst_68 {dimension_numbers = #tpu.dot_dimension_numbers<[1], [0], [0], [1], [0, 0, 1, 1], [], []>} : vector<64x4xf32>, vector<4x256xf32>, vector<64x256xf32> -> vector<64x256xf32>
    %c0_69 = arith.constant 0 : index
    %c0_70 = arith.constant 0 : index
    %129 = vector.load %arg3[%c0_69, %c0_70] : memref<64x1xf32, #tpu.memory_space<vmem>>, vector<64x1xf32>
    %130 = vector.broadcast %129 : vector<64x1xf32> to vector<64x256xf32>
    %131 = arith.addf %128, %130 : vector<64x256xf32>
    %cst_71 = arith.constant dense<0.000000e+00> : vector<64xf32>
    %132 = vector.multi_reduction <add>, %131, %cst_71 [1] : vector<64x256xf32> to vector<64xf32>
    %133 = vector.shape_cast %132 : vector<64xf32> to vector<64x1xf32>
    %cst_72 = arith.constant 2.560000e+02 : f32
    %134 = vector.broadcast %cst_72 : f32 to vector<64x1xf32>
    %135 = arith.divf %133, %134 : vector<64x1xf32>
    %136 = vector.broadcast %135 : vector<64x1xf32> to vector<64x256xf32>
    %137 = arith.subf %131, %136 : vector<64x256xf32>
    %138 = arith.mulf %137, %137 : vector<64x256xf32>
    %cst_73 = arith.constant dense<0.000000e+00> : vector<64xf32>
    %139 = vector.multi_reduction <add>, %138, %cst_73 [1] : vector<64x256xf32> to vector<64xf32>
    %140 = vector.shape_cast %139 : vector<64xf32> to vector<64x1xf32>
    %cst_74 = arith.constant 2.560000e+02 : f32
    %141 = vector.broadcast %cst_74 : f32 to vector<64x1xf32>
    %142 = arith.divf %140, %141 : vector<64x1xf32>
    %cst_75 = arith.constant 9.99999974E-6 : f32
    %143 = vector.broadcast %cst_75 : f32 to vector<64x1xf32>
    %144 = arith.addf %142, %143 : vector<64x1xf32>
    %145 = math.rsqrt %144 : vector<64x1xf32>
    %146 = vector.broadcast %145 : vector<64x1xf32> to vector<64x256xf32>
    %147 = arith.mulf %137, %146 : vector<64x256xf32>
    %cst_76 = arith.constant 0.000000e+00 : f32
    %148 = vector.broadcast %cst_76 : f32 to vector<64x256xf32>
    %149 = arith.maximumf %147, %148 : vector<64x256xf32>
    %c0_77 = arith.constant 0 : index
    %c0_78 = arith.constant 0 : index
    %150 = vector.load %arg4[%c0_77, %c0_78] : memref<64x64xf32, #tpu.memory_space<vmem>>, vector<64x64xf32>
    %cst_79 = arith.constant dense<0.000000e+00> : vector<64x256xf32>
    %151 = tpu.matmul %150, %149, %cst_79 {dimension_numbers = #tpu.dot_dimension_numbers<[1], [0], [0], [1], [0, 0, 1, 1], [], []>} : vector<64x64xf32>, vector<64x256xf32>, vector<64x256xf32> -> vector<64x256xf32>
    %c0_80 = arith.constant 0 : index
    %c0_81 = arith.constant 0 : index
    %152 = vector.load %arg5[%c0_80, %c0_81] : memref<64x1xf32, #tpu.memory_space<vmem>>, vector<64x1xf32>
    %153 = vector.broadcast %152 : vector<64x1xf32> to vector<64x256xf32>
    %154 = arith.addf %151, %153 : vector<64x256xf32>
    %cst_82 = arith.constant dense<0.000000e+00> : vector<64xf32>
    %155 = vector.multi_reduction <add>, %154, %cst_82 [1] : vector<64x256xf32> to vector<64xf32>
    %156 = vector.shape_cast %155 : vector<64xf32> to vector<64x1xf32>
    %cst_83 = arith.constant 2.560000e+02 : f32
    %157 = vector.broadcast %cst_83 : f32 to vector<64x1xf32>
    %158 = arith.divf %156, %157 : vector<64x1xf32>
    %159 = vector.broadcast %158 : vector<64x1xf32> to vector<64x256xf32>
    %160 = arith.subf %154, %159 : vector<64x256xf32>
    %161 = arith.mulf %160, %160 : vector<64x256xf32>
    %cst_84 = arith.constant dense<0.000000e+00> : vector<64xf32>
    %162 = vector.multi_reduction <add>, %161, %cst_84 [1] : vector<64x256xf32> to vector<64xf32>
    %163 = vector.shape_cast %162 : vector<64xf32> to vector<64x1xf32>
    %cst_85 = arith.constant 2.560000e+02 : f32
    %164 = vector.broadcast %cst_85 : f32 to vector<64x1xf32>
    %165 = arith.divf %163, %164 : vector<64x1xf32>
    %cst_86 = arith.constant 9.99999974E-6 : f32
    %166 = vector.broadcast %cst_86 : f32 to vector<64x1xf32>
    %167 = arith.addf %165, %166 : vector<64x1xf32>
    %168 = math.rsqrt %167 : vector<64x1xf32>
    %169 = vector.broadcast %168 : vector<64x1xf32> to vector<64x256xf32>
    %170 = arith.mulf %160, %169 : vector<64x256xf32>
    %cst_87 = arith.constant 0.000000e+00 : f32
    %171 = vector.broadcast %cst_87 : f32 to vector<64x256xf32>
    %172 = arith.maximumf %170, %171 : vector<64x256xf32>
    %c0_88 = arith.constant 0 : index
    %c0_89 = arith.constant 0 : index
    %173 = vector.load %arg6[%c0_88, %c0_89] : memref<64x64xf32, #tpu.memory_space<vmem>>, vector<64x64xf32>
    %cst_90 = arith.constant dense<0.000000e+00> : vector<64x256xf32>
    %174 = tpu.matmul %173, %172, %cst_90 {dimension_numbers = #tpu.dot_dimension_numbers<[1], [0], [0], [1], [0, 0, 1, 1], [], []>} : vector<64x64xf32>, vector<64x256xf32>, vector<64x256xf32> -> vector<64x256xf32>
    %c0_91 = arith.constant 0 : index
    %c0_92 = arith.constant 0 : index
    %175 = vector.load %arg7[%c0_91, %c0_92] : memref<64x1xf32, #tpu.memory_space<vmem>>, vector<64x1xf32>
    %176 = vector.broadcast %175 : vector<64x1xf32> to vector<64x256xf32>
    %177 = arith.addf %174, %176 : vector<64x256xf32>
    %cst_93 = arith.constant dense<0.000000e+00> : vector<64xf32>
    %178 = vector.multi_reduction <add>, %177, %cst_93 [1] : vector<64x256xf32> to vector<64xf32>
    %179 = vector.shape_cast %178 : vector<64xf32> to vector<64x1xf32>
    %cst_94 = arith.constant 2.560000e+02 : f32
    %180 = vector.broadcast %cst_94 : f32 to vector<64x1xf32>
    %181 = arith.divf %179, %180 : vector<64x1xf32>
    %182 = vector.broadcast %181 : vector<64x1xf32> to vector<64x256xf32>
    %183 = arith.subf %177, %182 : vector<64x256xf32>
    %184 = arith.mulf %183, %183 : vector<64x256xf32>
    %cst_95 = arith.constant dense<0.000000e+00> : vector<64xf32>
    %185 = vector.multi_reduction <add>, %184, %cst_95 [1] : vector<64x256xf32> to vector<64xf32>
    %186 = vector.shape_cast %185 : vector<64xf32> to vector<64x1xf32>
    %cst_96 = arith.constant 2.560000e+02 : f32
    %187 = vector.broadcast %cst_96 : f32 to vector<64x1xf32>
    %188 = arith.divf %186, %187 : vector<64x1xf32>
    %cst_97 = arith.constant 9.99999974E-6 : f32
    %189 = vector.broadcast %cst_97 : f32 to vector<64x1xf32>
    %190 = arith.addf %188, %189 : vector<64x1xf32>
    %191 = math.rsqrt %190 : vector<64x1xf32>
    %192 = vector.broadcast %191 : vector<64x1xf32> to vector<64x256xf32>
    %193 = arith.mulf %183, %192 : vector<64x256xf32>
    %cst_98 = arith.constant 0.000000e+00 : f32
    %194 = vector.broadcast %cst_98 : f32 to vector<64x256xf32>
    %195 = arith.maximumf %193, %194 : vector<64x256xf32>
    %c0_99 = arith.constant 0 : index
    %c0_100 = arith.constant 0 : index
    %196 = vector.load %arg8[%c0_99, %c0_100] : memref<64x64xf32, #tpu.memory_space<vmem>>, vector<64x64xf32>
    %cst_101 = arith.constant dense<0.000000e+00> : vector<64x256xf32>
    %197 = tpu.matmul %196, %195, %cst_101 {dimension_numbers = #tpu.dot_dimension_numbers<[1], [0], [0], [1], [0, 0, 1, 1], [], []>} : vector<64x64xf32>, vector<64x256xf32>, vector<64x256xf32> -> vector<64x256xf32>
    %c0_102 = arith.constant 0 : index
    %c0_103 = arith.constant 0 : index
    %198 = vector.load %arg9[%c0_102, %c0_103] : memref<64x1xf32, #tpu.memory_space<vmem>>, vector<64x1xf32>
    %199 = vector.broadcast %198 : vector<64x1xf32> to vector<64x256xf32>
    %200 = arith.addf %197, %199 : vector<64x256xf32>
    %cst_104 = arith.constant dense<0.000000e+00> : vector<64xf32>
    %201 = vector.multi_reduction <add>, %200, %cst_104 [1] : vector<64x256xf32> to vector<64xf32>
    %202 = vector.shape_cast %201 : vector<64xf32> to vector<64x1xf32>
    %cst_105 = arith.constant 2.560000e+02 : f32
    %203 = vector.broadcast %cst_105 : f32 to vector<64x1xf32>
    %204 = arith.divf %202, %203 : vector<64x1xf32>
    %205 = vector.broadcast %204 : vector<64x1xf32> to vector<64x256xf32>
    %206 = arith.subf %200, %205 : vector<64x256xf32>
    %207 = arith.mulf %206, %206 : vector<64x256xf32>
    %cst_106 = arith.constant dense<0.000000e+00> : vector<64xf32>
    %208 = vector.multi_reduction <add>, %207, %cst_106 [1] : vector<64x256xf32> to vector<64xf32>
    %209 = vector.shape_cast %208 : vector<64xf32> to vector<64x1xf32>
    %cst_107 = arith.constant 2.560000e+02 : f32
    %210 = vector.broadcast %cst_107 : f32 to vector<64x1xf32>
    %211 = arith.divf %209, %210 : vector<64x1xf32>
    %cst_108 = arith.constant 9.99999974E-6 : f32
    %212 = vector.broadcast %cst_108 : f32 to vector<64x1xf32>
    %213 = arith.addf %211, %212 : vector<64x1xf32>
    %214 = math.rsqrt %213 : vector<64x1xf32>
    %215 = vector.broadcast %214 : vector<64x1xf32> to vector<64x256xf32>
    %216 = arith.mulf %206, %215 : vector<64x256xf32>
    %cst_109 = arith.constant 0.000000e+00 : f32
    %217 = vector.broadcast %cst_109 : f32 to vector<64x256xf32>
    %218 = arith.maximumf %216, %217 : vector<64x256xf32>
    %c0_110 = arith.constant 0 : index
    %c0_111 = arith.constant 0 : index
    %219 = vector.load %arg10[%c0_110, %c0_111] : memref<64x64xf32, #tpu.memory_space<vmem>>, vector<64x64xf32>
    %cst_112 = arith.constant dense<0.000000e+00> : vector<64x256xf32>
    %220 = tpu.matmul %219, %218, %cst_112 {dimension_numbers = #tpu.dot_dimension_numbers<[1], [0], [0], [1], [0, 0, 1, 1], [], []>} : vector<64x64xf32>, vector<64x256xf32>, vector<64x256xf32> -> vector<64x256xf32>
    %c0_113 = arith.constant 0 : index
    %c0_114 = arith.constant 0 : index
    %221 = vector.load %arg11[%c0_113, %c0_114] : memref<64x1xf32, #tpu.memory_space<vmem>>, vector<64x1xf32>
    %222 = vector.broadcast %221 : vector<64x1xf32> to vector<64x256xf32>
    %223 = arith.addf %220, %222 : vector<64x256xf32>
    %cst_115 = arith.constant dense<0.000000e+00> : vector<64xf32>
    %224 = vector.multi_reduction <add>, %223, %cst_115 [1] : vector<64x256xf32> to vector<64xf32>
    %225 = vector.shape_cast %224 : vector<64xf32> to vector<64x1xf32>
    %cst_116 = arith.constant 2.560000e+02 : f32
    %226 = vector.broadcast %cst_116 : f32 to vector<64x1xf32>
    %227 = arith.divf %225, %226 : vector<64x1xf32>
    %228 = vector.broadcast %227 : vector<64x1xf32> to vector<64x256xf32>
    %229 = arith.subf %223, %228 : vector<64x256xf32>
    %230 = arith.mulf %229, %229 : vector<64x256xf32>
    %cst_117 = arith.constant dense<0.000000e+00> : vector<64xf32>
    %231 = vector.multi_reduction <add>, %230, %cst_117 [1] : vector<64x256xf32> to vector<64xf32>
    %232 = vector.shape_cast %231 : vector<64xf32> to vector<64x1xf32>
    %cst_118 = arith.constant 2.560000e+02 : f32
    %233 = vector.broadcast %cst_118 : f32 to vector<64x1xf32>
    %234 = arith.divf %232, %233 : vector<64x1xf32>
    %cst_119 = arith.constant 9.99999974E-6 : f32
    %235 = vector.broadcast %cst_119 : f32 to vector<64x1xf32>
    %236 = arith.addf %234, %235 : vector<64x1xf32>
    %237 = math.rsqrt %236 : vector<64x1xf32>
    %238 = vector.broadcast %237 : vector<64x1xf32> to vector<64x256xf32>
    %239 = arith.mulf %229, %238 : vector<64x256xf32>
    %cst_120 = arith.constant 0.000000e+00 : f32
    %240 = vector.broadcast %cst_120 : f32 to vector<64x256xf32>
    %241 = arith.maximumf %239, %240 : vector<64x256xf32>
    %c0_121 = arith.constant 0 : index
    %c0_122 = arith.constant 0 : index
    %242 = vector.load %arg12[%c0_121, %c0_122] : memref<2x64xf32, #tpu.memory_space<vmem>>, vector<2x64xf32>
    %cst_123 = arith.constant dense<0.000000e+00> : vector<2x256xf32>
    %243 = tpu.matmul %242, %241, %cst_123 {dimension_numbers = #tpu.dot_dimension_numbers<[1], [0], [0], [1], [0, 0, 1, 1], [], []>} : vector<2x64xf32>, vector<64x256xf32>, vector<2x256xf32> -> vector<2x256xf32>
    %c0_124 = arith.constant 0 : index
    %c0_125 = arith.constant 0 : index
    %244 = vector.load %arg13[%c0_124, %c0_125] : memref<2x1xf32, #tpu.memory_space<vmem>>, vector<2x1xf32>
    %245 = vector.broadcast %244 : vector<2x1xf32> to vector<2x256xf32>
    %246 = arith.addf %243, %245 : vector<2x256xf32>
    %c1_126 = arith.constant 1 : index
    %c0_127 = arith.constant 0 : index
    %c0_128 = arith.constant 0 : index
    %247 = vector.load %arg14[%c1_126, %c0_127, %c0_128] : memref<2x2x256xf32, #tpu.memory_space<vmem>>, vector<1x2x256xf32>
    %248 = vector.shape_cast %247 : vector<1x2x256xf32> to vector<2x256xf32>
    %249 = vector.shape_cast %246 : vector<2x256xf32> to vector<1x2x256xf32>
    tpu.vector_store %arg14[%c1_126, %c0_127, %c0_128], %249 {strides = array<i32>} : memref<2x2x256xf32, #tpu.memory_space<vmem>>, vector<1x2x256xf32>,
    return
  }
  func.func @transform_0(%arg0: i32) -> (i32, i32, i32) {
    %c0_i32 = arith.constant 0 : i32
    %c0_i32_0 = arith.constant 0 : i32
    %c0_i32_1 = arith.constant 0 : i32
    return %arg0, %c0_i32, %c0_i32_0 : i32, i32, i32
  }
  func.func @transform_1(%arg0: i32) -> (i32, i32) {
    %c0_i32 = arith.constant 0 : i32
    %c0_i32_0 = arith.constant 0 : i32
    %c0_i32_1 = arith.constant 0 : i32
    return %c0_i32, %c0_i32_0 : i32, i32
  }
  func.func @transform_2(%arg0: i32) -> (i32, i32) {
    %c0_i32 = arith.constant 0 : i32
    %c0_i32_0 = arith.constant 0 : i32
    %c0_i32_1 = arith.constant 0 : i32
    return %c0_i32, %c0_i32_0 : i32, i32
  }
  func.func @transform_3(%arg0: i32) -> (i32, i32) {
    %c0_i32 = arith.constant 0 : i32
    %c0_i32_0 = arith.constant 0 : i32
    %c0_i32_1 = arith.constant 0 : i32
    return %c0_i32, %c0_i32_0 : i32, i32
  }
  func.func @transform_4(%arg0: i32) -> (i32, i32) {
    %c0_i32 = arith.constant 0 : i32
    %c0_i32_0 = arith.constant 0 : i32
    %c0_i32_1 = arith.constant 0 : i32
    return %c0_i32, %c0_i32_0 : i32, i32
  }
  func.func @transform_5(%arg0: i32) -> (i32, i32) {
    %c0_i32 = arith.constant 0 : i32
    %c0_i32_0 = arith.constant 0 : i32
    %c0_i32_1 = arith.constant 0 : i32
    return %c0_i32, %c0_i32_0 : i32, i32
  }
  func.func @transform_6(%arg0: i32) -> (i32, i32) {
    %c0_i32 = arith.constant 0 : i32
    %c0_i32_0 = arith.constant 0 : i32
    %c0_i32_1 = arith.constant 0 : i32
    return %c0_i32, %c0_i32_0 : i32, i32
  }
  func.func @transform_7(%arg0: i32) -> (i32, i32) {
    %c0_i32 = arith.constant 0 : i32
    %c0_i32_0 = arith.constant 0 : i32
    %c0_i32_1 = arith.constant 0 : i32
    return %c0_i32, %c0_i32_0 : i32, i32
  }
  func.func @transform_8(%arg0: i32) -> (i32, i32) {
    %c0_i32 = arith.constant 0 : i32
    %c0_i32_0 = arith.constant 0 : i32
    %c0_i32_1 = arith.constant 0 : i32
    return %c0_i32, %c0_i32_0 : i32, i32
  }
  func.func @transform_9(%arg0: i32) -> (i32, i32) {
    %c0_i32 = arith.constant 0 : i32
    %c0_i32_0 = arith.constant 0 : i32
    %c0_i32_1 = arith.constant 0 : i32
    return %c0_i32, %c0_i32_0 : i32, i32
  }
  func.func @transform_10(%arg0: i32) -> (i32, i32) {
    %c0_i32 = arith.constant 0 : i32
    %c0_i32_0 = arith.constant 0 : i32
    %c0_i32_1 = arith.constant 0 : i32
    return %c0_i32, %c0_i32_0 : i32, i32
  }
  func.func @transform_11(%arg0: i32) -> (i32, i32) {
    %c0_i32 = arith.constant 0 : i32
    %c0_i32_0 = arith.constant 0 : i32
    %c0_i32_1 = arith.constant 0 : i32
    return %c0_i32, %c0_i32_0 : i32, i32
  }
  func.func @transform_12(%arg0: i32) -> (i32, i32) {
    %c0_i32 = arith.constant 0 : i32
    %c0_i32_0 = arith.constant 0 : i32
    %c0_i32_1 = arith.constant 0 : i32
    return %c0_i32, %c0_i32_0 : i32, i32
  }
  func.func @transform_13(%arg0: i32) -> (i32, i32, i32) {
    %c0_i32 = arith.constant 0 : i32
    %c0_i32_0 = arith.constant 0 : i32
    %c0_i32_1 = arith.constant 0 : i32
    return %arg0, %c0_i32, %c0_i32_0 : i32, i32, i32
  }
}

</mosaic_0001>

<bundles_post_ra>
// kernel: tpu_custom_call.1
= control target key start
LH: loop header
LB: loop body
LE: loop exit
PB: predicated region body
PF: predicated region fallthrough
CT: control target
= control target key end

     0   :  { %vm129_vm0 = vcmask 1043456   ;;  %v4079_v2 = vmov 0.0   ;;  %vm104_vm1 = vcmask 31744   ;;  %v4080_v4 = vmov 0   ;;  %s5638_s0 = inlined_call_operand.vmem [shape: f32[2,4,256], index: 0, kind: input, shape index: {}]   ;;  %s5639_s1 = inlined_call_operand.vmem [shape: f32[64,4], index: 1, kind: input, shape index: {}]   ;;  %s5640_s2 = inlined_call_operand.vmem [shape: f32[64,1], index: 2, kind: input, shape index: {}]   ;;  %s5641_s3 = inlined_call_operand.vmem [shape: f32[64,64], index: 3, kind: input, shape index: {}]   ;;  %s5642_s4 = inlined_call_operand.vmem [shape: f32[64,1], index: 4, kind: input, shape index: {}]   ;;  %s5643_s5 = inlined_call_operand.vmem [shape: f32[64,64], index: 5, kind: input, shape index: {}]   ;;  %s5644_s6 = inlined_call_operand.vmem [shape: f32[64,1], index: 6, kind: input, shape index: {}]   ;;  %s5645_s7 = inlined_call_operand.vmem [shape: f32[64,64], index: 7, kind: input, shape index: {}]   ;;  %s5646_s8 = inlined_call_operand.vmem [shape: f32[64,1], index: 8, kind: input, shape index: {}]   ;;  %s5647_s9 = inlined_call_operand.vmem [shape: f32[64,64], index: 9, kind: input, shape index: {}]   ;;  %s5648_s10 = inlined_call_operand.vmem [shape: f32[64,1], index: 10, kind: input, shape index: {}]   ;;  %s5649_s11 = inlined_call_operand.vmem [shape: f32[2,64], index: 11, kind: input, shape index: {}]   ;;  %s5650_s12 = inlined_call_operand.vmem [shape: f32[2,1], index: 12, kind: input, shape index: {}]   ;;  %s5651_s13 = inlined_call_operand.hbm [shape: f32[2,2,256], index: 13, kind: output, shape index: {}]  }
   0x1   :  { %v45_v0 = vld [vmem:[%s5638_s0] sm:$0xff]  ;;  %198 = vmatprep.mubr.f32.mxu0 %v4079_v2  ;;  %537 = vmatprep.mubr.f32.mxu1 %v4079_v2  ;;  %v56_v6 = vld [vmem:[%s5640_s2 + $0x10] sm:$0xff]  ;;  %v55_v7 = vld [vmem:[%s5640_s2 + $0x8] sm:$0xff] }
   0x2   :  { %v103_v1 = vcombine.high %v45_v0, %v45_v0  ;;  %v46_v3 = vld [vmem:[%s5639_s1] sm:$0xff]  ;;  %3891 = vset.pattern.permute.xlu0 %v4080_v4  ;;  %3892 = vset.pattern.permute.xlu1 %v4080_v4 }
   0x3   :  { %v54_v5 = vld [vmem:[%s5640_s2] sm:$0xff]  ;;  %74 = vperm.xlu1 %3892, %v56_v6  }
   0x4   :  { %3637 = vmatprep.subr.msk.mxu0 %vm129_vm0, %v103_v1  ;;  %64 = vperm.xlu0 %3891, %v54_v5  }
   0x5   :  { %3638 = vmatpush1.msk.msra.mxu0 %vm129_vm0, %v45_v0 }
   0x6   :  { %3639 = vmatmul.mubr.msk.f32.vlgmr.msra.gmra.mrb[0].mxu0 %vm104_vm1, %v46_v3 }
   0x7   :  { %18 = vsyncpa [#allocation3], 0  ;;  %204 = vmatprep.mubr.f32.mxu0 %v4079_v2  ;;  %v47_v8 = vld [vmem:[%s5639_s1 + $0x8] sm:$0xff]  ;;  %v57_v9 = vld [vmem:[%s5640_s2 + $0x18] sm:$0xff]  ;;  %vm448_vm2 = vcmask 523264  }
   0x8   :  { %69 = vperm.xlu0 %3891, %v55_v7   ;;  %79 = vperm.xlu1 %3892, %v57_v9   ;;  %v58_v10 = vld [vmem:[%s5640_s2 + $0x20] sm:$0xff]  ;;  %v48_v11 = vld [vmem:[%s5639_s1 + $0x10] sm:$0xff]  ;;  %v59_v12 = vld [vmem:[%s5640_s2 + $0x28] sm:$0xff] }
   0x9   :  { %v60_v13 = vld [vmem:[%s5640_s2 + $0x30] sm:$0xff]  ;;  %v49_v14 = vld [vmem:[%s5639_s1 + $0x18] sm:$0xff]  ;;  %v50_v16 = vld [vmem:[%s5639_s1 + $0x20] sm:$0xff] }
   0xa   :  { %3640 = vmatmul.mubr.msk.f32.gmra.mrb[2].mxu0 %vm104_vm1, %v47_v8  ;;  %v61_v15 = vld [vmem:[%s5640_s2 + $0x38] sm:$0xff]  ;;  %v51_v17 = vld [vmem:[%s5639_s1 + $0x28] sm:$0xff]  ;;  %v52_v18 = vld [vmem:[%s5639_s1 + $0x30] sm:$0xff] }
   0xb   :  { %210 = vmatprep.mubr.f32.mxu0 %v4079_v2  ;;  %v53_v19 = vld [vmem:[%s5639_s1 + $0x38] sm:$0xff] }
   0xc   :  { %84 = vperm.xlu0 %3891, %v58_v10   ;;  %89 = vperm.xlu1 %3892, %v59_v12  }
   0xe   :  { %3641 = vmatmul.mubr.msk.f32.gmra.mrb[4].mxu0 %vm104_vm1, %v48_v11 }
   0xf   :  { %216 = vmatprep.mubr.f32.mxu0 %v4079_v2 }
  0x10   :  { %94 = vperm.xlu0 %3891, %v60_v13   ;;  %99 = vperm.xlu1 %3892, %v61_v15  }
  0x12   :  { %3642 = vmatmul.mubr.msk.f32.gmra.mrb[6].mxu0 %vm104_vm1, %v49_v14 }
  0x13   :  { %222 = vmatprep.mubr.f32.mxu0 %v4079_v2 }
  0x16   :  { %3643 = vmatmul.mubr.msk.f32.gmra.mrb[8].mxu0 %vm104_vm1, %v50_v16 }
  0x17   :  { %228 = vmatprep.mubr.f32.mxu0 %v4079_v2 }
  0x1a   :  { %3644 = vmatmul.mubr.msk.f32.gmra.mrb[10].mxu0 %vm104_vm1, %v51_v17 }
  0x1b   :  { %234 = vmatprep.mubr.f32.mxu0 %v4079_v2 }
  0x1e   :  { %3645 = vmatmul.mubr.msk.f32.gmra.mrb[12].mxu0 %vm104_vm1, %v52_v18 }
  0x1f   :  { %240 = vmatprep.mubr.f32.mxu0 %v4079_v2 }
  0x22   :  { %3646 = vmatmul.mubr.msk.f32.gmra.mrb[14].mxu0 %vm104_vm1, %v53_v19 }
  0x23   :  { %874 = vmatprep.mubr.f32.mxu0 %v4079_v2 }
  0x82   :  { %v75_v30 = vpop.permute.xlu1 %74 }
  0x83   :  { %v65_v20 = vpop.permute.xlu0 %64 }
  0x87   :  { %v70_v25 = vpop.permute.xlu0 %69  ;;  %v80_v37 = vpop.permute.xlu1 %79 }
  0x8b   :  { %v85_v43 = vpop.permute.xlu0 %84  ;;  %v90_v49 = vpop.permute.xlu1 %89 }
  0x8f   :  { %v95_v55 = vpop.permute.xlu0 %94  ;;  %v100_v61 = vpop.permute.xlu1 %99 }
  0xd9   :  { %v200_v21 = vpop.f32.mrb[0].mxu0 }
  0xda   :  { %v201_v22 = vadd.f32 %v200_v21, %v65_v20  ;;  %v202_v23 = vpop.f32.mrb[1].mxu0 }
  0xdb   :  { %v203_v24 = vadd.f32 %v202_v23, %v65_v20 }
  0xdd   :  { %v206_v26 = vpop.f32.mrb[2].mxu0  ;;  %v247_v27 = vadd.f32 %v203_v24, %v201_v22 }
  0xde   :  { %v207_v28 = vadd.f32 %v206_v26, %v70_v25  ;;  %v208_v29 = vpop.f32.mrb[3].mxu0 }
  0xdf   :  { %v209_v31 = vadd.f32 %v208_v29, %v70_v25  ;;  %248 = vadd.xlane.f32.xlu0 %v247_v27 }
  0xe1   :  { %v212_v32 = vpop.f32.mrb[4].mxu0  ;;  %v250_v33 = vadd.f32 %v209_v31, %v207_v28 }
  0xe2   :  { %v213_v34 = vadd.f32 %v212_v32, %v75_v30  ;;  %v214_v35 = vpop.f32.mrb[5].mxu0 }
  0xe3   :  { %v215_v36 = vadd.f32 %v214_v35, %v75_v30  ;;  %251 = vadd.xlane.f32.xlu1 %v250_v33 }
  0xe5   :  { %v218_v38 = vpop.f32.mrb[6].mxu0  ;;  %v253_v39 = vadd.f32 %v215_v36, %v213_v34 }
  0xe6   :  { %v219_v40 = vadd.f32 %v218_v38, %v80_v37  ;;  %v220_v41 = vpop.f32.mrb[7].mxu0 }
  0xe7   :  { %v221_v42 = vadd.f32 %v220_v41, %v80_v37  ;;  %254 = vadd.xlane.f32.xlu0 %v253_v39 }
  0xe9   :  { %v224_v44 = vpop.f32.mrb[8].mxu0  ;;  %v256_v45 = vadd.f32 %v221_v42, %v219_v40 }
  0xea   :  { %v225_v46 = vadd.f32 %v224_v44, %v85_v43  ;;  %v226_v47 = vpop.f32.mrb[9].mxu0 }
  0xeb   :  { %v227_v48 = vadd.f32 %v226_v47, %v85_v43  ;;  %257 = vadd.xlane.f32.xlu0 %v256_v45 }
  0xed   :  { %v230_v50 = vpop.f32.mrb[10].mxu0  ;;  %v259_v51 = vadd.f32 %v227_v48, %v225_v46 }
  0xee   :  { %v231_v52 = vadd.f32 %v230_v50, %v90_v49  ;;  %v232_v53 = vpop.f32.mrb[11].mxu0 }
  0xef   :  { %v233_v54 = vadd.f32 %v232_v53, %v90_v49  ;;  %260 = vadd.xlane.f32.xlu1 %v259_v51 }
  0xf1   :  { %v236_v56 = vpop.f32.mrb[12].mxu0  ;;  %v262_v57 = vadd.f32 %v233_v54, %v231_v52 }
  0xf2   :  { %v237_v58 = vadd.f32 %v236_v56, %v95_v55  ;;  %v238_v59 = vpop.f32.mrb[13].mxu0 }
  0xf3   :  { %v239_v60 = vadd.f32 %v238_v59, %v95_v55  ;;  %263 = vadd.xlane.f32.xlu0 %v262_v57 }
  0xf5   :  { %v242_v62 = vpop.f32.mrb[14].mxu0  ;;  %v265_v63 = vadd.f32 %v239_v60, %v237_v58 }
  0xf6   :  { %v243_v0 = vadd.f32 %v242_v62, %v100_v61  ;;  %v244_v1 = vpop.f32.mrb[15].mxu0  ;;  %v402_v62 = vld [vmem:[%s5642_s4 + $0x10] sm:$0xff] }
  0xf7   :  { %v245_v3 = vadd.f32 %v244_v1, %v100_v61  ;;  %266 = vadd.xlane.f32.xlu1 %v265_v63  ;;  %v400_v61 = vld [vmem:[%s5642_s4] sm:$0xff]  ;;  %v403_v63 = vld [vmem:[%s5642_s4 + $0x18] sm:$0xff]  ;;  %v405_v1 = vld [vmem:[%s5642_s4 + $0x28] sm:$0xff] }
  0xf9   :  { %v268_v4 = vadd.f32 %v245_v3, %v243_v0 }
  0xfb   :  { %269 = vadd.xlane.f32.xlu0 %v268_v4  ;;  %v407_v4 = vld [vmem:[%s5642_s4 + $0x38] sm:$0xff] }
 0x16c   :  { %v249_v5 = vpop.xlane.xlu0 %248 }
 0x16d   :  { %v272_v6 = vmul.f32 0.00390625, %v249_v5  ;;  %v406_v5 = vld [vmem:[%s5642_s4 + $0x30] sm:$0xff] }
 0x16f   :  { %v4225_v7 = vsub.f32 %v201_v22, %v272_v6  ;;  %v4227_v8 = vsub.f32 %v203_v24, %v272_v6 }
 0x170   :  { %v252_v9 = vpop.xlane.xlu1 %251 }
 0x171   :  { %v273_v10 = vmul.f32 0.00390625, %v252_v9  ;;  %v296_v11 = vmul.f32 %v4225_v7, %v4225_v7  ;;  %v297_v12 = vmul.f32 %v4227_v8, %v4227_v8 }
 0x173   :  { %v4233_v13 = vsub.f32 %v207_v28, %v273_v10  ;;  %v4235_v14 = vsub.f32 %v209_v31, %v273_v10  ;;  %v312_v15 = vadd.f32 %v297_v12, %v296_v11 }
 0x174   :  { %v255_v16 = vpop.xlane.xlu0 %254 }
 0x175   :  { %v274_v17 = vmul.f32 0.00390625, %v255_v16  ;;  %313 = vadd.xlane.f32.xlu1 %v312_v15  ;;  %v298_v18 = vmul.f32 %v4233_v13, %v4233_v13  ;;  %v299_v19 = vmul.f32 %v4235_v14, %v4235_v14 }
 0x177   :  { %v4241_v20 = vsub.f32 %v213_v34, %v274_v17  ;;  %v4243_v21 = vsub.f32 %v215_v36, %v274_v17  ;;  %v315_v22 = vadd.f32 %v299_v19, %v298_v18 }
 0x178   :  { %v258_v23 = vpop.xlane.xlu0 %257 }
 0x179   :  { %v275_v24 = vmul.f32 0.00390625, %v258_v23  ;;  %316 = vadd.xlane.f32.xlu0 %v315_v22  ;;  %v300_v25 = vmul.f32 %v4241_v20, %v4241_v20  ;;  %v301_v26 = vmul.f32 %v4243_v21, %v4243_v21 }
 0x17b   :  { %v4249_v27 = vsub.f32 %v219_v40, %v275_v24  ;;  %v4251_v28 = vsub.f32 %v221_v42, %v275_v24  ;;  %v318_v29 = vadd.f32 %v301_v26, %v300_v25 }
 0x17c   :  { %v261_v30 = vpop.xlane.xlu1 %260 }
 0x17d   :  { %v276_v31 = vmul.f32 0.00390625, %v261_v30  ;;  %319 = vadd.xlane.f32.xlu1 %v318_v29  ;;  %v302_v32 = vmul.f32 %v4249_v27, %v4249_v27  ;;  %v303_v33 = vmul.f32 %v4251_v28, %v4251_v28 }
 0x17f   :  { %v4257_v34 = vsub.f32 %v225_v46, %v276_v31  ;;  %v4259_v35 = vsub.f32 %v227_v48, %v276_v31  ;;  %v321_v36 = vadd.f32 %v303_v33, %v302_v32 }
 0x180   :  { %v264_v37 = vpop.xlane.xlu0 %263 }
 0x181   :  { %v277_v38 = vmul.f32 0.00390625, %v264_v37  ;;  %322 = vadd.xlane.f32.xlu0 %v321_v36  ;;  %v304_v39 = vmul.f32 %v4257_v34, %v4257_v34  ;;  %v305_v40 = vmul.f32 %v4259_v35, %v4259_v35 }
 0x183   :  { %v4265_v41 = vsub.f32 %v231_v52, %v277_v38  ;;  %v4267_v42 = vsub.f32 %v233_v54, %v277_v38  ;;  %v324_v43 = vadd.f32 %v305_v40, %v304_v39 }
 0x184   :  { %v267_v44 = vpop.xlane.xlu1 %266 }
 0x185   :  { %v278_v45 = vmul.f32 0.00390625, %v267_v44  ;;  %325 = vadd.xlane.f32.xlu1 %v324_v43  ;;  %v306_v46 = vmul.f32 %v4265_v41, %v4265_v41  ;;  %v307_v47 = vmul.f32 %v4267_v42, %v4267_v42 }
 0x187   :  { %v4273_v48 = vsub.f32 %v237_v58, %v278_v45  ;;  %v4275_v49 = vsub.f32 %v239_v60, %v278_v45  ;;  %v327_v50 = vadd.f32 %v307_v47, %v306_v46 }
 0x188   :  { %v270_v51 = vpop.xlane.xlu0 %269 }
 0x189   :  { %v279_v52 = vmul.f32 0.00390625, %v270_v51  ;;  %328 = vadd.xlane.f32.xlu0 %v327_v50  ;;  %v308_v53 = vmul.f32 %v4273_v48, %v4273_v48  ;;  %v309_v54 = vmul.f32 %v4275_v49, %v4275_v49 }
 0x18b   :  { %v4281_v55 = vsub.f32 %v243_v0, %v279_v52  ;;  %v4283_v56 = vsub.f32 %v245_v3, %v279_v52  ;;  %v330_v57 = vadd.f32 %v309_v54, %v308_v53  ;;  %v401_v0 = vld [vmem:[%s5642_s4 + $0x8] sm:$0xff]  ;;  %v404_v3 = vld [vmem:[%s5642_s4 + $0x20] sm:$0xff] }
 0x18d   :  { %331 = vadd.xlane.f32.xlu1 %v330_v57  ;;  %v310_v58 = vmul.f32 %v4281_v55, %v4281_v55  ;;  %v311_v59 = vmul.f32 %v4283_v56, %v4283_v56 }
 0x18f   :  { %v333_v60 = vadd.f32 %v311_v59, %v310_v58 }
 0x191   :  { %334 = vadd.xlane.f32.xlu0 %v333_v60 }
 0x19e   :  { %410 = vperm.xlu1 %3892, %v400_v61  }
 0x1a2   :  { %420 = vperm.xlu1 %3892, %v402_v62  }
 0x1a6   :  { %425 = vperm.xlu1 %3892, %v403_v63  }
 0x1a7   :  { %415 = vperm.xlu0 %3891, %v401_v0  }
 0x1aa   :  { %435 = vperm.xlu1 %3892, %v405_v1  }
 0x1ab   :  { %430 = vperm.xlu0 %3891, %v404_v3  }
 0x1ae   :  { %445 = vperm.xlu1 %3892, %v407_v4  }
 0x1af   :  { %440 = vperm.xlu0 %3891, %v406_v5  }
 0x202   :  { %v314_v6 = vpop.xlane.xlu1 %313 }
 0x203   :  { %v336_v9 = vmul.f32 0.00390625, %v314_v6 }
 0x205   :  { %v344_v10 = vadd.f32 1e-05, %v336_v9 }
 0x206   :  { %v317_v11 = vpop.xlane.xlu0 %316 }
 0x207   :  { %3895 = vrsqrt.f32 %v344_v10  ;;  %v337_v12 = vmul.f32 0.00390625, %v317_v11 }
 0x209   :  { %v345_v15 = vadd.f32 1e-05, %v337_v12 }
 0x20a   :  { %v320_v16 = vpop.xlane.xlu1 %319 }
 0x20b   :  { %3897 = vrsqrt.f32 %v345_v15  ;;  %v338_v17 = vmul.f32 0.00390625, %v320_v16 }
 0x20d   :  { %v346_v18 = vadd.f32 1e-05, %v338_v17 }
 0x20e   :  { %v323_v19 = vpop.xlane.xlu0 %322 }
 0x20f   :  { %3899 = vrsqrt.f32 %v346_v18  ;;  %v339_v22 = vmul.f32 0.00390625, %v323_v19 }
 0x211   :  { %v3896_v23 = vpop.eup %3895  ;;  %v347_v24 = vadd.f32 1e-05, %v339_v22 }
 0x212   :  { %v326_v25 = vpop.xlane.xlu1 %325  ;;  %v361_v29 = vmul.f32 %v3896_v23, %v4227_v8  ;;  %v360_v30 = vmul.f32 %v3896_v23, %v4225_v7 }
 0x213   :  { %3901 = vrsqrt.f32 %v347_v24  ;;  %v340_v26 = vmul.f32 0.00390625, %v326_v25  ;;  %v396_v25 = vld [vmem:[%s5641_s3 + $0x20] sm:$0xff] }
 0x214   :  { %v377_v39 = vmax.f32 %v361_v29, 0.0  ;;  %v376_v43 = vmax.f32 %v360_v30, 0.0  ;;  %v398_v29 = vld [vmem:[%s5641_s3 + $0x30] sm:$0xff]  ;;  %v399_v30 = vld [vmem:[%s5641_s3 + $0x38] sm:$0xff] }
 0x215   :  { %v3898_v31 = vpop.eup %3897  ;;  %v348_v32 = vadd.f32 1e-05, %v340_v26  ;;  %v397_v26 = vld [vmem:[%s5641_s3 + $0x28] sm:$0xff] }
 0x216   :  { %v329_v33 = vpop.xlane.xlu0 %328  ;;  %v363_v36 = vmul.f32 %v3898_v31, %v4235_v14  ;;  %v362_v37 = vmul.f32 %v3898_v31, %v4233_v13 }
 0x217   :  { %3903 = vrsqrt.f32 %v348_v32  ;;  %v341_v38 = vmul.f32 0.00390625, %v329_v33 }
 0x218   :  { %v379_v40 = vmax.f32 %v363_v36, 0.0  ;;  %v378_v44 = vmax.f32 %v362_v37, 0.0 }
 0x219   :  { %v3900_v45 = vpop.eup %3899  ;;  %v349_v46 = vadd.f32 1e-05, %v341_v38 }
 0x21a   :  { %v332_v47 = vpop.xlane.xlu1 %331  ;;  %v3726_v50 = vpack.c.bf16 %v379_v40, %v377_v39  ;;  %v3728_v8 = vpack.c.bf16 %v378_v44, %v376_v43  ;;  %v365_v51 = vmul.f32 %v3900_v45, %v4243_v21  ;;  %v364_v14 = vmul.f32 %v3900_v45, %v4241_v20 }
 0x21b   :  { %3905 = vrsqrt.f32 %v349_v46  ;;  %v342_v7 = vmul.f32 0.00390625, %v332_v47 }
 0x21c   :  { %3727 = vmatprep.subr.bf16.mxu1 %v3726_v50  ;;  %v381_v59 = vmax.f32 %v365_v51, 0.0  ;;  %v380_v61 = vmax.f32 %v364_v14, 0.0 }
 0x21d   :  { %v3902_v52 = vpop.eup %3901  ;;  %v350_v13 = vadd.f32 1e-05, %v342_v7  ;;  %3729 = vmatpush1.bf16.msra.mxu1 %v3728_v8 }
 0x21e   :  { %v335_v53 = vpop.xlane.xlu0 %334  ;;  %v367_v54 = vmul.f32 %v3902_v52, %v4251_v28  ;;  %v366_v57 = vmul.f32 %v3902_v52, %v4249_v27  ;;  %v411_v31 = vpop.permute.xlu1 %410 }
 0x21f   :  { %3907 = vrsqrt.f32 %v350_v13  ;;  %v343_v58 = vmul.f32 0.00390625, %v335_v53 }
 0x220   :  { %v383_v60 = vmax.f32 %v367_v54, 0.0  ;;  %v382_v62 = vmax.f32 %v366_v57, 0.0 }
 0x221   :  { %v3904_v63 = vpop.eup %3903  ;;  %v351_v0 = vadd.f32 1e-05, %v343_v58 }
 0x222   :  { %v3730_v1 = vpack.c.bf16 %v383_v60, %v381_v59  ;;  %v3732_v21 = vpack.c.bf16 %v382_v62, %v380_v61  ;;  %v369_v20 = vmul.f32 %v3904_v63, %v4259_v35  ;;  %v368_v3 = vmul.f32 %v3904_v63, %v4257_v34  ;;  %v421_v45 = vpop.permute.xlu1 %420 }
 0x223   :  { %3909 = vrsqrt.f32 %v351_v0 }
 0x224   :  { %3731 = vmatprep.subr.bf16.mxu1 %v3730_v1  ;;  %v385_v5 = vmax.f32 %v369_v20, 0.0  ;;  %v384_v9 = vmax.f32 %v368_v3, 0.0 }
 0x225   :  { %v3906_v4 = vpop.eup %3905  ;;  %3733 = vmatpush1.bf16.msra.mxu1 %v3732_v21 }
 0x226   :  { %v371_v27 = vmul.f32 %v3906_v4, %v4267_v42  ;;  %v370_v28 = vmul.f32 %v3906_v4, %v4265_v41  ;;  %v416_v38 = vpop.permute.xlu0 %415  ;;  %v426_v14 = vpop.permute.xlu1 %425 }
 0x228   :  { %v387_v6 = vmax.f32 %v371_v27, 0.0  ;;  %v386_v10 = vmax.f32 %v370_v28, 0.0 }
 0x229   :  { %v3908_v11 = vpop.eup %3907 }
 0x22a   :  { %v3734_v12 = vpack.c.bf16 %v387_v6, %v385_v5  ;;  %v3736_v15 = vpack.c.bf16 %v386_v10, %v384_v9  ;;  %v373_v16 = vmul.f32 %v3908_v11, %v4275_v49  ;;  %v372_v35 = vmul.f32 %v3908_v11, %v4273_v48  ;;  %v392_v49 = vld [vmem:[%s5641_s3] sm:$0xff]  ;;  %v393_v48 = vld [vmem:[%s5641_s3 + $0x8] sm:$0xff]  ;;  %v431_v58 = vpop.permute.xlu0 %430  ;;  %v436_v0 = vpop.permute.xlu1 %435 }
 0x22c   :  { %3735 = vmatprep.subr.bf16.mxu1 %v3734_v12  ;;  %v389_v18 = vmax.f32 %v373_v16, 0.0  ;;  %v388_v19 = vmax.f32 %v372_v35, 0.0 }
 0x22d   :  { %v3910_v17 = vpop.eup %3909  ;;  %3737 = vmatpush1.bf16.msra.mxu1 %v3736_v15 }
 0x22e   :  { %v375_v34 = vmul.f32 %v3910_v17, %v4283_v56  ;;  %v374_v42 = vmul.f32 %v3910_v17, %v4281_v55  ;;  %v394_v55 = vld [vmem:[%s5641_s3 + $0x10] sm:$0xff]  ;;  %v395_v56 = vld [vmem:[%s5641_s3 + $0x18] sm:$0xff]  ;;  %v441_v27 = vpop.permute.xlu0 %440  ;;  %v446_v11 = vpop.permute.xlu1 %445 }
 0x230   :  { %v391_v41 = vmax.f32 %v375_v34, 0.0  ;;  %v390_v22 = vmax.f32 %v374_v42, 0.0 }
 0x232   :  { %v3738_v23 = vpack.c.bf16 %v391_v41, %v389_v18  ;;  %v3740_v24 = vpack.c.bf16 %v390_v22, %v388_v19 }
 0x234   :  { %3739 = vmatprep.subr.bf16.mxu1 %v3738_v23 }
 0x235   :  { %3741 = vmatpush1.bf16.msra.mxu1 %v3740_v24 }
 0x238   :  { %3647 = vmatmul.mubr.msk.f32.vlgmr.msra.gmra.mrb[0].mxu1 %vm448_vm2, %v392_v49 }
 0x239   :  { %543 = vmatprep.mubr.f32.mxu1 %v4079_v2 }
 0x23c   :  { %3648 = vmatmul.mubr.msk.f32.gmra.mrb[2].mxu1 %vm448_vm2, %v393_v48 }
 0x23d   :  { %549 = vmatprep.mubr.f32.mxu1 %v4079_v2 }
 0x240   :  { %3649 = vmatmul.mubr.msk.f32.gmra.mrb[4].mxu1 %vm448_vm2, %v394_v55 }
 0x241   :  { %555 = vmatprep.mubr.f32.mxu1 %v4079_v2 }
 0x244   :  { %3650 = vmatmul.mubr.msk.f32.gmra.mrb[6].mxu1 %vm448_vm2, %v395_v56 }
 0x245   :  { %561 = vmatprep.mubr.f32.mxu1 %v4079_v2 }
 0x248   :  { %3651 = vmatmul.mubr.msk.f32.gmra.mrb[8].mxu1 %vm448_vm2, %v396_v25 }
 0x249   :  { %567 = vmatprep.mubr.f32.mxu1 %v4079_v2 }
 0x24c   :  { %3652 = vmatmul.mubr.msk.f32.gmra.mrb[10].mxu1 %vm448_vm2, %v397_v26 }
 0x24d   :  { %573 = vmatprep.mubr.f32.mxu1 %v4079_v2 }
 0x250   :  { %3653 = vmatmul.mubr.msk.f32.gmra.mrb[12].mxu1 %vm448_vm2, %v398_v29 }
 0x251   :  { %579 = vmatprep.mubr.f32.mxu1 %v4079_v2 }
 0x254   :  { %3654 = vmatmul.mubr.msk.f32.gmra.mrb[14].mxu1 %vm448_vm2, %v399_v30 }
 0x255   :  { %1211 = vmatprep.mubr.f32.mxu1 %v4079_v2 }
 0x30b   :  { %v539_v32 = vpop.f32.mrb[0].mxu1 }
 0x30c   :  { %v540_v33 = vadd.f32 %v539_v32, %v411_v31  ;;  %v541_v36 = vpop.f32.mrb[1].mxu1 }
 0x30d   :  { %v542_v37 = vadd.f32 %v541_v36, %v411_v31 }
 0x30f   :  { %v545_v39 = vpop.f32.mrb[2].mxu1  ;;  %v586_v40 = vadd.f32 %v542_v37, %v540_v33 }
 0x310   :  { %v546_v43 = vadd.f32 %v545_v39, %v416_v38  ;;  %v547_v44 = vpop.f32.mrb[3].mxu1 }
 0x311   :  { %v548_v46 = vadd.f32 %v547_v44, %v416_v38  ;;  %587 = vadd.xlane.f32.xlu0 %v586_v40 }
 0x313   :  { %v551_v47 = vpop.f32.mrb[4].mxu1  ;;  %v589_v50 = vadd.f32 %v548_v46, %v546_v43 }
 0x314   :  { %v552_v8 = vadd.f32 %v551_v47, %v421_v45  ;;  %v553_v7 = vpop.f32.mrb[5].mxu1 }
 0x315   :  { %v554_v51 = vadd.f32 %v553_v7, %v421_v45  ;;  %590 = vadd.xlane.f32.xlu1 %v589_v50 }
 0x317   :  { %v557_v52 = vpop.f32.mrb[6].mxu1  ;;  %v592_v13 = vadd.f32 %v554_v51, %v552_v8 }
 0x318   :  { %v558_v53 = vadd.f32 %v557_v52, %v426_v14  ;;  %v559_v54 = vpop.f32.mrb[7].mxu1 }
 0x319   :  { %v560_v57 = vadd.f32 %v559_v54, %v426_v14  ;;  %593 = vadd.xlane.f32.xlu0 %v592_v13 }
 0x31b   :  { %v563_v59 = vpop.f32.mrb[8].mxu1  ;;  %v595_v60 = vadd.f32 %v560_v57, %v558_v53 }
 0x31c   :  { %v564_v61 = vadd.f32 %v563_v59, %v431_v58  ;;  %v565_v62 = vpop.f32.mrb[9].mxu1 }
 0x31d   :  { %v566_v63 = vadd.f32 %v565_v62, %v431_v58  ;;  %596 = vadd.xlane.f32.xlu0 %v595_v60 }
 0x31f   :  { %v569_v1 = vpop.f32.mrb[10].mxu1  ;;  %v598_v21 = vadd.f32 %v566_v63, %v564_v61 }
 0x320   :  { %v570_v20 = vadd.f32 %v569_v1, %v436_v0  ;;  %v571_v3 = vpop.f32.mrb[11].mxu1 }
 0x321   :  { %v572_v4 = vadd.f32 %v571_v3, %v436_v0  ;;  %599 = vadd.xlane.f32.xlu1 %v598_v21 }
 0x323   :  { %v575_v28 = vpop.f32.mrb[12].mxu1  ;;  %v601_v5 = vadd.f32 %v572_v4, %v570_v20 }
 0x324   :  { %v576_v6 = vadd.f32 %v575_v28, %v441_v27  ;;  %v577_v9 = vpop.f32.mrb[13].mxu1 }
 0x325   :  { %v578_v10 = vadd.f32 %v577_v9, %v441_v27  ;;  %602 = vadd.xlane.f32.xlu0 %v601_v5 }
 0x327   :  { %v581_v12 = vpop.f32.mrb[14].mxu1  ;;  %v604_v15 = vadd.f32 %v578_v10, %v576_v6 }
 0x328   :  { %v582_v16 = vadd.f32 %v581_v12, %v446_v11  ;;  %v583_v35 = vpop.f32.mrb[15].mxu1  ;;  %v740_v12 = vld [vmem:[%s5644_s6 + $0x10] sm:$0xff] }
 0x329   :  { %v584_v17 = vadd.f32 %v583_v35, %v446_v11  ;;  %605 = vadd.xlane.f32.xlu1 %v604_v15  ;;  %v738_v11 = vld [vmem:[%s5644_s6] sm:$0xff]  ;;  %v741_v15 = vld [vmem:[%s5644_s6 + $0x18] sm:$0xff]  ;;  %v743_v35 = vld [vmem:[%s5644_s6 + $0x28] sm:$0xff] }
 0x32b   :  { %v607_v34 = vadd.f32 %v584_v17, %v582_v16 }
 0x32d   :  { %608 = vadd.xlane.f32.xlu0 %v607_v34  ;;  %v745_v34 = vld [vmem:[%s5644_s6 + $0x38] sm:$0xff] }
 0x39e   :  { %v588_v42 = vpop.xlane.xlu0 %587 }
 0x39f   :  { %v610_v18 = vmul.f32 0.00390625, %v588_v42  ;;  %v744_v42 = vld [vmem:[%s5644_s6 + $0x30] sm:$0xff] }
 0x3a1   :  { %v4369_v41 = vsub.f32 %v540_v33, %v610_v18  ;;  %v4371_v19 = vsub.f32 %v542_v37, %v610_v18 }
 0x3a2   :  { %v591_v22 = vpop.xlane.xlu1 %590 }
 0x3a3   :  { %v611_v23 = vmul.f32 0.00390625, %v591_v22  ;;  %v634_v24 = vmul.f32 %v4369_v41, %v4369_v41  ;;  %v635_v49 = vmul.f32 %v4371_v19, %v4371_v19 }
 0x3a5   :  { %v4377_v48 = vsub.f32 %v546_v43, %v611_v23  ;;  %v4379_v55 = vsub.f32 %v548_v46, %v611_v23  ;;  %v650_v56 = vadd.f32 %v635_v49, %v634_v24 }
 0x3a6   :  { %v594_v25 = vpop.xlane.xlu0 %593 }
 0x3a7   :  { %v612_v26 = vmul.f32 0.00390625, %v594_v25  ;;  %651 = vadd.xlane.f32.xlu1 %v650_v56  ;;  %v636_v29 = vmul.f32 %v4377_v48, %v4377_v48  ;;  %v637_v30 = vmul.f32 %v4379_v55, %v4379_v55 }
 0x3a9   :  { %v4385_v31 = vsub.f32 %v552_v8, %v612_v26  ;;  %v4387_v32 = vsub.f32 %v554_v51, %v612_v26  ;;  %v653_v33 = vadd.f32 %v637_v30, %v636_v29 }
 0x3aa   :  { %v597_v36 = vpop.xlane.xlu0 %596 }
 0x3ab   :  { %v613_v37 = vmul.f32 0.00390625, %v597_v36  ;;  %654 = vadd.xlane.f32.xlu0 %v653_v33  ;;  %v638_v38 = vmul.f32 %v4385_v31, %v4385_v31  ;;  %v639_v39 = vmul.f32 %v4387_v32, %v4387_v32 }
 0x3ad   :  { %v4393_v40 = vsub.f32 %v558_v53, %v613_v37  ;;  %v4395_v43 = vsub.f32 %v560_v57, %v613_v37  ;;  %v656_v44 = vadd.f32 %v639_v39, %v638_v38 }
 0x3ae   :  { %v600_v45 = vpop.xlane.xlu1 %599 }
 0x3af   :  { %v614_v46 = vmul.f32 0.00390625, %v600_v45  ;;  %657 = vadd.xlane.f32.xlu1 %v656_v44  ;;  %v640_v47 = vmul.f32 %v4393_v40, %v4393_v40  ;;  %v641_v50 = vmul.f32 %v4395_v43, %v4395_v43 }
 0x3b1   :  { %v4401_v8 = vsub.f32 %v564_v61, %v614_v46  ;;  %v4403_v7 = vsub.f32 %v566_v63, %v614_v46  ;;  %v659_v51 = vadd.f32 %v641_v50, %v640_v47 }
 0x3b2   :  { %v603_v14 = vpop.xlane.xlu0 %602 }
 0x3b3   :  { %v615_v52 = vmul.f32 0.00390625, %v603_v14  ;;  %660 = vadd.xlane.f32.xlu0 %v659_v51  ;;  %v642_v13 = vmul.f32 %v4401_v8, %v4401_v8  ;;  %v643_v53 = vmul.f32 %v4403_v7, %v4403_v7 }
 0x3b5   :  { %v4409_v54 = vsub.f32 %v570_v20, %v615_v52  ;;  %v4411_v57 = vsub.f32 %v572_v4, %v615_v52  ;;  %v662_v58 = vadd.f32 %v643_v53, %v642_v13 }
 0x3b6   :  { %v606_v59 = vpop.xlane.xlu1 %605 }
 0x3b7   :  { %v616_v60 = vmul.f32 0.00390625, %v606_v59  ;;  %663 = vadd.xlane.f32.xlu1 %v662_v58  ;;  %v644_v61 = vmul.f32 %v4409_v54, %v4409_v54  ;;  %v645_v62 = vmul.f32 %v4411_v57, %v4411_v57 }
 0x3b9   :  { %v4417_v63 = vsub.f32 %v576_v6, %v616_v60  ;;  %v4419_v0 = vsub.f32 %v578_v10, %v616_v60  ;;  %v665_v1 = vadd.f32 %v645_v62, %v644_v61 }
 0x3ba   :  { %v609_v21 = vpop.xlane.xlu0 %608 }
 0x3bb   :  { %v617_v20 = vmul.f32 0.00390625, %v609_v21  ;;  %666 = vadd.xlane.f32.xlu0 %v665_v1  ;;  %v646_v3 = vmul.f32 %v4417_v63, %v4417_v63  ;;  %v647_v4 = vmul.f32 %v4419_v0, %v4419_v0 }
 0x3bd   :  { %v4425_v27 = vsub.f32 %v582_v16, %v617_v20  ;;  %v4427_v28 = vsub.f32 %v584_v17, %v617_v20  ;;  %v668_v5 = vadd.f32 %v647_v4, %v646_v3  ;;  %v739_v16 = vld [vmem:[%s5644_s6 + $0x8] sm:$0xff]  ;;  %v742_v17 = vld [vmem:[%s5644_s6 + $0x20] sm:$0xff] }
 0x3bf   :  { %669 = vadd.xlane.f32.xlu1 %v668_v5  ;;  %v648_v6 = vmul.f32 %v4425_v27, %v4425_v27  ;;  %v649_v9 = vmul.f32 %v4427_v28, %v4427_v28 }
 0x3c1   :  { %v671_v10 = vadd.f32 %v649_v9, %v648_v6 }
 0x3c3   :  { %672 = vadd.xlane.f32.xlu0 %v671_v10 }
 0x3d0   :  { %748 = vperm.xlu1 %3892, %v738_v11  }
 0x3d4   :  { %758 = vperm.xlu1 %3892, %v740_v12  }
 0x3d8   :  { %763 = vperm.xlu1 %3892, %v741_v15  }
 0x3d9   :  { %753 = vperm.xlu0 %3891, %v739_v16  }
 0x3dc   :  { %773 = vperm.xlu1 %3892, %v743_v35  }
 0x3dd   :  { %768 = vperm.xlu0 %3891, %v742_v17  }
 0x3e0   :  { %783 = vperm.xlu1 %3892, %v745_v34  }
 0x3e1   :  { %778 = vperm.xlu0 %3891, %v744_v42  }
 0x434   :  { %v652_v18 = vpop.xlane.xlu1 %651 }
 0x435   :  { %v674_v22 = vmul.f32 0.00390625, %v652_v18 }
 0x437   :  { %v682_v23 = vadd.f32 1e-05, %v674_v22 }
 0x438   :  { %v655_v24 = vpop.xlane.xlu0 %654 }
 0x439   :  { %3911 = vrsqrt.f32 %v682_v23  ;;  %v675_v49 = vmul.f32 0.00390625, %v655_v24 }
 0x43b   :  { %v683_v56 = vadd.f32 1e-05, %v675_v49 }
 0x43c   :  { %v658_v25 = vpop.xlane.xlu1 %657 }
 0x43d   :  { %3913 = vrsqrt.f32 %v683_v56  ;;  %v676_v26 = vmul.f32 0.00390625, %v658_v25 }
 0x43f   :  { %v684_v29 = vadd.f32 1e-05, %v676_v26 }
 0x440   :  { %v661_v30 = vpop.xlane.xlu0 %660 }
 0x441   :  { %3915 = vrsqrt.f32 %v684_v29  ;;  %v677_v33 = vmul.f32 0.00390625, %v661_v30 }
 0x443   :  { %v3912_v36 = vpop.eup %3911  ;;  %v685_v37 = vadd.f32 1e-05, %v677_v33 }
 0x444   :  { %v664_v38 = vpop.xlane.xlu1 %663  ;;  %v699_v44 = vmul.f32 %v3912_v36, %v4371_v19  ;;  %v698_v45 = vmul.f32 %v3912_v36, %v4369_v41 }
 0x445   :  { %3917 = vrsqrt.f32 %v685_v37  ;;  %v678_v39 = vmul.f32 0.00390625, %v664_v38  ;;  %v734_v38 = vld [vmem:[%s5643_s5 + $0x20] sm:$0xff] }
 0x446   :  { %v715_v13 = vmax.f32 %v699_v44, 0.0  ;;  %v714_v58 = vmax.f32 %v698_v45, 0.0  ;;  %v736_v44 = vld [vmem:[%s5643_s5 + $0x30] sm:$0xff]  ;;  %v737_v45 = vld [vmem:[%s5643_s5 + $0x38] sm:$0xff] }
 0x447   :  { %v3914_v46 = vpop.eup %3913  ;;  %v686_v47 = vadd.f32 1e-05, %v678_v39  ;;  %v735_v39 = vld [vmem:[%s5643_s5 + $0x28] sm:$0xff] }
 0x448   :  { %v667_v50 = vpop.xlane.xlu0 %666  ;;  %v701_v51 = vmul.f32 %v3914_v46, %v4379_v55  ;;  %v700_v14 = vmul.f32 %v3914_v46, %v4377_v48 }
 0x449   :  { %3919 = vrsqrt.f32 %v686_v47  ;;  %v679_v52 = vmul.f32 0.00390625, %v667_v50 }
 0x44a   :  { %v717_v53 = vmax.f32 %v701_v51, 0.0  ;;  %v716_v59 = vmax.f32 %v700_v14, 0.0 }
 0x44b   :  { %v3916_v60 = vpop.eup %3915  ;;  %v687_v61 = vadd.f32 1e-05, %v679_v52 }
 0x44c   :  { %v670_v62 = vpop.xlane.xlu1 %669  ;;  %v3742_v1 = vpack.c.bf16 %v717_v53, %v715_v13  ;;  %v3744_v19 = vpack.c.bf16 %v716_v59, %v714_v58  ;;  %v703_v21 = vmul.f32 %v3916_v60, %v4387_v32  ;;  %v702_v55 = vmul.f32 %v3916_v60, %v4385_v31 }
 0x44d   :  { %3921 = vrsqrt.f32 %v687_v61  ;;  %v680_v41 = vmul.f32 0.00390625, %v670_v62 }
 0x44e   :  { %3743 = vmatprep.subr.bf16.mxu0 %v3742_v1  ;;  %v719_v9 = vmax.f32 %v703_v21, 0.0  ;;  %v718_v11 = vmax.f32 %v702_v55, 0.0 }
 0x44f   :  { %v3918_v20 = vpop.eup %3917  ;;  %v688_v48 = vadd.f32 1e-05, %v680_v41  ;;  %3745 = vmatpush1.bf16.msra.mxu0 %v3744_v19 }
 0x450   :  { %v673_v3 = vpop.xlane.xlu0 %672  ;;  %v705_v4 = vmul.f32 %v3918_v20, %v4395_v43  ;;  %v704_v5 = vmul.f32 %v3918_v20, %v4393_v40  ;;  %v749_v46 = vpop.permute.xlu1 %748 }
 0x451   :  { %3923 = vrsqrt.f32 %v688_v48  ;;  %v681_v6 = vmul.f32 0.00390625, %v673_v3 }
 0x452   :  { %v721_v10 = vmax.f32 %v705_v4, 0.0  ;;  %v720_v12 = vmax.f32 %v704_v5, 0.0 }
 0x453   :  { %v3920_v15 = vpop.eup %3919  ;;  %v689_v16 = vadd.f32 1e-05, %v681_v6 }
 0x454   :  { %v3746_v35 = vpack.c.bf16 %v721_v10, %v719_v9  ;;  %v3748_v32 = vpack.c.bf16 %v720_v12, %v718_v11  ;;  %v707_v31 = vmul.f32 %v3920_v15, %v4403_v7  ;;  %v706_v17 = vmul.f32 %v3920_v15, %v4401_v8  ;;  %v759_v60 = vpop.permute.xlu1 %758 }
 0x455   :  { %3925 = vrsqrt.f32 %v689_v16 }
 0x456   :  { %3747 = vmatprep.subr.bf16.mxu0 %v3746_v35  ;;  %v723_v42 = vmax.f32 %v707_v31, 0.0  ;;  %v722_v22 = vmax.f32 %v706_v17, 0.0 }
 0x457   :  { %v3922_v34 = vpop.eup %3921  ;;  %3749 = vmatpush1.bf16.msra.mxu0 %v3748_v32 }
 0x458   :  { %v709_v40 = vmul.f32 %v3922_v34, %v4411_v57  ;;  %v708_v43 = vmul.f32 %v3922_v34, %v4409_v54  ;;  %v754_v52 = vpop.permute.xlu0 %753  ;;  %v764_v55 = vpop.permute.xlu1 %763 }
 0x45a   :  { %v725_v18 = vmax.f32 %v709_v40, 0.0  ;;  %v724_v23 = vmax.f32 %v708_v43, 0.0 }
 0x45b   :  { %v3924_v24 = vpop.eup %3923 }
 0x45c   :  { %v3750_v49 = vpack.c.bf16 %v725_v18, %v723_v42  ;;  %v3752_v56 = vpack.c.bf16 %v724_v23, %v722_v22  ;;  %v711_v25 = vmul.f32 %v3924_v24, %v4419_v0  ;;  %v710_v7 = vmul.f32 %v3924_v24, %v4417_v63  ;;  %v730_v0 = vld [vmem:[%s5643_s5] sm:$0xff]  ;;  %v731_v63 = vld [vmem:[%s5643_s5 + $0x8] sm:$0xff]  ;;  %v769_v6 = vpop.permute.xlu0 %768  ;;  %v774_v16 = vpop.permute.xlu1 %773 }
 0x45e   :  { %3751 = vmatprep.subr.bf16.mxu0 %v3750_v49  ;;  %v727_v29 = vmax.f32 %v711_v25, 0.0  ;;  %v726_v30 = vmax.f32 %v710_v7, 0.0 }
 0x45f   :  { %v3926_v26 = vpop.eup %3925  ;;  %3753 = vmatpush1.bf16.msra.mxu0 %v3752_v56 }
 0x460   :  { %v713_v8 = vmul.f32 %v3926_v26, %v4427_v28  ;;  %v712_v57 = vmul.f32 %v3926_v26, %v4425_v27  ;;  %v732_v27 = vld [vmem:[%s5643_s5 + $0x10] sm:$0xff]  ;;  %v733_v28 = vld [vmem:[%s5643_s5 + $0x18] sm:$0xff]  ;;  %v779_v40 = vpop.permute.xlu0 %778  ;;  %v784_v24 = vpop.permute.xlu1 %783 }
 0x462   :  { %v729_v54 = vmax.f32 %v713_v8, 0.0  ;;  %v728_v33 = vmax.f32 %v712_v57, 0.0 }
 0x464   :  { %v3754_v36 = vpack.c.bf16 %v729_v54, %v727_v29  ;;  %v3756_v37 = vpack.c.bf16 %v728_v33, %v726_v30 }
 0x466   :  { %3755 = vmatprep.subr.bf16.mxu0 %v3754_v36 }
 0x467   :  { %3757 = vmatpush1.bf16.msra.mxu0 %v3756_v37 }
 0x46a   :  { %3655 = vmatmul.mubr.msk.f32.vlgmr.msra.gmra.mrb[16].mxu0 %vm448_vm2, %v730_v0 }
 0x46b   :  { %880 = vmatprep.mubr.f32.mxu0 %v4079_v2 }
 0x46e   :  { %3656 = vmatmul.mubr.msk.f32.gmra.mrb[18].mxu0 %vm448_vm2, %v731_v63 }
 0x46f   :  { %886 = vmatprep.mubr.f32.mxu0 %v4079_v2 }
 0x472   :  { %3657 = vmatmul.mubr.msk.f32.gmra.mrb[20].mxu0 %vm448_vm2, %v732_v27 }
 0x473   :  { %892 = vmatprep.mubr.f32.mxu0 %v4079_v2 }
 0x476   :  { %3658 = vmatmul.mubr.msk.f32.gmra.mrb[22].mxu0 %vm448_vm2, %v733_v28 }
 0x477   :  { %898 = vmatprep.mubr.f32.mxu0 %v4079_v2 }
 0x47a   :  { %3659 = vmatmul.mubr.msk.f32.gmra.mrb[24].mxu0 %vm448_vm2, %v734_v38 }
 0x47b   :  { %904 = vmatprep.mubr.f32.mxu0 %v4079_v2 }
 0x47e   :  { %3660 = vmatmul.mubr.msk.f32.gmra.mrb[26].mxu0 %vm448_vm2, %v735_v39 }
 0x47f   :  { %910 = vmatprep.mubr.f32.mxu0 %v4079_v2 }
 0x482   :  { %3661 = vmatmul.mubr.msk.f32.gmra.mrb[28].mxu0 %vm448_vm2, %v736_v44 }
 0x483   :  { %916 = vmatprep.mubr.f32.mxu0 %v4079_v2 }
 0x486   :  { %3662 = vmatmul.mubr.msk.f32.gmra.mrb[30].mxu0 %vm448_vm2, %v737_v45 }
 0x487   :  { %1548 = vmatprep.mubr.f32.mxu0 %v4079_v2 }
 0x53d   :  { %v876_v47 = vpop.f32.mrb[16].mxu0 }
 0x53e   :  { %v877_v50 = vadd.f32 %v876_v47, %v749_v46  ;;  %v878_v51 = vpop.f32.mrb[17].mxu0 }
 0x53f   :  { %v879_v14 = vadd.f32 %v878_v51, %v749_v46 }
 0x541   :  { %v882_v13 = vpop.f32.mrb[18].mxu0  ;;  %v923_v53 = vadd.f32 %v879_v14, %v877_v50 }
 0x542   :  { %v883_v58 = vadd.f32 %v882_v13, %v754_v52  ;;  %v884_v59 = vpop.f32.mrb[19].mxu0 }
 0x543   :  { %v885_v61 = vadd.f32 %v884_v59, %v754_v52  ;;  %924 = vadd.xlane.f32.xlu0 %v923_v53 }
 0x545   :  { %v888_v62 = vpop.f32.mrb[20].mxu0  ;;  %v926_v1 = vadd.f32 %v885_v61, %v883_v58 }
 0x546   :  { %v889_v19 = vadd.f32 %v888_v62, %v759_v60  ;;  %v890_v41 = vpop.f32.mrb[21].mxu0 }
 0x547   :  { %v891_v21 = vadd.f32 %v890_v41, %v759_v60  ;;  %927 = vadd.xlane.f32.xlu1 %v926_v1 }
 0x549   :  { %v894_v20 = vpop.f32.mrb[22].mxu0  ;;  %v929_v48 = vadd.f32 %v891_v21, %v889_v19 }
 0x54a   :  { %v895_v3 = vadd.f32 %v894_v20, %v764_v55  ;;  %v896_v4 = vpop.f32.mrb[23].mxu0 }
 0x54b   :  { %v897_v5 = vadd.f32 %v896_v4, %v764_v55  ;;  %930 = vadd.xlane.f32.xlu0 %v929_v48 }
 0x54d   :  { %v900_v9 = vpop.f32.mrb[24].mxu0  ;;  %v932_v10 = vadd.f32 %v897_v5, %v895_v3 }
 0x54e   :  { %v901_v11 = vadd.f32 %v900_v9, %v769_v6  ;;  %v902_v12 = vpop.f32.mrb[25].mxu0 }
 0x54f   :  { %v903_v15 = vadd.f32 %v902_v12, %v769_v6  ;;  %933 = vadd.xlane.f32.xlu0 %v932_v10 }
 0x551   :  { %v906_v35 = vpop.f32.mrb[26].mxu0  ;;  %v935_v32 = vadd.f32 %v903_v15, %v901_v11 }
 0x552   :  { %v907_v31 = vadd.f32 %v906_v35, %v774_v16  ;;  %v908_v17 = vpop.f32.mrb[27].mxu0 }
 0x553   :  { %v909_v34 = vadd.f32 %v908_v17, %v774_v16  ;;  %936 = vadd.xlane.f32.xlu1 %v935_v32 }
 0x555   :  { %v912_v43 = vpop.f32.mrb[28].mxu0  ;;  %v938_v42 = vadd.f32 %v909_v34, %v907_v31 }
 0x556   :  { %v913_v18 = vadd.f32 %v912_v43, %v779_v40  ;;  %v914_v22 = vpop.f32.mrb[29].mxu0 }
 0x557   :  { %v915_v23 = vadd.f32 %v914_v22, %v779_v40  ;;  %939 = vadd.xlane.f32.xlu0 %v938_v42 }
 0x559   :  { %v918_v49 = vpop.f32.mrb[30].mxu0  ;;  %v941_v56 = vadd.f32 %v915_v23, %v913_v18 }
 0x55a   :  { %v919_v25 = vadd.f32 %v918_v49, %v784_v24  ;;  %v920_v7 = vpop.f32.mrb[31].mxu0  ;;  %v1077_v49 = vld [vmem:[%s5646_s8 + $0x10] sm:$0xff] }
 0x55b   :  { %v921_v26 = vadd.f32 %v920_v7, %v784_v24  ;;  %942 = vadd.xlane.f32.xlu1 %v941_v56  ;;  %v1075_v24 = vld [vmem:[%s5646_s8] sm:$0xff]  ;;  %v1078_v56 = vld [vmem:[%s5646_s8 + $0x18] sm:$0xff]  ;;  %v1080_v7 = vld [vmem:[%s5646_s8 + $0x28] sm:$0xff] }
 0x55d   :  { %v944_v8 = vadd.f32 %v921_v26, %v919_v25 }
 0x55f   :  { %945 = vadd.xlane.f32.xlu0 %v944_v8  ;;  %v1082_v8 = vld [vmem:[%s5646_s8 + $0x38] sm:$0xff] }
 0x5d0   :  { %v925_v57 = vpop.xlane.xlu0 %924 }
 0x5d1   :  { %v947_v29 = vmul.f32 0.00390625, %v925_v57  ;;  %v1081_v57 = vld [vmem:[%s5646_s8 + $0x30] sm:$0xff] }
 0x5d3   :  { %v4513_v54 = vsub.f32 %v877_v50, %v947_v29  ;;  %v4515_v30 = vsub.f32 %v879_v14, %v947_v29 }
 0x5d4   :  { %v928_v33 = vpop.xlane.xlu1 %927 }
 0x5d5   :  { %v948_v36 = vmul.f32 0.00390625, %v928_v33  ;;  %v971_v37 = vmul.f32 %v4513_v54, %v4513_v54  ;;  %v972_v0 = vmul.f32 %v4515_v30, %v4515_v30 }
 0x5d7   :  { %v4521_v63 = vsub.f32 %v883_v58, %v948_v36  ;;  %v4523_v27 = vsub.f32 %v885_v61, %v948_v36  ;;  %v987_v28 = vadd.f32 %v972_v0, %v971_v37 }
 0x5d8   :  { %v931_v38 = vpop.xlane.xlu0 %930 }
 0x5d9   :  { %v949_v39 = vmul.f32 0.00390625, %v931_v38  ;;  %988 = vadd.xlane.f32.xlu1 %v987_v28  ;;  %v973_v44 = vmul.f32 %v4521_v63, %v4521_v63  ;;  %v974_v45 = vmul.f32 %v4523_v27, %v4523_v27 }
 0x5db   :  { %v4529_v46 = vsub.f32 %v889_v19, %v949_v39  ;;  %v4531_v47 = vsub.f32 %v891_v21, %v949_v39  ;;  %v990_v50 = vadd.f32 %v974_v45, %v973_v44 }
 0x5dc   :  { %v934_v51 = vpop.xlane.xlu0 %933 }
 0x5dd   :  { %v950_v14 = vmul.f32 0.00390625, %v934_v51  ;;  %991 = vadd.xlane.f32.xlu0 %v990_v50  ;;  %v975_v52 = vmul.f32 %v4529_v46, %v4529_v46  ;;  %v976_v13 = vmul.f32 %v4531_v47, %v4531_v47 }
 0x5df   :  { %v4537_v53 = vsub.f32 %v895_v3, %v950_v14  ;;  %v4539_v58 = vsub.f32 %v897_v5, %v950_v14  ;;  %v993_v59 = vadd.f32 %v976_v13, %v975_v52 }
 0x5e0   :  { %v937_v60 = vpop.xlane.xlu1 %936 }
 0x5e1   :  { %v951_v61 = vmul.f32 0.00390625, %v937_v60  ;;  %994 = vadd.xlane.f32.xlu1 %v993_v59  ;;  %v977_v62 = vmul.f32 %v4537_v53, %v4537_v53  ;;  %v978_v1 = vmul.f32 %v4539_v58, %v4539_v58 }
 0x5e3   :  { %v4545_v19 = vsub.f32 %v901_v11, %v951_v61  ;;  %v4547_v41 = vsub.f32 %v903_v15, %v951_v61  ;;  %v996_v21 = vadd.f32 %v978_v1, %v977_v62 }
 0x5e4   :  { %v940_v55 = vpop.xlane.xlu0 %939 }
 0x5e5   :  { %v952_v20 = vmul.f32 0.00390625, %v940_v55  ;;  %997 = vadd.xlane.f32.xlu0 %v996_v21  ;;  %v979_v48 = vmul.f32 %v4545_v19, %v4545_v19  ;;  %v980_v3 = vmul.f32 %v4547_v41, %v4547_v41 }
 0x5e7   :  { %v4553_v4 = vsub.f32 %v907_v31, %v952_v20  ;;  %v4555_v5 = vsub.f32 %v909_v34, %v952_v20  ;;  %v999_v6 = vadd.f32 %v980_v3, %v979_v48 }
 0x5e8   :  { %v943_v9 = vpop.xlane.xlu1 %942 }
 0x5e9   :  { %v953_v10 = vmul.f32 0.00390625, %v943_v9  ;;  %1000 = vadd.xlane.f32.xlu1 %v999_v6  ;;  %v981_v11 = vmul.f32 %v4553_v4, %v4553_v4  ;;  %v982_v12 = vmul.f32 %v4555_v5, %v4555_v5 }
 0x5eb   :  { %v4561_v15 = vsub.f32 %v913_v18, %v953_v10  ;;  %v4563_v16 = vsub.f32 %v915_v23, %v953_v10  ;;  %v1002_v35 = vadd.f32 %v982_v12, %v981_v11 }
 0x5ec   :  { %v946_v32 = vpop.xlane.xlu0 %945 }
 0x5ed   :  { %v954_v31 = vmul.f32 0.00390625, %v946_v32  ;;  %1003 = vadd.xlane.f32.xlu0 %v1002_v35  ;;  %v983_v17 = vmul.f32 %v4561_v15, %v4561_v15  ;;  %v984_v34 = vmul.f32 %v4563_v16, %v4563_v16 }
 0x5ef   :  { %v4569_v40 = vsub.f32 %v919_v25, %v954_v31  ;;  %v4571_v43 = vsub.f32 %v921_v26, %v954_v31  ;;  %v1005_v42 = vadd.f32 %v984_v34, %v983_v17  ;;  %v1076_v25 = vld [vmem:[%s5646_s8 + $0x8] sm:$0xff]  ;;  %v1079_v26 = vld [vmem:[%s5646_s8 + $0x20] sm:$0xff] }
 0x5f1   :  { %1006 = vadd.xlane.f32.xlu1 %v1005_v42  ;;  %v985_v18 = vmul.f32 %v4569_v40, %v4569_v40  ;;  %v986_v22 = vmul.f32 %v4571_v43, %v4571_v43 }
 0x5f3   :  { %v1008_v23 = vadd.f32 %v986_v22, %v985_v18 }
 0x5f5   :  { %1009 = vadd.xlane.f32.xlu0 %v1008_v23 }
 0x602   :  { %1085 = vperm.xlu1 %3892, %v1075_v24  }
 0x606   :  { %1095 = vperm.xlu1 %3892, %v1077_v49  }
 0x60a   :  { %1100 = vperm.xlu1 %3892, %v1078_v56  }
 0x60b   :  { %1090 = vperm.xlu0 %3891, %v1076_v25  }
 0x60e   :  { %1110 = vperm.xlu1 %3892, %v1080_v7  }
 0x60f   :  { %1105 = vperm.xlu0 %3891, %v1079_v26  }
 0x612   :  { %1120 = vperm.xlu1 %3892, %v1082_v8  }
 0x613   :  { %1115 = vperm.xlu0 %3891, %v1081_v57  }
 0x666   :  { %v989_v29 = vpop.xlane.xlu1 %988 }
 0x667   :  { %v1011_v33 = vmul.f32 0.00390625, %v989_v29 }
 0x669   :  { %v1019_v36 = vadd.f32 1e-05, %v1011_v33 }
 0x66a   :  { %v992_v37 = vpop.xlane.xlu0 %991 }
 0x66b   :  { %3927 = vrsqrt.f32 %v1019_v36  ;;  %v1012_v0 = vmul.f32 0.00390625, %v992_v37 }
 0x66d   :  { %v1020_v28 = vadd.f32 1e-05, %v1012_v0 }
 0x66e   :  { %v995_v38 = vpop.xlane.xlu1 %994 }
 0x66f   :  { %3929 = vrsqrt.f32 %v1020_v28  ;;  %v1013_v39 = vmul.f32 0.00390625, %v995_v38 }
 0x671   :  { %v1021_v44 = vadd.f32 1e-05, %v1013_v39 }
 0x672   :  { %v998_v45 = vpop.xlane.xlu0 %997 }
 0x673   :  { %3931 = vrsqrt.f32 %v1021_v44  ;;  %v1014_v50 = vmul.f32 0.00390625, %v998_v45 }
 0x675   :  { %v3928_v51 = vpop.eup %3927  ;;  %v1022_v14 = vadd.f32 1e-05, %v1014_v50 }
 0x676   :  { %v1001_v52 = vpop.xlane.xlu1 %1000  ;;  %v1036_v59 = vmul.f32 %v3928_v51, %v4515_v30  ;;  %v1035_v60 = vmul.f32 %v3928_v51, %v4513_v54 }
 0x677   :  { %3933 = vrsqrt.f32 %v1022_v14  ;;  %v1015_v13 = vmul.f32 0.00390625, %v1001_v52  ;;  %v1071_v52 = vld [vmem:[%s5645_s7 + $0x20] sm:$0xff] }
 0x678   :  { %v1052_v48 = vmax.f32 %v1036_v59, 0.0  ;;  %v1051_v6 = vmax.f32 %v1035_v60, 0.0  ;;  %v1073_v59 = vld [vmem:[%s5645_s7 + $0x30] sm:$0xff]  ;;  %v1074_v60 = vld [vmem:[%s5645_s7 + $0x38] sm:$0xff] }
 0x679   :  { %v3930_v61 = vpop.eup %3929  ;;  %v1023_v62 = vadd.f32 1e-05, %v1015_v13  ;;  %v1072_v13 = vld [vmem:[%s5645_s7 + $0x28] sm:$0xff] }
 0x67a   :  { %v1004_v1 = vpop.xlane.xlu0 %1003  ;;  %v1038_v21 = vmul.f32 %v3930_v61, %v4523_v27  ;;  %v1037_v55 = vmul.f32 %v3930_v61, %v4521_v63 }
 0x67b   :  { %3935 = vrsqrt.f32 %v1023_v62  ;;  %v1016_v20 = vmul.f32 0.00390625, %v1004_v1 }
 0x67c   :  { %v1054_v3 = vmax.f32 %v1038_v21, 0.0  ;;  %v1053_v9 = vmax.f32 %v1037_v55, 0.0 }
 0x67d   :  { %v3932_v10 = vpop.eup %3931  ;;  %v1024_v11 = vadd.f32 1e-05, %v1016_v20 }
 0x67e   :  { %v1007_v12 = vpop.xlane.xlu1 %1006  ;;  %v3758_v35 = vpack.c.bf16 %v1054_v3, %v1052_v48  ;;  %v3760_v30 = vpack.c.bf16 %v1053_v9, %v1051_v6  ;;  %v1040_v32 = vmul.f32 %v3932_v10, %v4531_v47  ;;  %v1039_v27 = vmul.f32 %v3932_v10, %v4529_v46 }
 0x67f   :  { %3937 = vrsqrt.f32 %v1024_v11  ;;  %v1017_v54 = vmul.f32 0.00390625, %v1007_v12 }
 0x680   :  { %3759 = vmatprep.subr.bf16.mxu1 %v3758_v35  ;;  %v1056_v22 = vmax.f32 %v1040_v32, 0.0  ;;  %v1055_v24 = vmax.f32 %v1039_v27, 0.0 }
 0x681   :  { %v3934_v31 = vpop.eup %3933  ;;  %v1025_v63 = vadd.f32 1e-05, %v1017_v54  ;;  %3761 = vmatpush1.bf16.msra.mxu1 %v3760_v30 }
 0x682   :  { %v1010_v17 = vpop.xlane.xlu0 %1009  ;;  %v1042_v34 = vmul.f32 %v3934_v31, %v4539_v58  ;;  %v1041_v42 = vmul.f32 %v3934_v31, %v4537_v53  ;;  %v1086_v61 = vpop.permute.xlu1 %1085 }
 0x683   :  { %3939 = vrsqrt.f32 %v1025_v63  ;;  %v1018_v18 = vmul.f32 0.00390625, %v1010_v17 }
 0x684   :  { %v1058_v23 = vmax.f32 %v1042_v34, 0.0  ;;  %v1057_v49 = vmax.f32 %v1041_v42, 0.0 }
 0x685   :  { %v3936_v56 = vpop.eup %3935  ;;  %v1026_v25 = vadd.f32 1e-05, %v1018_v18 }
 0x686   :  { %v3762_v7 = vpack.c.bf16 %v1058_v23, %v1056_v22  ;;  %v3764_v47 = vpack.c.bf16 %v1057_v49, %v1055_v24  ;;  %v1044_v46 = vmul.f32 %v3936_v56, %v4547_v41  ;;  %v1043_v26 = vmul.f32 %v3936_v56, %v4545_v19  ;;  %v1096_v10 = vpop.permute.xlu1 %1095 }
 0x687   :  { %3941 = vrsqrt.f32 %v1026_v25 }
 0x688   :  { %3763 = vmatprep.subr.bf16.mxu1 %v3762_v7  ;;  %v1060_v57 = vmax.f32 %v1044_v46, 0.0  ;;  %v1059_v33 = vmax.f32 %v1043_v26, 0.0 }
 0x689   :  { %v3938_v8 = vpop.eup %3937  ;;  %3765 = vmatpush1.bf16.msra.mxu1 %v3764_v47 }
 0x68a   :  { %v1046_v53 = vmul.f32 %v3938_v8, %v4555_v5  ;;  %v1045_v58 = vmul.f32 %v3938_v8, %v4553_v4  ;;  %v1091_v20 = vpop.permute.xlu0 %1090  ;;  %v1101_v27 = vpop.permute.xlu1 %1100 }
 0x68c   :  { %v1062_v29 = vmax.f32 %v1046_v53, 0.0  ;;  %v1061_v36 = vmax.f32 %v1045_v58, 0.0 }
 0x68d   :  { %v3940_v37 = vpop.eup %3939 }
 0x68e   :  { %v3766_v0 = vpack.c.bf16 %v1062_v29, %v1060_v57  ;;  %v3768_v28 = vpack.c.bf16 %v1061_v36, %v1059_v33  ;;  %v1048_v38 = vmul.f32 %v3940_v37, %v4563_v16  ;;  %v1047_v41 = vmul.f32 %v3940_v37, %v4561_v15  ;;  %v1067_v16 = vld [vmem:[%s5645_s7] sm:$0xff]  ;;  %v1068_v15 = vld [vmem:[%s5645_s7 + $0x8] sm:$0xff]  ;;  %v1106_v18 = vpop.permute.xlu0 %1105  ;;  %v1111_v25 = vpop.permute.xlu1 %1110 }
 0x690   :  { %3767 = vmatprep.subr.bf16.mxu1 %v3766_v0  ;;  %v1064_v44 = vmax.f32 %v1048_v38, 0.0  ;;  %v1063_v45 = vmax.f32 %v1047_v41, 0.0 }
 0x691   :  { %v3942_v39 = vpop.eup %3941  ;;  %3769 = vmatpush1.bf16.msra.mxu1 %v3768_v28 }
 0x692   :  { %v1050_v19 = vmul.f32 %v3942_v39, %v4571_v43  ;;  %v1049_v5 = vmul.f32 %v3942_v39, %v4569_v40  ;;  %v1069_v40 = vld [vmem:[%s5645_s7 + $0x10] sm:$0xff]  ;;  %v1070_v43 = vld [vmem:[%s5645_s7 + $0x18] sm:$0xff]  ;;  %v1116_v53 = vpop.permute.xlu0 %1115  ;;  %v1121_v37 = vpop.permute.xlu1 %1120 }
 0x694   :  { %v1066_v4 = vmax.f32 %v1050_v19, 0.0  ;;  %v1065_v50 = vmax.f32 %v1049_v5, 0.0 }
 0x696   :  { %v3770_v51 = vpack.c.bf16 %v1066_v4, %v1064_v44  ;;  %v3772_v14 = vpack.c.bf16 %v1065_v50, %v1063_v45 }
 0x698   :  { %3771 = vmatprep.subr.bf16.mxu1 %v3770_v51 }
 0x699   :  { %3773 = vmatpush1.bf16.msra.mxu1 %v3772_v14 }
 0x69c   :  { %3663 = vmatmul.mubr.msk.f32.vlgmr.msra.gmra.mrb[16].mxu1 %vm448_vm2, %v1067_v16 }
 0x69d   :  { %1217 = vmatprep.mubr.f32.mxu1 %v4079_v2 }
 0x6a0   :  { %3664 = vmatmul.mubr.msk.f32.gmra.mrb[18].mxu1 %vm448_vm2, %v1068_v15 }
 0x6a1   :  { %1223 = vmatprep.mubr.f32.mxu1 %v4079_v2 }
 0x6a4   :  { %3665 = vmatmul.mubr.msk.f32.gmra.mrb[20].mxu1 %vm448_vm2, %v1069_v40 }
 0x6a5   :  { %1229 = vmatprep.mubr.f32.mxu1 %v4079_v2 }
 0x6a8   :  { %3666 = vmatmul.mubr.msk.f32.gmra.mrb[22].mxu1 %vm448_vm2, %v1070_v43 }
 0x6a9   :  { %1235 = vmatprep.mubr.f32.mxu1 %v4079_v2 }
 0x6ac   :  { %3667 = vmatmul.mubr.msk.f32.gmra.mrb[24].mxu1 %vm448_vm2, %v1071_v52 }
 0x6ad   :  { %1241 = vmatprep.mubr.f32.mxu1 %v4079_v2 }
 0x6b0   :  { %3668 = vmatmul.mubr.msk.f32.gmra.mrb[26].mxu1 %vm448_vm2, %v1072_v13 }
 0x6b1   :  { %1247 = vmatprep.mubr.f32.mxu1 %v4079_v2 }
 0x6b4   :  { %3669 = vmatmul.mubr.msk.f32.gmra.mrb[28].mxu1 %vm448_vm2, %v1073_v59 }
 0x6b5   :  { %1253 = vmatprep.mubr.f32.mxu1 %v4079_v2 }
 0x6b8   :  { %3670 = vmatmul.mubr.msk.f32.gmra.mrb[30].mxu1 %vm448_vm2, %v1074_v60 }
 0x6b9   :  { %1815 = vmatprep.mubr.f32.mxu1 %v4079_v2 }
 0x76f   :  { %v1213_v62 = vpop.f32.mrb[16].mxu1 }
 0x770   :  { %v1214_v1 = vadd.f32 %v1213_v62, %v1086_v61  ;;  %v1215_v21 = vpop.f32.mrb[17].mxu1 }
 0x771   :  { %v1216_v55 = vadd.f32 %v1215_v21, %v1086_v61 }
 0x773   :  { %v1219_v48 = vpop.f32.mrb[18].mxu1  ;;  %v1260_v3 = vadd.f32 %v1216_v55, %v1214_v1 }
 0x774   :  { %v1220_v6 = vadd.f32 %v1219_v48, %v1091_v20  ;;  %v1221_v9 = vpop.f32.mrb[19].mxu1 }
 0x775   :  { %v1222_v11 = vadd.f32 %v1221_v9, %v1091_v20  ;;  %1261 = vadd.xlane.f32.xlu0 %v1260_v3 }
 0x777   :  { %v1225_v12 = vpop.f32.mrb[20].mxu1  ;;  %v1263_v35 = vadd.f32 %v1222_v11, %v1220_v6 }
 0x778   :  { %v1226_v30 = vadd.f32 %v1225_v12, %v1096_v10  ;;  %v1227_v54 = vpop.f32.mrb[21].mxu1 }
 0x779   :  { %v1228_v32 = vadd.f32 %v1227_v54, %v1096_v10  ;;  %1264 = vadd.xlane.f32.xlu1 %v1263_v35 }
 0x77b   :  { %v1231_v31 = vpop.f32.mrb[22].mxu1  ;;  %v1266_v63 = vadd.f32 %v1228_v32, %v1226_v30 }
 0x77c   :  { %v1232_v17 = vadd.f32 %v1231_v31, %v1101_v27  ;;  %v1233_v34 = vpop.f32.mrb[23].mxu1 }
 0x77d   :  { %v1234_v42 = vadd.f32 %v1233_v34, %v1101_v27  ;;  %1267 = vadd.xlane.f32.xlu0 %v1266_v63 }
 0x77f   :  { %v1237_v22 = vpop.f32.mrb[24].mxu1  ;;  %v1269_v23 = vadd.f32 %v1234_v42, %v1232_v17 }
 0x780   :  { %v1238_v24 = vadd.f32 %v1237_v22, %v1106_v18  ;;  %v1239_v49 = vpop.f32.mrb[25].mxu1 }
 0x781   :  { %v1240_v56 = vadd.f32 %v1239_v49, %v1106_v18  ;;  %1270 = vadd.xlane.f32.xlu0 %v1269_v23 }
 0x783   :  { %v1243_v7 = vpop.f32.mrb[26].mxu1  ;;  %v1272_v47 = vadd.f32 %v1240_v56, %v1238_v24 }
 0x784   :  { %v1244_v46 = vadd.f32 %v1243_v7, %v1111_v25  ;;  %v1245_v26 = vpop.f32.mrb[27].mxu1 }
 0x785   :  { %v1246_v8 = vadd.f32 %v1245_v26, %v1111_v25  ;;  %1273 = vadd.xlane.f32.xlu1 %v1272_v47 }
 0x787   :  { %v1249_v58 = vpop.f32.mrb[28].mxu1  ;;  %v1275_v57 = vadd.f32 %v1246_v8, %v1244_v46 }
 0x788   :  { %v1250_v29 = vadd.f32 %v1249_v58, %v1116_v53  ;;  %v1251_v33 = vpop.f32.mrb[29].mxu1 }
 0x789   :  { %v1252_v36 = vadd.f32 %v1251_v33, %v1116_v53  ;;  %1276 = vadd.xlane.f32.xlu0 %v1275_v57 }
 0x78b   :  { %v1255_v0 = vpop.f32.mrb[30].mxu1  ;;  %v1278_v28 = vadd.f32 %v1252_v36, %v1250_v29 }
 0x78c   :  { %v1256_v38 = vadd.f32 %v1255_v0, %v1121_v37  ;;  %v1257_v41 = vpop.f32.mrb[31].mxu1  ;;  %v1414_v0 = vld [vmem:[%s5648_s10 + $0x10] sm:$0xff] }
 0x78d   :  { %v1258_v39 = vadd.f32 %v1257_v41, %v1121_v37  ;;  %1279 = vadd.xlane.f32.xlu1 %v1278_v28  ;;  %v1412_v37 = vld [vmem:[%s5648_s10] sm:$0xff]  ;;  %v1415_v28 = vld [vmem:[%s5648_s10 + $0x18] sm:$0xff]  ;;  %v1417_v41 = vld [vmem:[%s5648_s10 + $0x28] sm:$0xff] }
 0x78f   :  { %v1281_v19 = vadd.f32 %v1258_v39, %v1256_v38 }
 0x791   :  { %1282 = vadd.xlane.f32.xlu0 %v1281_v19  ;;  %v1419_v19 = vld [vmem:[%s5648_s10 + $0x38] sm:$0xff] }
 0x802   :  { %v1262_v5 = vpop.xlane.xlu0 %1261 }
 0x803   :  { %v1284_v44 = vmul.f32 0.00390625, %v1262_v5  ;;  %v1418_v5 = vld [vmem:[%s5648_s10 + $0x30] sm:$0xff] }
 0x805   :  { %v4657_v4 = vsub.f32 %v1214_v1, %v1284_v44  ;;  %v4659_v45 = vsub.f32 %v1216_v55, %v1284_v44 }
 0x806   :  { %v1265_v50 = vpop.xlane.xlu1 %1264 }
 0x807   :  { %v1285_v51 = vmul.f32 0.00390625, %v1265_v50  ;;  %v1308_v14 = vmul.f32 %v4657_v4, %v4657_v4  ;;  %v1309_v16 = vmul.f32 %v4659_v45, %v4659_v45 }
 0x809   :  { %v4665_v15 = vsub.f32 %v1220_v6, %v1285_v51  ;;  %v4667_v40 = vsub.f32 %v1222_v11, %v1285_v51  ;;  %v1324_v43 = vadd.f32 %v1309_v16, %v1308_v14 }
 0x80a   :  { %v1268_v52 = vpop.xlane.xlu0 %1267 }
 0x80b   :  { %v1286_v13 = vmul.f32 0.00390625, %v1268_v52  ;;  %1325 = vadd.xlane.f32.xlu1 %v1324_v43  ;;  %v1310_v59 = vmul.f32 %v4665_v15, %v4665_v15  ;;  %v1311_v60 = vmul.f32 %v4667_v40, %v4667_v40 }
 0x80d   :  { %v4673_v61 = vsub.f32 %v1226_v30, %v1286_v13  ;;  %v4675_v62 = vsub.f32 %v1228_v32, %v1286_v13  ;;  %v1327_v1 = vadd.f32 %v1311_v60, %v1310_v59 }
 0x80e   :  { %v1271_v21 = vpop.xlane.xlu0 %1270 }
 0x80f   :  { %v1287_v55 = vmul.f32 0.00390625, %v1271_v21  ;;  %1328 = vadd.xlane.f32.xlu0 %v1327_v1  ;;  %v1312_v20 = vmul.f32 %v4673_v61, %v4673_v61  ;;  %v1313_v48 = vmul.f32 %v4675_v62, %v4675_v62 }
 0x811   :  { %v4681_v3 = vsub.f32 %v1232_v17, %v1287_v55  ;;  %v4683_v6 = vsub.f32 %v1234_v42, %v1287_v55  ;;  %v1330_v9 = vadd.f32 %v1313_v48, %v1312_v20 }
 0x812   :  { %v1274_v10 = vpop.xlane.xlu1 %1273 }
 0x813   :  { %v1288_v11 = vmul.f32 0.00390625, %v1274_v10  ;;  %1331 = vadd.xlane.f32.xlu1 %v1330_v9  ;;  %v1314_v12 = vmul.f32 %v4681_v3, %v4681_v3  ;;  %v1315_v35 = vmul.f32 %v4683_v6, %v4683_v6 }
 0x815   :  { %v4689_v30 = vsub.f32 %v1238_v24, %v1288_v11  ;;  %v4691_v54 = vsub.f32 %v1240_v56, %v1288_v11  ;;  %v1333_v32 = vadd.f32 %v1315_v35, %v1314_v12 }
 0x816   :  { %v1277_v27 = vpop.xlane.xlu0 %1276 }
 0x817   :  { %v1289_v31 = vmul.f32 0.00390625, %v1277_v27  ;;  %1334 = vadd.xlane.f32.xlu0 %v1333_v32  ;;  %v1316_v63 = vmul.f32 %v4689_v30, %v4689_v30  ;;  %v1317_v17 = vmul.f32 %v4691_v54, %v4691_v54 }
 0x819   :  { %v4697_v34 = vsub.f32 %v1244_v46, %v1289_v31  ;;  %v4699_v42 = vsub.f32 %v1246_v8, %v1289_v31  ;;  %v1336_v18 = vadd.f32 %v1317_v17, %v1316_v63 }
 0x81a   :  { %v1280_v22 = vpop.xlane.xlu1 %1279 }
 0x81b   :  { %v1290_v23 = vmul.f32 0.00390625, %v1280_v22  ;;  %1337 = vadd.xlane.f32.xlu1 %v1336_v18  ;;  %v1318_v24 = vmul.f32 %v4697_v34, %v4697_v34  ;;  %v1319_v49 = vmul.f32 %v4699_v42, %v4699_v42 }
 0x81d   :  { %v4705_v56 = vsub.f32 %v1250_v29, %v1290_v23  ;;  %v4707_v25 = vsub.f32 %v1252_v36, %v1290_v23  ;;  %v1339_v7 = vadd.f32 %v1319_v49, %v1318_v24 }
 0x81e   :  { %v1283_v47 = vpop.xlane.xlu0 %1282 }
 0x81f   :  { %v1291_v46 = vmul.f32 0.00390625, %v1283_v47  ;;  %1340 = vadd.xlane.f32.xlu0 %v1339_v7  ;;  %v1320_v26 = vmul.f32 %v4705_v56, %v4705_v56  ;;  %v1321_v8 = vmul.f32 %v4707_v25, %v4707_v25 }
 0x821   :  { %v4713_v53 = vsub.f32 %v1256_v38, %v1291_v46  ;;  %v4715_v58 = vsub.f32 %v1258_v39, %v1291_v46  ;;  %v1342_v57 = vadd.f32 %v1321_v8, %v1320_v26  ;;  %v1413_v38 = vld [vmem:[%s5648_s10 + $0x8] sm:$0xff]  ;;  %v1416_v39 = vld [vmem:[%s5648_s10 + $0x20] sm:$0xff] }
 0x823   :  { %1343 = vadd.xlane.f32.xlu1 %v1342_v57  ;;  %v1322_v29 = vmul.f32 %v4713_v53, %v4713_v53  ;;  %v1323_v33 = vmul.f32 %v4715_v58, %v4715_v58 }
 0x825   :  { %v1345_v36 = vadd.f32 %v1323_v33, %v1322_v29 }
 0x827   :  { %1346 = vadd.xlane.f32.xlu0 %v1345_v36 }
 0x834   :  { %1422 = vperm.xlu1 %3892, %v1412_v37  }
 0x838   :  { %1432 = vperm.xlu1 %3892, %v1414_v0  }
 0x83c   :  { %1437 = vperm.xlu1 %3892, %v1415_v28  }
 0x83d   :  { %1427 = vperm.xlu0 %3891, %v1413_v38  }
 0x840   :  { %1447 = vperm.xlu1 %3892, %v1417_v41  }
 0x841   :  { %1442 = vperm.xlu0 %3891, %v1416_v39  }
 0x844   :  { %1457 = vperm.xlu1 %3892, %v1419_v19  }
 0x845   :  { %1452 = vperm.xlu0 %3891, %v1418_v5  }
 0x898   :  { %v1326_v44 = vpop.xlane.xlu1 %1325 }
 0x899   :  { %v1348_v50 = vmul.f32 0.00390625, %v1326_v44 }
 0x89b   :  { %v1356_v51 = vadd.f32 1e-05, %v1348_v50 }
 0x89c   :  { %v1329_v14 = vpop.xlane.xlu0 %1328 }
 0x89d   :  { %3943 = vrsqrt.f32 %v1356_v51  ;;  %v1349_v16 = vmul.f32 0.00390625, %v1329_v14 }
 0x89f   :  { %v1357_v43 = vadd.f32 1e-05, %v1349_v16 }
 0x8a0   :  { %v1332_v52 = vpop.xlane.xlu1 %1331 }
 0x8a1   :  { %3945 = vrsqrt.f32 %v1357_v43  ;;  %v1350_v13 = vmul.f32 0.00390625, %v1332_v52 }
 0x8a3   :  { %v1358_v59 = vadd.f32 1e-05, %v1350_v13 }
 0x8a4   :  { %v1335_v60 = vpop.xlane.xlu0 %1334 }
 0x8a5   :  { %3947 = vrsqrt.f32 %v1358_v59  ;;  %v1351_v1 = vmul.f32 0.00390625, %v1335_v60 }
 0x8a7   :  { %v3944_v21 = vpop.eup %3943  ;;  %v1359_v55 = vadd.f32 1e-05, %v1351_v1 }
 0x8a8   :  { %v1338_v20 = vpop.xlane.xlu1 %1337  ;;  %v1373_v9 = vmul.f32 %v3944_v21, %v4659_v45  ;;  %v1372_v10 = vmul.f32 %v3944_v21, %v4657_v4 }
 0x8a9   :  { %3949 = vrsqrt.f32 %v1359_v55  ;;  %v1352_v48 = vmul.f32 0.00390625, %v1338_v20  ;;  %v1408_v20 = vld [vmem:[%s5647_s9 + $0x20] sm:$0xff] }
 0x8aa   :  { %v1389_v63 = vmax.f32 %v1373_v9, 0.0  ;;  %v1388_v18 = vmax.f32 %v1372_v10, 0.0  ;;  %v1410_v9 = vld [vmem:[%s5647_s9 + $0x30] sm:$0xff]  ;;  %v1411_v10 = vld [vmem:[%s5647_s9 + $0x38] sm:$0xff] }
 0x8ab   :  { %v3946_v11 = vpop.eup %3945  ;;  %v1360_v12 = vadd.f32 1e-05, %v1352_v48  ;;  %v1409_v48 = vld [vmem:[%s5647_s9 + $0x28] sm:$0xff] }
 0x8ac   :  { %v1341_v35 = vpop.xlane.xlu0 %1340  ;;  %v1375_v32 = vmul.f32 %v3946_v11, %v4667_v40  ;;  %v1374_v27 = vmul.f32 %v3946_v11, %v4665_v15 }
 0x8ad   :  { %3951 = vrsqrt.f32 %v1360_v12  ;;  %v1353_v31 = vmul.f32 0.00390625, %v1341_v35 }
 0x8ae   :  { %v1391_v17 = vmax.f32 %v1375_v32, 0.0  ;;  %v1390_v22 = vmax.f32 %v1374_v27, 0.0 }
 0x8af   :  { %v3948_v23 = vpop.eup %3947  ;;  %v1361_v24 = vadd.f32 1e-05, %v1353_v31 }
 0x8b0   :  { %v1344_v49 = vpop.xlane.xlu1 %1343  ;;  %v3774_v7 = vpack.c.bf16 %v1391_v17, %v1389_v63  ;;  %v3776_v45 = vpack.c.bf16 %v1390_v22, %v1388_v18  ;;  %v1377_v47 = vmul.f32 %v3948_v23, %v4675_v62  ;;  %v1376_v40 = vmul.f32 %v3948_v23, %v4673_v61 }
 0x8b1   :  { %3953 = vrsqrt.f32 %v1361_v24  ;;  %v1354_v4 = vmul.f32 0.00390625, %v1344_v49 }
 0x8b2   :  { %3775 = vmatprep.subr.bf16.mxu0 %v3774_v7  ;;  %v1393_v33 = vmax.f32 %v1377_v47, 0.0  ;;  %v1392_v37 = vmax.f32 %v1376_v40, 0.0 }
 0x8b3   :  { %v3950_v46 = vpop.eup %3949  ;;  %v1362_v15 = vadd.f32 1e-05, %v1354_v4  ;;  %3777 = vmatpush1.bf16.msra.mxu0 %v3776_v45 }
 0x8b4   :  { %v1347_v26 = vpop.xlane.xlu0 %1346  ;;  %v1379_v8 = vmul.f32 %v3950_v46, %v4683_v6  ;;  %v1378_v57 = vmul.f32 %v3950_v46, %v4681_v3  ;;  %v1423_v11 = vpop.permute.xlu1 %1422 }
 0x8b5   :  { %3955 = vrsqrt.f32 %v1362_v15  ;;  %v1355_v29 = vmul.f32 0.00390625, %v1347_v26 }
 0x8b6   :  { %v1395_v36 = vmax.f32 %v1379_v8, 0.0  ;;  %v1394_v0 = vmax.f32 %v1378_v57, 0.0 }
 0x8b7   :  { %v3952_v28 = vpop.eup %3951  ;;  %v1363_v38 = vadd.f32 1e-05, %v1355_v29 }
 0x8b8   :  { %v3778_v41 = vpack.c.bf16 %v1395_v36, %v1393_v33  ;;  %v3780_v62 = vpack.c.bf16 %v1394_v0, %v1392_v37  ;;  %v1381_v61 = vmul.f32 %v3952_v28, %v4691_v54  ;;  %v1380_v39 = vmul.f32 %v3952_v28, %v4689_v30  ;;  %v1433_v23 = vpop.permute.xlu1 %1432 }
 0x8b9   :  { %3957 = vrsqrt.f32 %v1363_v38 }
 0x8ba   :  { %3779 = vmatprep.subr.bf16.mxu0 %v3778_v41  ;;  %v1397_v5 = vmax.f32 %v1381_v61, 0.0  ;;  %v1396_v50 = vmax.f32 %v1380_v39, 0.0 }
 0x8bb   :  { %v3954_v19 = vpop.eup %3953  ;;  %3781 = vmatpush1.bf16.msra.mxu0 %v3780_v62 }
 0x8bc   :  { %v1383_v3 = vmul.f32 %v3954_v19, %v4699_v42  ;;  %v1382_v6 = vmul.f32 %v3954_v19, %v4697_v34  ;;  %v1428_v31 = vpop.permute.xlu0 %1427  ;;  %v1438_v40 = vpop.permute.xlu1 %1437 }
 0x8be   :  { %v1399_v44 = vmax.f32 %v1383_v3, 0.0  ;;  %v1398_v51 = vmax.f32 %v1382_v6, 0.0 }
 0x8bf   :  { %v3956_v14 = vpop.eup %3955 }
 0x8c0   :  { %v3782_v16 = vpack.c.bf16 %v1399_v44, %v1397_v5  ;;  %v3784_v43 = vpack.c.bf16 %v1398_v51, %v1396_v50  ;;  %v1385_v52 = vmul.f32 %v3956_v14, %v4707_v25  ;;  %v1384_v54 = vmul.f32 %v3956_v14, %v4705_v56  ;;  %v1404_v25 = vld [vmem:[%s5647_s9] sm:$0xff]  ;;  %v1405_v56 = vld [vmem:[%s5647_s9 + $0x8] sm:$0xff]  ;;  %v1443_v29 = vpop.permute.xlu0 %1442  ;;  %v1448_v38 = vpop.permute.xlu1 %1447 }
 0x8c2   :  { %3783 = vmatprep.subr.bf16.mxu0 %v3782_v16  ;;  %v1401_v59 = vmax.f32 %v1385_v52, 0.0  ;;  %v1400_v60 = vmax.f32 %v1384_v54, 0.0 }
 0x8c3   :  { %v3958_v13 = vpop.eup %3957  ;;  %3785 = vmatpush1.bf16.msra.mxu0 %v3784_v43 }
 0x8c4   :  { %v1387_v30 = vmul.f32 %v3958_v13, %v4715_v58  ;;  %v1386_v42 = vmul.f32 %v3958_v13, %v4713_v53  ;;  %v1406_v53 = vld [vmem:[%s5647_s9 + $0x10] sm:$0xff]  ;;  %v1407_v58 = vld [vmem:[%s5647_s9 + $0x18] sm:$0xff]  ;;  %v1453_v3 = vpop.permute.xlu0 %1452  ;;  %v1458_v14 = vpop.permute.xlu1 %1457 }
 0x8c6   :  { %v1403_v34 = vmax.f32 %v1387_v30, 0.0  ;;  %v1402_v1 = vmax.f32 %v1386_v42, 0.0 }
 0x8c8   :  { %v3786_v21 = vpack.c.bf16 %v1403_v34, %v1401_v59  ;;  %v3788_v55 = vpack.c.bf16 %v1402_v1, %v1400_v60 }
 0x8ca   :  { %3787 = vmatprep.subr.bf16.mxu0 %v3786_v21 }
 0x8cb   :  { %3789 = vmatpush1.bf16.msra.mxu0 %v3788_v55 }
 0x8ce   :  { %3671 = vmatmul.mubr.msk.f32.vlgmr.msra.gmra.mrb[32].mxu0 %vm448_vm2, %v1404_v25 }
 0x8cf   :  { %1554 = vmatprep.mubr.f32.mxu0 %v4079_v2 }
 0x8d2   :  { %3672 = vmatmul.mubr.msk.f32.gmra.mrb[34].mxu0 %vm448_vm2, %v1405_v56 }
 0x8d3   :  { %1560 = vmatprep.mubr.f32.mxu0 %v4079_v2 }
 0x8d6   :  { %3673 = vmatmul.mubr.msk.f32.gmra.mrb[36].mxu0 %vm448_vm2, %v1406_v53 }
 0x8d7   :  { %1566 = vmatprep.mubr.f32.mxu0 %v4079_v2 }
 0x8da   :  { %3674 = vmatmul.mubr.msk.f32.gmra.mrb[38].mxu0 %vm448_vm2, %v1407_v58 }
 0x8db   :  { %1572 = vmatprep.mubr.f32.mxu0 %v4079_v2 }
 0x8de   :  { %3675 = vmatmul.mubr.msk.f32.gmra.mrb[40].mxu0 %vm448_vm2, %v1408_v20 }
 0x8df   :  { %1578 = vmatprep.mubr.f32.mxu0 %v4079_v2 }
 0x8e2   :  { %3676 = vmatmul.mubr.msk.f32.gmra.mrb[42].mxu0 %vm448_vm2, %v1409_v48 }
 0x8e3   :  { %1584 = vmatprep.mubr.f32.mxu0 %v4079_v2 }
 0x8e6   :  { %3677 = vmatmul.mubr.msk.f32.gmra.mrb[44].mxu0 %vm448_vm2, %v1410_v9 }
 0x8e7   :  { %1590 = vmatprep.mubr.f32.mxu0 %v4079_v2 }
 0x8ea   :  { %3678 = vmatmul.mubr.msk.f32.gmra.mrb[46].mxu0 %vm448_vm2, %v1411_v10 }
 0x8eb   :  { %2323 = vmatprep.mubr.f32.mxu0 %v4079_v2 }
 0x9a1   :  { %v1550_v12 = vpop.f32.mrb[32].mxu0 }
 0x9a2   :  { %v1551_v35 = vadd.f32 %v1550_v12, %v1423_v11  ;;  %v1552_v32 = vpop.f32.mrb[33].mxu0 }
 0x9a3   :  { %v1553_v27 = vadd.f32 %v1552_v32, %v1423_v11 }
 0x9a5   :  { %v1597_v63 = vadd.f32 %v1553_v27, %v1551_v35  ;;  %v1556_v17 = vpop.f32.mrb[34].mxu0 }
 0x9a6   :  { %v1557_v18 = vadd.f32 %v1556_v17, %v1428_v31  ;;  %v1558_v22 = vpop.f32.mrb[35].mxu0 }
 0x9a7   :  { %v1559_v24 = vadd.f32 %v1558_v22, %v1428_v31  ;;  %1598 = vadd.xlane.f32.xlu0 %v1597_v63 }
 0x9a9   :  { %v1600_v49 = vadd.f32 %v1559_v24, %v1557_v18  ;;  %v1562_v7 = vpop.f32.mrb[36].mxu0 }
 0x9aa   :  { %v1563_v45 = vadd.f32 %v1562_v7, %v1433_v23  ;;  %v1564_v4 = vpop.f32.mrb[37].mxu0 }
 0x9ab   :  { %v1565_v47 = vadd.f32 %v1564_v4, %v1433_v23  ;;  %1601 = vadd.xlane.f32.xlu1 %v1600_v49 }
 0x9ad   :  { %v1603_v46 = vadd.f32 %v1565_v47, %v1563_v45  ;;  %v1568_v15 = vpop.f32.mrb[38].mxu0 }
 0x9ae   :  { %v1569_v26 = vadd.f32 %v1568_v15, %v1438_v40  ;;  %v1570_v8 = vpop.f32.mrb[39].mxu0 }
 0x9af   :  { %v1571_v57 = vadd.f32 %v1570_v8, %v1438_v40  ;;  %1604 = vadd.xlane.f32.xlu0 %v1603_v46 }
 0x9b1   :  { %v1606_v33 = vadd.f32 %v1571_v57, %v1569_v26  ;;  %v1574_v36 = vpop.f32.mrb[40].mxu0 }
 0x9b2   :  { %v1575_v37 = vadd.f32 %v1574_v36, %v1443_v29  ;;  %v1576_v0 = vpop.f32.mrb[41].mxu0 }
 0x9b3   :  { %v1577_v28 = vadd.f32 %v1576_v0, %v1443_v29  ;;  %1607 = vadd.xlane.f32.xlu0 %v1606_v33 }
 0x9b5   :  { %v1609_v41 = vadd.f32 %v1577_v28, %v1575_v37  ;;  %v1580_v62 = vpop.f32.mrb[42].mxu0 }
 0x9b6   :  { %v1581_v61 = vadd.f32 %v1580_v62, %v1448_v38  ;;  %v1582_v39 = vpop.f32.mrb[43].mxu0 }
 0x9b7   :  { %v1583_v19 = vadd.f32 %v1582_v39, %v1448_v38  ;;  %1610 = vadd.xlane.f32.xlu1 %v1609_v41 }
 0x9b9   :  { %v1612_v6 = vadd.f32 %v1583_v19, %v1581_v61  ;;  %v1586_v5 = vpop.f32.mrb[44].mxu0 }
 0x9ba   :  { %v1587_v44 = vadd.f32 %v1586_v5, %v1453_v3  ;;  %v1588_v50 = vpop.f32.mrb[45].mxu0 }
 0x9bb   :  { %v1589_v51 = vadd.f32 %v1588_v50, %v1453_v3  ;;  %1613 = vadd.xlane.f32.xlu0 %v1612_v6 }
 0x9bd   :  { %v1615_v16 = vadd.f32 %v1589_v51, %v1587_v44  ;;  %v1592_v43 = vpop.f32.mrb[46].mxu0 }
 0x9be   :  { %v1593_v52 = vadd.f32 %v1592_v43, %v1458_v14  ;;  %v1594_v54 = vpop.f32.mrb[47].mxu0  ;;  %v1847_v43 = vld [vmem:[%s5640_s2 + $0x18] sm:$0xff] }
 0x9bf   :  { %v1595_v13 = vadd.f32 %v1594_v54, %v1458_v14  ;;  %1616 = vadd.xlane.f32.xlu1 %v1615_v16  ;;  %v1844_v14 = vld [vmem:[%s5640_s2] sm:$0xff]  ;;  %v1846_v16 = vld [vmem:[%s5640_s2 + $0x10] sm:$0xff]  ;;  %v1849_v54 = vld [vmem:[%s5640_s2 + $0x28] sm:$0xff] }
 0x9c1   :  { %v1618_v30 = vadd.f32 %v1595_v13, %v1593_v52 }
 0x9c3   :  { %1619 = vadd.xlane.f32.xlu0 %v1618_v30  ;;  %v1851_v30 = vld [vmem:[%s5640_s2 + $0x38] sm:$0xff] }
 0xa34   :  { %v1599_v42 = vpop.xlane.xlu0 %1598 }
 0xa35   :  { %v1621_v59 = vmul.f32 0.00390625, %v1599_v42  ;;  %v1850_v42 = vld [vmem:[%s5640_s2 + $0x30] sm:$0xff] }
 0xa37   :  { %v4801_v34 = vsub.f32 %v1551_v35, %v1621_v59  ;;  %v4803_v60 = vsub.f32 %v1553_v27, %v1621_v59 }
 0xa38   :  { %v1602_v1 = vpop.xlane.xlu1 %1601 }
 0xa39   :  { %v1645_v21 = vmul.f32 %v4801_v34, %v4801_v34  ;;  %v1646_v55 = vmul.f32 %v4803_v60, %v4803_v60  ;;  %v1622_v25 = vmul.f32 0.00390625, %v1602_v1 }
 0xa3b   :  { %v4809_v56 = vsub.f32 %v1557_v18, %v1622_v25  ;;  %v4811_v53 = vsub.f32 %v1559_v24, %v1622_v25  ;;  %v1661_v58 = vadd.f32 %v1646_v55, %v1645_v21 }
 0xa3c   :  { %v1605_v20 = vpop.xlane.xlu0 %1604 }
 0xa3d   :  { %v1647_v48 = vmul.f32 %v4809_v56, %v4809_v56  ;;  %v1648_v9 = vmul.f32 %v4811_v53, %v4811_v53  ;;  %v1623_v10 = vmul.f32 0.00390625, %v1605_v20  ;;  %1662 = vadd.xlane.f32.xlu1 %v1661_v58 }
 0xa3f   :  { %v4817_v11 = vsub.f32 %v1563_v45, %v1623_v10  ;;  %v4819_v12 = vsub.f32 %v1565_v47, %v1623_v10  ;;  %v1664_v35 = vadd.f32 %v1648_v9, %v1647_v48 }
 0xa40   :  { %v1608_v32 = vpop.xlane.xlu0 %1607 }
 0xa41   :  { %v1649_v27 = vmul.f32 %v4817_v11, %v4817_v11  ;;  %v1650_v31 = vmul.f32 %v4819_v12, %v4819_v12  ;;  %v1624_v63 = vmul.f32 0.00390625, %v1608_v32  ;;  %1665 = vadd.xlane.f32.xlu0 %v1664_v35 }
 0xa43   :  { %v4825_v17 = vsub.f32 %v1569_v26, %v1624_v63  ;;  %v4827_v18 = vsub.f32 %v1571_v57, %v1624_v63  ;;  %v1667_v22 = vadd.f32 %v1650_v31, %v1649_v27 }
 0xa44   :  { %v1611_v23 = vpop.xlane.xlu1 %1610 }
 0xa45   :  { %v1651_v24 = vmul.f32 %v4825_v17, %v4825_v17  ;;  %v1652_v49 = vmul.f32 %v4827_v18, %v4827_v18  ;;  %v1625_v7 = vmul.f32 0.00390625, %v1611_v23  ;;  %1668 = vadd.xlane.f32.xlu1 %v1667_v22 }
 0xa47   :  { %v4833_v45 = vsub.f32 %v1575_v37, %v1625_v7  ;;  %v4835_v4 = vsub.f32 %v1577_v28, %v1625_v7  ;;  %v1670_v47 = vadd.f32 %v1652_v49, %v1651_v24 }
 0xa48   :  { %v1614_v40 = vpop.xlane.xlu0 %1613 }
 0xa49   :  { %v1653_v46 = vmul.f32 %v4833_v45, %v4833_v45  ;;  %v1654_v15 = vmul.f32 %v4835_v4, %v4835_v4  ;;  %v1626_v26 = vmul.f32 0.00390625, %v1614_v40  ;;  %1671 = vadd.xlane.f32.xlu0 %v1670_v47 }
 0xa4b   :  { %v4841_v8 = vsub.f32 %v1581_v61, %v1626_v26  ;;  %v4843_v57 = vsub.f32 %v1583_v19, %v1626_v26  ;;  %v1673_v29 = vadd.f32 %v1654_v15, %v1653_v46 }
 0xa4c   :  { %v1617_v33 = vpop.xlane.xlu1 %1616 }
 0xa4d   :  { %v1655_v36 = vmul.f32 %v4841_v8, %v4841_v8  ;;  %v1656_v37 = vmul.f32 %v4843_v57, %v4843_v57  ;;  %v1627_v0 = vmul.f32 0.00390625, %v1617_v33  ;;  %1674 = vadd.xlane.f32.xlu1 %v1673_v29 }
 0xa4f   :  { %v4849_v28 = vsub.f32 %v1587_v44, %v1627_v0  ;;  %v4851_v38 = vsub.f32 %v1589_v51, %v1627_v0  ;;  %v1676_v41 = vadd.f32 %v1656_v37, %v1655_v36 }
 0xa50   :  { %v1620_v62 = vpop.xlane.xlu0 %1619 }
 0xa51   :  { %v1657_v61 = vmul.f32 %v4849_v28, %v4849_v28  ;;  %v1658_v39 = vmul.f32 %v4851_v38, %v4851_v38  ;;  %v1628_v19 = vmul.f32 0.00390625, %v1620_v62  ;;  %1677 = vadd.xlane.f32.xlu0 %v1676_v41 }
 0xa53   :  { %v4857_v3 = vsub.f32 %v1593_v52, %v1628_v19  ;;  %v4859_v6 = vsub.f32 %v1595_v13, %v1628_v19  ;;  %v1679_v5 = vadd.f32 %v1658_v39, %v1657_v61  ;;  %v1845_v52 = vld [vmem:[%s5640_s2 + $0x8] sm:$0xff]  ;;  %v1848_v13 = vld [vmem:[%s5640_s2 + $0x20] sm:$0xff] }
 0xa55   :  { %v1659_v44 = vmul.f32 %v4857_v3, %v4857_v3  ;;  %v1660_v50 = vmul.f32 %v4859_v6, %v4859_v6  ;;  %1680 = vadd.xlane.f32.xlu1 %v1679_v5 }
 0xa57   :  { %v1682_v51 = vadd.f32 %v1660_v50, %v1659_v44 }
 0xa59   :  { %1683 = vadd.xlane.f32.xlu0 %v1682_v51 }
 0xa66   :  { %1854 = vperm.xlu1 %3892, %v1844_v14  }
 0xa6a   :  { %1864 = vperm.xlu1 %3892, %v1846_v16  }
 0xa6e   :  { %1869 = vperm.xlu1 %3892, %v1847_v43  }
 0xa6f   :  { %1859 = vperm.xlu0 %3891, %v1845_v52  }
 0xa72   :  { %1879 = vperm.xlu1 %3892, %v1849_v54  }
 0xa73   :  { %1874 = vperm.xlu0 %3891, %v1848_v13  }
 0xa76   :  { %1889 = vperm.xlu1 %3892, %v1851_v30  }
 0xa77   :  { %1884 = vperm.xlu0 %3891, %v1850_v42  }
 0xaca   :  { %v1663_v59 = vpop.xlane.xlu1 %1662 }
 0xacb   :  { %v1685_v1 = vmul.f32 0.00390625, %v1663_v59 }
 0xacd   :  { %v1693_v21 = vadd.f32 1e-05, %v1685_v1 }
 0xace   :  { %v1666_v55 = vpop.xlane.xlu0 %1665 }
 0xacf   :  { %3959 = vrsqrt.f32 %v1693_v21  ;;  %v1686_v25 = vmul.f32 0.00390625, %v1666_v55 }
 0xad1   :  { %v1694_v58 = vadd.f32 1e-05, %v1686_v25 }
 0xad2   :  { %v1669_v20 = vpop.xlane.xlu1 %1668 }
 0xad3   :  { %3961 = vrsqrt.f32 %v1694_v58  ;;  %v1687_v48 = vmul.f32 0.00390625, %v1669_v20 }
 0xad5   :  { %v1695_v9 = vadd.f32 1e-05, %v1687_v48 }
 0xad6   :  { %v1672_v10 = vpop.xlane.xlu0 %1671 }
 0xad7   :  { %3963 = vrsqrt.f32 %v1695_v9  ;;  %v1688_v35 = vmul.f32 0.00390625, %v1672_v10 }
 0xad9   :  { %v3960_v32 = vpop.eup %3959  ;;  %v1696_v27 = vadd.f32 1e-05, %v1688_v35 }
 0xada   :  { %v1675_v31 = vpop.xlane.xlu1 %1674  ;;  %v1710_v22 = vmul.f32 %v3960_v32, %v4803_v60  ;;  %v1709_v23 = vmul.f32 %v3960_v32, %v4801_v34 }
 0xadb   :  { %3965 = vrsqrt.f32 %v1696_v27  ;;  %v1689_v63 = vmul.f32 0.00390625, %v1675_v31 }
 0xadc   :  { %v1726_v15 = vmax.f32 %v1710_v22, 0.0  ;;  %v1725_v29 = vmax.f32 %v1709_v23, 0.0  ;;  %v1839_v22 = vld [vmem:[%s5639_s1 + $0x18] sm:$0xff]  ;;  %v1840_v23 = vld [vmem:[%s5639_s1 + $0x20] sm:$0xff] }
 0xadd   :  { %v3962_v24 = vpop.eup %3961  ;;  %v1697_v49 = vadd.f32 1e-05, %v1689_v63 }
 0xade   :  { %v1678_v7 = vpop.xlane.xlu0 %1677  ;;  %v1712_v47 = vmul.f32 %v3962_v24, %v4811_v53  ;;  %v1711_v40 = vmul.f32 %v3962_v24, %v4809_v56  ;;  %v1841_v24 = vld [vmem:[%s5639_s1 + $0x28] sm:$0xff] }
 0xadf   :  { %3967 = vrsqrt.f32 %v1697_v49  ;;  %v1690_v46 = vmul.f32 0.00390625, %v1678_v7  ;;  %v1842_v49 = vld [vmem:[%s5639_s1 + $0x30] sm:$0xff]  ;;  %v1843_v7 = vld [vmem:[%s5639_s1 + $0x38] sm:$0xff] }
 0xae0   :  { %v1728_v26 = vmax.f32 %v1712_v47, 0.0  ;;  %v1727_v33 = vmax.f32 %v1711_v40, 0.0 }
 0xae1   :  { %v3964_v36 = vpop.eup %3963  ;;  %v1698_v37 = vadd.f32 1e-05, %v1690_v46 }
 0xae2   :  { %v1681_v0 = vpop.xlane.xlu1 %1680  ;;  %v3790_v41 = vpack.c.bf16 %v1728_v26, %v1726_v15  ;;  %v3792_v60 = vpack.c.bf16 %v1727_v33, %v1725_v29  ;;  %v1714_v62 = vmul.f32 %v3964_v36, %v4819_v12  ;;  %v1713_v53 = vmul.f32 %v3964_v36, %v4817_v11 }
 0xae3   :  { %3969 = vrsqrt.f32 %v1698_v37  ;;  %v1691_v34 = vmul.f32 0.00390625, %v1681_v0 }
 0xae4   :  { %3791 = vmatprep.subr.bf16.mxu1 %v3790_v41  ;;  %v1730_v50 = vmax.f32 %v1714_v62, 0.0  ;;  %v1729_v14 = vmax.f32 %v1713_v53, 0.0 }
 0xae5   :  { %v3966_v61 = vpop.eup %3965  ;;  %v1699_v56 = vadd.f32 1e-05, %v1691_v34  ;;  %3793 = vmatpush1.bf16.msra.mxu1 %v3792_v60 }
 0xae6   :  { %v1684_v39 = vpop.xlane.xlu0 %1683  ;;  %v1716_v19 = vmul.f32 %v3966_v61, %v4827_v18  ;;  %v1715_v5 = vmul.f32 %v3966_v61, %v4825_v17  ;;  %v1855_v46 = vpop.permute.xlu1 %1854 }
 0xae7   :  { %3971 = vrsqrt.f32 %v1699_v56  ;;  %v1692_v44 = vmul.f32 0.00390625, %v1684_v39 }
 0xae8   :  { %v1732_v51 = vmax.f32 %v1716_v19, 0.0  ;;  %v1731_v16 = vmax.f32 %v1715_v5, 0.0 }
 0xae9   :  { %v3968_v43 = vpop.eup %3967  ;;  %v1700_v52 = vadd.f32 1e-05, %v1692_v44 }
 0xaea   :  { %v3794_v54 = vpack.c.bf16 %v1732_v51, %v1730_v50  ;;  %v3796_v12 = vpack.c.bf16 %v1731_v16, %v1729_v14  ;;  %v1718_v11 = vmul.f32 %v3968_v43, %v4835_v4  ;;  %v1717_v13 = vmul.f32 %v3968_v43, %v4833_v45  ;;  %v1865_v34 = vpop.permute.xlu1 %1864 }
 0xaeb   :  { %3973 = vrsqrt.f32 %v1700_v52 }
 0xaec   :  { %3795 = vmatprep.subr.bf16.mxu1 %v3794_v54  ;;  %v1734_v42 = vmax.f32 %v1718_v11, 0.0  ;;  %v1733_v1 = vmax.f32 %v1717_v13, 0.0 }
 0xaed   :  { %v3970_v30 = vpop.eup %3969  ;;  %3797 = vmatpush1.bf16.msra.mxu1 %v3796_v12 }
 0xaee   :  { %v1720_v17 = vmul.f32 %v3970_v30, %v4843_v57  ;;  %v1719_v18 = vmul.f32 %v3970_v30, %v4841_v8  ;;  %v3681_v8 = vld [vmem:[%s5638_s0 + $0x8] sm:$0xff]  ;;  %v1860_v36 = vpop.permute.xlu0 %1859  ;;  %v1870_v5 = vpop.permute.xlu1 %1869 }
 0xaef   :  { %v1893_v63 = vcombine.high %v3681_v8, %v3681_v8 }
 0xaf0   :  { %v1736_v59 = vmax.f32 %v1720_v17, 0.0  ;;  %v1735_v21 = vmax.f32 %v1719_v18, 0.0 }
 0xaf1   :  { %v3972_v55 = vpop.eup %3971 }
 0xaf2   :  { %v3798_v25 = vpack.c.bf16 %v1736_v59, %v1734_v42  ;;  %v3800_v58 = vpack.c.bf16 %v1735_v21, %v1733_v1  ;;  %v1722_v20 = vmul.f32 %v3972_v55, %v4851_v38  ;;  %v1721_v4 = vmul.f32 %v3972_v55, %v4849_v28  ;;  %v1741_v28 = vld [vmem:[%s5649_s11] sm:$0x3]  ;;  %v1875_v43 = vpop.permute.xlu0 %1874  ;;  %v1880_v30 = vpop.permute.xlu1 %1879 }
 0xaf3   :  { %v1836_v38 = vld [vmem:[%s5639_s1] sm:$0xff] }
 0xaf4   :  { %3799 = vmatprep.subr.bf16.mxu1 %v3798_v25  ;;  %v1738_v9 = vmax.f32 %v1722_v20, 0.0  ;;  %v1737_v35 = vmax.f32 %v1721_v4, 0.0 }
 0xaf5   :  { %v3974_v48 = vpop.eup %3973  ;;  %3801 = vmatpush1.bf16.msra.mxu1 %v3800_v58 }
 0xaf6   :  { %v1724_v45 = vmul.f32 %v3974_v48, %v4859_v6  ;;  %v1723_v57 = vmul.f32 %v3974_v48, %v4857_v3  ;;  %v1837_v3 = vld [vmem:[%s5639_s1 + $0x8] sm:$0xff]  ;;  %v1838_v6 = vld [vmem:[%s5639_s1 + $0x10] sm:$0xff]  ;;  %v1885_v21 = vpop.permute.xlu0 %1884  ;;  %v1890_v48 = vpop.permute.xlu1 %1889 }
 0xaf8   :  { %v1740_v10 = vmax.f32 %v1724_v45, 0.0  ;;  %v1739_v32 = vmax.f32 %v1723_v57, 0.0 }
 0xafa   :  { %v3802_v27 = vpack.c.bf16 %v1740_v10, %v1738_v9  ;;  %v3804_v31 = vpack.c.bf16 %v1739_v32, %v1737_v35 }
 0xafc   :  { %3803 = vmatprep.subr.bf16.mxu1 %v3802_v27 }
 0xafd   :  { %3805 = vmatpush1.bf16.msra.mxu1 %v3804_v31 }
 0xafe   :  { %3682 = vmatprep.subr.msk.mxu1 %vm129_vm0, %v1893_v63 }
 0xb00   :  { %3679 = vmatmul.mubr.msk.f32.vlgmr.msra.gmra.mrb[32].mxu1 %vm448_vm2, %v1741_v28 }
 0xb01   :  { %3683 = vmatpush1.msk.msra.mxu1 %vm129_vm0, %v3681_v8  ;;  %1986 = vmatprep.mubr.f32.mxu1 %v4079_v2 }
 0xb04   :  { %3684 = vmatmul.mubr.msk.f32.vlgmr.msra.gmra.mrb[34].mxu1 %vm104_vm1, %v1836_v38 }
 0xb05   :  { %1992 = vmatprep.mubr.f32.mxu1 %v4079_v2 }
 0xb08   :  { %3685 = vmatmul.mubr.msk.f32.gmra.mrb[36].mxu1 %vm104_vm1, %v1837_v3 }
 0xb09   :  { %1998 = vmatprep.mubr.f32.mxu1 %v4079_v2 }
 0xb0c   :  { %3686 = vmatmul.mubr.msk.f32.gmra.mrb[38].mxu1 %vm104_vm1, %v1838_v6 }
 0xb0d   :  { %2004 = vmatprep.mubr.f32.mxu1 %v4079_v2 }
 0xb10   :  { %3687 = vmatmul.mubr.msk.f32.gmra.mrb[40].mxu1 %vm104_vm1, %v1839_v22 }
 0xb11   :  { %2010 = vmatprep.mubr.f32.mxu1 %v4079_v2 }
 0xb14   :  { %3688 = vmatmul.mubr.msk.f32.gmra.mrb[42].mxu1 %vm104_vm1, %v1840_v23 }
 0xb15   :  { %2016 = vmatprep.mubr.f32.mxu1 %v4079_v2 }
 0xb18   :  { %3689 = vmatmul.mubr.msk.f32.gmra.mrb[44].mxu1 %vm104_vm1, %v1841_v24 }
 0xb19   :  { %2022 = vmatprep.mubr.f32.mxu1 %v4079_v2 }
 0xb1c   :  { %3690 = vmatmul.mubr.msk.f32.gmra.mrb[46].mxu1 %vm104_vm1, %v1842_v49 }
 0xb1d   :  { %2028 = vmatprep.mubr.f32.mxu1 %v4079_v2 }
 0xb20   :  { %3691 = vmatmul.mubr.msk.f32.gmra.mrb[48].mxu1 %vm104_vm1, %v1843_v7 }
 0xb21   :  { %2660 = vmatprep.mubr.f32.mxu1 %v4079_v2 }
 0xbd3   :  { %v4955_v47 = vpop.f32.mrb[32].mxu1 }
 0xbd4   :  { %v4957_v40 = vpop.f32.mrb[33].mxu1 }
 0xbd7   :  { %v1988_v15 = vpop.f32.mrb[34].mxu1 }
 0xbd8   :  { %v1989_v26 = vadd.f32 %v1988_v15, %v1855_v46  ;;  %v1990_v29 = vpop.f32.mrb[35].mxu1 }
 0xbd9   :  { %v1991_v33 = vadd.f32 %v1990_v29, %v1855_v46 }
 0xbdb   :  { %v2035_v37 = vadd.f32 %v1991_v33, %v1989_v26  ;;  %v1994_v0 = vpop.f32.mrb[36].mxu1 }
 0xbdc   :  { %v1995_v41 = vadd.f32 %v1994_v0, %v1860_v36  ;;  %v1996_v60 = vpop.f32.mrb[37].mxu1 }
 0xbdd   :  { %v1997_v62 = vadd.f32 %v1996_v60, %v1860_v36  ;;  %2036 = vadd.xlane.f32.xlu0 %v2035_v37 }
 0xbdf   :  { %v2038_v53 = vadd.f32 %v1997_v62, %v1995_v41  ;;  %v2000_v61 = vpop.f32.mrb[38].mxu1 }
 0xbe0   :  { %v2001_v56 = vadd.f32 %v2000_v61, %v1865_v34  ;;  %v2002_v39 = vpop.f32.mrb[39].mxu1 }
 0xbe1   :  { %v2003_v19 = vadd.f32 %v2002_v39, %v1865_v34  ;;  %2039 = vadd.xlane.f32.xlu1 %v2038_v53 }
 0xbe3   :  { %v2041_v44 = vadd.f32 %v2003_v19, %v2001_v56  ;;  %v2006_v50 = vpop.f32.mrb[40].mxu1 }
 0xbe4   :  { %v2007_v51 = vadd.f32 %v2006_v50, %v1870_v5  ;;  %v2008_v14 = vpop.f32.mrb[41].mxu1 }
 0xbe5   :  { %v2009_v16 = vadd.f32 %v2008_v14, %v1870_v5  ;;  %2042 = vadd.xlane.f32.xlu0 %v2041_v44 }
 0xbe7   :  { %v2044_v52 = vadd.f32 %v2009_v16, %v2007_v51  ;;  %v2012_v54 = vpop.f32.mrb[42].mxu1 }
 0xbe8   :  { %v2013_v12 = vadd.f32 %v2012_v54, %v1875_v43  ;;  %v2014_v11 = vpop.f32.mrb[43].mxu1 }
 0xbe9   :  { %v2015_v13 = vadd.f32 %v2014_v11, %v1875_v43  ;;  %2045 = vadd.xlane.f32.xlu0 %v2044_v52 }
 0xbeb   :  { %v2047_v17 = vadd.f32 %v2015_v13, %v2013_v12  ;;  %v2018_v18 = vpop.f32.mrb[44].mxu1 }
 0xbec   :  { %v2019_v42 = vadd.f32 %v2018_v18, %v1880_v30  ;;  %v2020_v59 = vpop.f32.mrb[45].mxu1 }
 0xbed   :  { %v2021_v1 = vadd.f32 %v2020_v59, %v1880_v30  ;;  %2048 = vadd.xlane.f32.xlu1 %v2047_v17 }
 0xbef   :  { %v2050_v55 = vadd.f32 %v2021_v1, %v2019_v42  ;;  %v2024_v25 = vpop.f32.mrb[46].mxu1 }
 0xbf0   :  { %v2025_v58 = vadd.f32 %v2024_v25, %v1885_v21  ;;  %v2026_v20 = vpop.f32.mrb[47].mxu1 }
 0xbf1   :  { %v2027_v4 = vadd.f32 %v2026_v20, %v1885_v21  ;;  %2051 = vadd.xlane.f32.xlu0 %v2050_v55 }
 0xbf3   :  { %v2053_v45 = vadd.f32 %v2027_v4, %v2025_v58  ;;  %v2030_v57 = vpop.f32.mrb[48].mxu1 }
 0xbf4   :  { %v2031_v8 = vadd.f32 %v2030_v57, %v1890_v48  ;;  %v2032_v9 = vpop.f32.mrb[49].mxu1  ;;  %v2187_v57 = vld [vmem:[%s5642_s4] sm:$0xff] }
 0xbf5   :  { %v2033_v10 = vadd.f32 %v2032_v9, %v1890_v48  ;;  %2054 = vadd.xlane.f32.xlu1 %v2053_v45  ;;  %v2190_v9 = vld [vmem:[%s5642_s4 + $0x18] sm:$0xff] }
 0xbf7   :  { %v2056_v35 = vadd.f32 %v2033_v10, %v2031_v8 }
 0xbf9   :  { %2057 = vadd.xlane.f32.xlu0 %v2056_v35  ;;  %v2192_v35 = vld [vmem:[%s5642_s4 + $0x28] sm:$0xff] }
 0xc6a   :  { %v2037_v32 = vpop.xlane.xlu0 %2036 }
 0xc6b   :  { %v2059_v27 = vmul.f32 0.00390625, %v2037_v32  ;;  %v2191_v32 = vld [vmem:[%s5642_s4 + $0x20] sm:$0xff] }
 0xc6d   :  { %v4959_v31 = vsub.f32 %v1989_v26, %v2059_v27  ;;  %v4961_v63 = vsub.f32 %v1991_v33, %v2059_v27  ;;  %v2194_v27 = vld [vmem:[%s5642_s4 + $0x38] sm:$0xff] }
 0xc6e   :  { %v2040_v28 = vpop.xlane.xlu1 %2039 }
 0xc6f   :  { %v2083_v38 = vmul.f32 %v4959_v31, %v4959_v31  ;;  %v2084_v3 = vmul.f32 %v4961_v63, %v4961_v63  ;;  %v2060_v6 = vmul.f32 0.00390625, %v2040_v28  ;;  %v2193_v28 = vld [vmem:[%s5642_s4 + $0x30] sm:$0xff] }
 0xc71   :  { %v4967_v22 = vsub.f32 %v1995_v41, %v2060_v6  ;;  %v4969_v23 = vsub.f32 %v1997_v62, %v2060_v6  ;;  %v2099_v24 = vadd.f32 %v2084_v3, %v2083_v38 }
 0xc72   :  { %v2043_v49 = vpop.xlane.xlu0 %2042 }
 0xc73   :  { %v2085_v7 = vmul.f32 %v4967_v22, %v4967_v22  ;;  %v2086_v46 = vmul.f32 %v4969_v23, %v4969_v23  ;;  %v2061_v15 = vmul.f32 0.00390625, %v2043_v49  ;;  %2100 = vadd.xlane.f32.xlu1 %v2099_v24 }
 0xc75   :  { %v4975_v26 = vsub.f32 %v2001_v56, %v2061_v15  ;;  %v4977_v29 = vsub.f32 %v2003_v19, %v2061_v15  ;;  %v2102_v33 = vadd.f32 %v2086_v46, %v2085_v7 }
 0xc76   :  { %v2046_v36 = vpop.xlane.xlu0 %2045 }
 0xc77   :  { %v2087_v37 = vmul.f32 %v4975_v26, %v4975_v26  ;;  %v2088_v0 = vmul.f32 %v4977_v29, %v4977_v29  ;;  %v2062_v41 = vmul.f32 0.00390625, %v2046_v36  ;;  %2103 = vadd.xlane.f32.xlu0 %v2102_v33 }
 0xc79   :  { %v4983_v60 = vsub.f32 %v2007_v51, %v2062_v41  ;;  %v4985_v34 = vsub.f32 %v2009_v16, %v2062_v41  ;;  %v2105_v62 = vadd.f32 %v2088_v0, %v2087_v37 }
 0xc7a   :  { %v2049_v53 = vpop.xlane.xlu1 %2048 }
 0xc7b   :  { %v2089_v61 = vmul.f32 %v4983_v60, %v4983_v60  ;;  %v2090_v56 = vmul.f32 %v4985_v34, %v4985_v34  ;;  %v2063_v39 = vmul.f32 0.00390625, %v2049_v53  ;;  %2106 = vadd.xlane.f32.xlu1 %v2105_v62 }
 0xc7d   :  { %v4991_v19 = vsub.f32 %v2013_v12, %v2063_v39  ;;  %v4993_v5 = vsub.f32 %v2015_v13, %v2063_v39  ;;  %v2108_v44 = vadd.f32 %v2090_v56, %v2089_v61 }
 0xc7e   :  { %v2052_v50 = vpop.xlane.xlu0 %2051 }
 0xc7f   :  { %v2091_v51 = vmul.f32 %v4991_v19, %v4991_v19  ;;  %v2092_v14 = vmul.f32 %v4993_v5, %v4993_v5  ;;  %v2064_v16 = vmul.f32 0.00390625, %v2052_v50  ;;  %2109 = vadd.xlane.f32.xlu0 %v2108_v44 }
 0xc81   :  { %v4999_v43 = vsub.f32 %v2019_v42, %v2064_v16  ;;  %v5001_v52 = vsub.f32 %v2021_v1, %v2064_v16  ;;  %v2111_v54 = vadd.f32 %v2092_v14, %v2091_v51 }
 0xc82   :  { %v2055_v11 = vpop.xlane.xlu1 %2054 }
 0xc83   :  { %v2093_v12 = vmul.f32 %v4999_v43, %v4999_v43  ;;  %v2094_v13 = vmul.f32 %v5001_v52, %v5001_v52  ;;  %v2065_v30 = vmul.f32 0.00390625, %v2055_v11  ;;  %2112 = vadd.xlane.f32.xlu1 %v2111_v54 }
 0xc85   :  { %v5007_v17 = vsub.f32 %v2025_v58, %v2065_v30  ;;  %v5009_v18 = vsub.f32 %v2027_v4, %v2065_v30  ;;  %v2114_v59 = vadd.f32 %v2094_v13, %v2093_v12 }
 0xc86   :  { %v2058_v21 = vpop.xlane.xlu0 %2057 }
 0xc87   :  { %v2095_v42 = vmul.f32 %v5007_v17, %v5007_v17  ;;  %v2096_v1 = vmul.f32 %v5009_v18, %v5009_v18  ;;  %v2066_v55 = vmul.f32 0.00390625, %v2058_v21  ;;  %2115 = vadd.xlane.f32.xlu0 %v2114_v59 }
 0xc89   :  { %v5015_v25 = vsub.f32 %v2031_v8, %v2066_v55  ;;  %v5017_v20 = vsub.f32 %v2033_v10, %v2066_v55  ;;  %v2117_v48 = vadd.f32 %v2096_v1, %v2095_v42  ;;  %v2189_v8 = vld [vmem:[%s5642_s4 + $0x10] sm:$0xff]  ;;  %v2188_v10 = vld [vmem:[%s5642_s4 + $0x8] sm:$0xff] }
 0xc8b   :  { %v2097_v58 = vmul.f32 %v5015_v25, %v5015_v25  ;;  %v2098_v4 = vmul.f32 %v5017_v20, %v5017_v20  ;;  %2118 = vadd.xlane.f32.xlu1 %v2117_v48 }
 0xc8d   :  { %v2120_v45 = vadd.f32 %v2098_v4, %v2097_v58 }
 0xc8f   :  { %2121 = vadd.xlane.f32.xlu0 %v2120_v45 }
 0xc9c   :  { %2197 = vperm.xlu1 %3892, %v2187_v57  }
 0xca0   :  { %2207 = vperm.xlu1 %3892, %v2189_v8  }
 0xca4   :  { %2212 = vperm.xlu1 %3892, %v2190_v9  }
 0xca5   :  { %2202 = vperm.xlu0 %3891, %v2188_v10  }
 0xca8   :  { %2222 = vperm.xlu1 %3892, %v2192_v35  }
 0xca9   :  { %2217 = vperm.xlu0 %3891, %v2191_v32  }
 0xcac   :  { %2232 = vperm.xlu1 %3892, %v2194_v27  }
 0xcad   :  { %2227 = vperm.xlu0 %3891, %v2193_v28  }
 0xd00   :  { %v2101_v38 = vpop.xlane.xlu1 %2100 }
 0xd01   :  { %v2123_v3 = vmul.f32 0.00390625, %v2101_v38 }
 0xd03   :  { %v2131_v6 = vadd.f32 1e-05, %v2123_v3 }
 0xd04   :  { %v2104_v24 = vpop.xlane.xlu0 %2103 }
 0xd05   :  { %3975 = vrsqrt.f32 %v2131_v6  ;;  %v2124_v49 = vmul.f32 0.00390625, %v2104_v24 }
 0xd07   :  { %v2132_v7 = vadd.f32 1e-05, %v2124_v49 }
 0xd08   :  { %v2107_v46 = vpop.xlane.xlu1 %2106 }
 0xd09   :  { %3977 = vrsqrt.f32 %v2132_v7  ;;  %v2125_v15 = vmul.f32 0.00390625, %v2107_v46 }
 0xd0b   :  { %v2133_v33 = vadd.f32 1e-05, %v2125_v15 }
 0xd0c   :  { %v2110_v36 = vpop.xlane.xlu0 %2109 }
 0xd0d   :  { %3979 = vrsqrt.f32 %v2133_v33  ;;  %v2126_v37 = vmul.f32 0.00390625, %v2110_v36 }
 0xd0f   :  { %v3976_v0 = vpop.eup %3975  ;;  %v2134_v41 = vadd.f32 1e-05, %v2126_v37 }
 0xd10   :  { %v2113_v62 = vpop.xlane.xlu1 %2112  ;;  %v2148_v61 = vmul.f32 %v3976_v0, %v4961_v63  ;;  %v2147_v56 = vmul.f32 %v3976_v0, %v4959_v31 }
 0xd11   :  { %3981 = vrsqrt.f32 %v2134_v41  ;;  %v2127_v53 = vmul.f32 0.00390625, %v2113_v62 }
 0xd12   :  { %v2164_v54 = vmax.f32 %v2148_v61, 0.0  ;;  %v2163_v12 = vmax.f32 %v2147_v56, 0.0  ;;  %v2183_v61 = vld [vmem:[%s5641_s3 + $0x20] sm:$0xff]  ;;  %v2184_v56 = vld [vmem:[%s5641_s3 + $0x28] sm:$0xff] }
 0xd13   :  { %v3978_v39 = vpop.eup %3977  ;;  %v2135_v44 = vadd.f32 1e-05, %v2127_v53 }
 0xd14   :  { %v2116_v50 = vpop.xlane.xlu0 %2115  ;;  %v2150_v51 = vmul.f32 %v3978_v39, %v4969_v23  ;;  %v2149_v14 = vmul.f32 %v3978_v39, %v4967_v22  ;;  %v2185_v39 = vld [vmem:[%s5641_s3 + $0x30] sm:$0xff] }
 0xd15   :  { %3983 = vrsqrt.f32 %v2135_v44  ;;  %v2128_v16 = vmul.f32 0.00390625, %v2116_v50  ;;  %v2186_v44 = vld [vmem:[%s5641_s3 + $0x38] sm:$0xff] }
 0xd16   :  { %v2166_v11 = vmax.f32 %v2150_v51, 0.0  ;;  %v2165_v13 = vmax.f32 %v2149_v14, 0.0 }
 0xd17   :  { %v3980_v30 = vpop.eup %3979  ;;  %v2136_v59 = vadd.f32 1e-05, %v2128_v16 }
 0xd18   :  { %v2119_v21 = vpop.xlane.xlu1 %2118  ;;  %v3806_v42 = vpack.c.bf16 %v2166_v11, %v2164_v54  ;;  %v3808_v63 = vpack.c.bf16 %v2165_v13, %v2163_v12  ;;  %v2152_v1 = vmul.f32 %v3980_v30, %v4977_v29  ;;  %v2151_v23 = vmul.f32 %v3980_v30, %v4975_v26 }
 0xd19   :  { %3985 = vrsqrt.f32 %v2136_v59  ;;  %v2129_v31 = vmul.f32 0.00390625, %v2119_v21 }
 0xd1a   :  { %3807 = vmatprep.subr.bf16.mxu0 %v3806_v42  ;;  %v2168_v57 = vmax.f32 %v2152_v1, 0.0  ;;  %v2167_v9 = vmax.f32 %v2151_v23, 0.0 }
 0xd1b   :  { %v3982_v55 = vpop.eup %3981  ;;  %v2137_v22 = vadd.f32 1e-05, %v2129_v31  ;;  %3809 = vmatpush1.bf16.msra.mxu0 %v3808_v63 }
 0xd1c   :  { %v2122_v48 = vpop.xlane.xlu0 %2121  ;;  %v2154_v58 = vmul.f32 %v3982_v55, %v4985_v34  ;;  %v2153_v4 = vmul.f32 %v3982_v55, %v4983_v60  ;;  %v2198_v50 = vpop.permute.xlu1 %2197 }
 0xd1d   :  { %3987 = vrsqrt.f32 %v2137_v22  ;;  %v2130_v45 = vmul.f32 0.00390625, %v2122_v48 }
 0xd1e   :  { %v2170_v8 = vmax.f32 %v2154_v58, 0.0  ;;  %v2169_v10 = vmax.f32 %v2153_v4, 0.0 }
 0xd1f   :  { %v3984_v35 = vpop.eup %3983  ;;  %v2138_v32 = vadd.f32 1e-05, %v2130_v45 }
 0xd20   :  { %v3810_v27 = vpack.c.bf16 %v2170_v8, %v2168_v57  ;;  %v3812_v29 = vpack.c.bf16 %v2169_v10, %v2167_v9  ;;  %v2156_v26 = vmul.f32 %v3984_v35, %v4993_v5  ;;  %v2155_v28 = vmul.f32 %v3984_v35, %v4991_v19  ;;  %v2208_v21 = vpop.permute.xlu1 %2207 }
 0xd21   :  { %3989 = vrsqrt.f32 %v2138_v32 }
 0xd22   :  { %3811 = vmatprep.subr.bf16.mxu0 %v3810_v27  ;;  %v2172_v3 = vmax.f32 %v2156_v26, 0.0  ;;  %v2171_v24 = vmax.f32 %v2155_v28, 0.0 }
 0xd23   :  { %v3986_v38 = vpop.eup %3985  ;;  %3813 = vmatpush1.bf16.msra.mxu0 %v3812_v29 }
 0xd24   :  { %v2158_v60 = vmul.f32 %v3986_v38, %v5001_v52  ;;  %v2157_v34 = vmul.f32 %v3986_v38, %v4999_v43  ;;  %v2203_v11 = vpop.permute.xlu0 %2202  ;;  %v2213_v22 = vpop.permute.xlu1 %2212 }
 0xd26   :  { %v2174_v6 = vmax.f32 %v2158_v60, 0.0  ;;  %v2173_v49 = vmax.f32 %v2157_v34, 0.0 }
 0xd27   :  { %v3988_v7 = vpop.eup %3987 }
 0xd28   :  { %v3814_v46 = vpack.c.bf16 %v2174_v6, %v2172_v3  ;;  %v3816_v15 = vpack.c.bf16 %v2173_v49, %v2171_v24  ;;  %v2160_v33 = vmul.f32 %v3988_v7, %v5009_v18  ;;  %v2159_v5 = vmul.f32 %v3988_v7, %v5007_v17  ;;  %v2179_v18 = vld [vmem:[%s5641_s3] sm:$0xff]  ;;  %v2180_v17 = vld [vmem:[%s5641_s3 + $0x8] sm:$0xff]  ;;  %v2218_v8 = vpop.permute.xlu0 %2217  ;;  %v2223_v29 = vpop.permute.xlu1 %2222 }
 0xd2a   :  { %3815 = vmatprep.subr.bf16.mxu0 %v3814_v46  ;;  %v2176_v37 = vmax.f32 %v2160_v33, 0.0  ;;  %v2175_v0 = vmax.f32 %v2159_v5, 0.0 }
 0xd2b   :  { %v3990_v36 = vpop.eup %3989  ;;  %3817 = vmatpush1.bf16.msra.mxu0 %v3816_v15 }
 0xd2c   :  { %v2162_v19 = vmul.f32 %v3990_v36, %v5017_v20  ;;  %v2161_v52 = vmul.f32 %v3990_v36, %v5015_v25  ;;  %v2181_v25 = vld [vmem:[%s5641_s3 + $0x10] sm:$0xff]  ;;  %v2182_v20 = vld [vmem:[%s5641_s3 + $0x18] sm:$0xff]  ;;  %v2228_v3 = vpop.permute.xlu0 %2227  ;;  %v2233_v15 = vpop.permute.xlu1 %2232  ;;  %s4081_s3 = smov [#allocation2]  }
 0xd2e   :  { %v2178_v43 = vmax.f32 %v2162_v19, 0.0  ;;  %v2177_v41 = vmax.f32 %v2161_v52, 0.0 }
 0xd30   :  { %v3818_v62 = vpack.c.bf16 %v2178_v43, %v2176_v37  ;;  %v3820_v53 = vpack.c.bf16 %v2177_v41, %v2175_v0 }
 0xd32   :  { %3819 = vmatprep.subr.bf16.mxu0 %v3818_v62 }
 0xd33   :  { %3821 = vmatpush1.bf16.msra.mxu0 %v3820_v53 }
 0xd36   :  { %3692 = vmatmul.mubr.msk.f32.vlgmr.msra.gmra.mrb[48].mxu0 %vm448_vm2, %v2179_v18 }
 0xd37   :  { %2329 = vmatprep.mubr.f32.mxu0 %v4079_v2 }
 0xd3a   :  { %3693 = vmatmul.mubr.msk.f32.gmra.mrb[50].mxu0 %vm448_vm2, %v2180_v17 }
 0xd3b   :  { %2335 = vmatprep.mubr.f32.mxu0 %v4079_v2 }
 0xd3e   :  { %3694 = vmatmul.mubr.msk.f32.gmra.mrb[52].mxu0 %vm448_vm2, %v2181_v25 }
 0xd3f   :  { %2341 = vmatprep.mubr.f32.mxu0 %v4079_v2 }
 0xd42   :  { %3695 = vmatmul.mubr.msk.f32.gmra.mrb[54].mxu0 %vm448_vm2, %v2182_v20 }
 0xd43   :  { %2347 = vmatprep.mubr.f32.mxu0 %v4079_v2 }
 0xd46   :  { %3696 = vmatmul.mubr.msk.f32.gmra.mrb[56].mxu0 %vm448_vm2, %v2183_v61 }
 0xd47   :  { %2353 = vmatprep.mubr.f32.mxu0 %v4079_v2 }
 0xd4a   :  { %3697 = vmatmul.mubr.msk.f32.gmra.mrb[58].mxu0 %vm448_vm2, %v2184_v56 }
 0xd4b   :  { %2359 = vmatprep.mubr.f32.mxu0 %v4079_v2 }
 0xd4e   :  { %3698 = vmatmul.mubr.msk.f32.gmra.mrb[60].mxu0 %vm448_vm2, %v2185_v39 }
 0xd4f   :  { %2365 = vmatprep.mubr.f32.mxu0 %v4079_v2 }
 0xd52   :  { %3699 = vmatmul.mubr.msk.f32.gmra.mrb[62].mxu0 %vm448_vm2, %v2186_v44 }
 0xd53   :  { %2997 = vmatprep.mubr.f32.mxu0 %v4079_v2 }
 0xe09   :  { %v2325_v51 = vpop.f32.mrb[48].mxu0 }
 0xe0a   :  { %v2326_v14 = vadd.f32 %v2325_v51, %v2198_v50  ;;  %v2327_v16 = vpop.f32.mrb[49].mxu0 }
 0xe0b   :  { %v2328_v54 = vadd.f32 %v2327_v16, %v2198_v50 }
 0xe0d   :  { %v2372_v12 = vadd.f32 %v2328_v54, %v2326_v14  ;;  %v2331_v13 = vpop.f32.mrb[50].mxu0 }
 0xe0e   :  { %v2332_v30 = vadd.f32 %v2331_v13, %v2203_v11  ;;  %v2333_v59 = vpop.f32.mrb[51].mxu0 }
 0xe0f   :  { %v2334_v42 = vadd.f32 %v2333_v59, %v2203_v11  ;;  %2373 = vadd.xlane.f32.xlu0 %v2372_v12 }
 0xe11   :  { %v2375_v63 = vadd.f32 %v2334_v42, %v2332_v30  ;;  %v2337_v31 = vpop.f32.mrb[52].mxu0 }
 0xe12   :  { %v2338_v1 = vadd.f32 %v2337_v31, %v2208_v21  ;;  %v2339_v23 = vpop.f32.mrb[53].mxu0 }
 0xe13   :  { %v2340_v55 = vadd.f32 %v2339_v23, %v2208_v21  ;;  %2376 = vadd.xlane.f32.xlu1 %v2375_v63 }
 0xe15   :  { %v2378_v48 = vadd.f32 %v2340_v55, %v2338_v1  ;;  %v2343_v58 = vpop.f32.mrb[54].mxu0 }
 0xe16   :  { %v2344_v4 = vadd.f32 %v2343_v58, %v2213_v22  ;;  %v2345_v45 = vpop.f32.mrb[55].mxu0 }
 0xe17   :  { %v2346_v57 = vadd.f32 %v2345_v45, %v2213_v22  ;;  %2379 = vadd.xlane.f32.xlu0 %v2378_v48 }
 0xe19   :  { %v2381_v9 = vadd.f32 %v2346_v57, %v2344_v4  ;;  %v2349_v10 = vpop.f32.mrb[56].mxu0 }
 0xe1a   :  { %v2350_v35 = vadd.f32 %v2349_v10, %v2218_v8  ;;  %v2351_v32 = vpop.f32.mrb[57].mxu0 }
 0xe1b   :  { %v2352_v27 = vadd.f32 %v2351_v32, %v2218_v8  ;;  %2382 = vadd.xlane.f32.xlu0 %v2381_v9 }
 0xe1d   :  { %v2384_v26 = vadd.f32 %v2352_v27, %v2350_v35  ;;  %v2355_v28 = vpop.f32.mrb[58].mxu0 }
 0xe1e   :  { %v2356_v38 = vadd.f32 %v2355_v28, %v2223_v29  ;;  %v2357_v60 = vpop.f32.mrb[59].mxu0 }
 0xe1f   :  { %v2358_v34 = vadd.f32 %v2357_v60, %v2223_v29  ;;  %2385 = vadd.xlane.f32.xlu1 %v2384_v26 }
 0xe21   :  { %v2387_v6 = vadd.f32 %v2358_v34, %v2356_v38  ;;  %v2361_v24 = vpop.f32.mrb[60].mxu0 }
 0xe22   :  { %v2362_v49 = vadd.f32 %v2361_v24, %v2228_v3  ;;  %v2363_v7 = vpop.f32.mrb[61].mxu0 }
 0xe23   :  { %v2364_v46 = vadd.f32 %v2363_v7, %v2228_v3  ;;  %2388 = vadd.xlane.f32.xlu0 %v2387_v6 }
 0xe25   :  { %v2390_v33 = vadd.f32 %v2364_v46, %v2362_v49  ;;  %v2367_v5 = vpop.f32.mrb[62].mxu0 }
 0xe26   :  { %v2368_v36 = vadd.f32 %v2367_v5, %v2233_v15  ;;  %v2369_v19 = vpop.f32.mrb[63].mxu0  ;;  %v2524_v5 = vld [vmem:[%s5644_s6] sm:$0xff] }
 0xe27   :  { %v2370_v52 = vadd.f32 %v2369_v19, %v2233_v15  ;;  %2391 = vadd.xlane.f32.xlu1 %v2390_v33  ;;  %v2527_v19 = vld [vmem:[%s5644_s6 + $0x18] sm:$0xff] }
 0xe29   :  { %v2393_v37 = vadd.f32 %v2370_v52, %v2368_v36 }
 0xe2b   :  { %2394 = vadd.xlane.f32.xlu0 %v2393_v37  ;;  %v2529_v37 = vld [vmem:[%s5644_s6 + $0x28] sm:$0xff] }
 0xe9c   :  { %v2374_v43 = vpop.xlane.xlu0 %2373 }
 0xe9d   :  { %v2396_v0 = vmul.f32 0.00390625, %v2374_v43  ;;  %v2528_v43 = vld [vmem:[%s5644_s6 + $0x20] sm:$0xff] }
 0xe9f   :  { %v5103_v41 = vsub.f32 %v2326_v14, %v2396_v0  ;;  %v5105_v62 = vsub.f32 %v2328_v54, %v2396_v0  ;;  %v2531_v0 = vld [vmem:[%s5644_s6 + $0x38] sm:$0xff] }
 0xea0   :  { %v2377_v53 = vpop.xlane.xlu1 %2376 }
 0xea1   :  { %v2420_v18 = vmul.f32 %v5103_v41, %v5103_v41  ;;  %v2421_v17 = vmul.f32 %v5105_v62, %v5105_v62  ;;  %v2397_v25 = vmul.f32 0.00390625, %v2377_v53  ;;  %v2530_v53 = vld [vmem:[%s5644_s6 + $0x30] sm:$0xff] }
 0xea3   :  { %v5111_v20 = vsub.f32 %v2332_v30, %v2397_v25  ;;  %v5113_v61 = vsub.f32 %v2334_v42, %v2397_v25  ;;  %v2436_v56 = vadd.f32 %v2421_v17, %v2420_v18 }
 0xea4   :  { %v2380_v39 = vpop.xlane.xlu0 %2379 }
 0xea5   :  { %v2422_v44 = vmul.f32 %v5111_v20, %v5111_v20  ;;  %v2423_v50 = vmul.f32 %v5113_v61, %v5113_v61  ;;  %v2398_v51 = vmul.f32 0.00390625, %v2380_v39  ;;  %2437 = vadd.xlane.f32.xlu1 %v2436_v56 }
 0xea7   :  { %v5119_v14 = vsub.f32 %v2338_v1, %v2398_v51  ;;  %v5121_v16 = vsub.f32 %v2340_v55, %v2398_v51  ;;  %v2439_v54 = vadd.f32 %v2423_v50, %v2422_v44 }
 0xea8   :  { %v2383_v11 = vpop.xlane.xlu0 %2382 }
 0xea9   :  { %v2424_v12 = vmul.f32 %v5119_v14, %v5119_v14  ;;  %v2425_v13 = vmul.f32 %v5121_v16, %v5121_v16  ;;  %v2399_v30 = vmul.f32 0.00390625, %v2383_v11  ;;  %2440 = vadd.xlane.f32.xlu0 %v2439_v54 }
 0xeab   :  { %v5127_v59 = vsub.f32 %v2344_v4, %v2399_v30  ;;  %v5129_v21 = vsub.f32 %v2346_v57, %v2399_v30  ;;  %v2442_v42 = vadd.f32 %v2425_v13, %v2424_v12 }
 0xeac   :  { %v2386_v63 = vpop.xlane.xlu1 %2385 }
 0xead   :  { %v2426_v31 = vmul.f32 %v5127_v59, %v5127_v59  ;;  %v2427_v1 = vmul.f32 %v5129_v21, %v5129_v21  ;;  %v2400_v23 = vmul.f32 0.00390625, %v2386_v63  ;;  %2443 = vadd.xlane.f32.xlu1 %v2442_v42 }
 0xeaf   :  { %v5135_v55 = vsub.f32 %v2350_v35, %v2400_v23  ;;  %v5137_v22 = vsub.f32 %v2352_v27, %v2400_v23  ;;  %v2445_v48 = vadd.f32 %v2427_v1, %v2426_v31 }
 0xeb0   :  { %v2389_v58 = vpop.xlane.xlu0 %2388 }
 0xeb1   :  { %v2428_v4 = vmul.f32 %v5135_v55, %v5135_v55  ;;  %v2429_v45 = vmul.f32 %v5137_v22, %v5137_v22  ;;  %v2401_v57 = vmul.f32 0.00390625, %v2389_v58  ;;  %2446 = vadd.xlane.f32.xlu0 %v2445_v48 }
 0xeb3   :  { %v5143_v8 = vsub.f32 %v2356_v38, %v2401_v57  ;;  %v5145_v9 = vsub.f32 %v2358_v34, %v2401_v57  ;;  %v2448_v10 = vadd.f32 %v2429_v45, %v2428_v4 }
 0xeb4   :  { %v2392_v32 = vpop.xlane.xlu1 %2391 }
 0xeb5   :  { %v2430_v35 = vmul.f32 %v5143_v8, %v5143_v8  ;;  %v2431_v27 = vmul.f32 %v5145_v9, %v5145_v9  ;;  %v2402_v29 = vmul.f32 0.00390625, %v2392_v32  ;;  %2449 = vadd.xlane.f32.xlu1 %v2448_v10 }
 0xeb7   :  { %v5151_v26 = vsub.f32 %v2362_v49, %v2402_v29  ;;  %v5153_v28 = vsub.f32 %v2364_v46, %v2402_v29  ;;  %v2451_v60 = vadd.f32 %v2431_v27, %v2430_v35 }
 0xeb8   :  { %v2395_v3 = vpop.xlane.xlu0 %2394 }
 0xeb9   :  { %v2432_v38 = vmul.f32 %v5151_v26, %v5151_v26  ;;  %v2433_v34 = vmul.f32 %v5153_v28, %v5153_v28  ;;  %v2403_v6 = vmul.f32 0.00390625, %v2395_v3  ;;  %2452 = vadd.xlane.f32.xlu0 %v2451_v60 }
 0xebb   :  { %v5159_v24 = vsub.f32 %v2368_v36, %v2403_v6  ;;  %v5161_v7 = vsub.f32 %v2370_v52, %v2403_v6  ;;  %v2454_v15 = vadd.f32 %v2433_v34, %v2432_v38  ;;  %v2526_v36 = vld [vmem:[%s5644_s6 + $0x10] sm:$0xff]  ;;  %v2525_v52 = vld [vmem:[%s5644_s6 + $0x8] sm:$0xff] }
 0xebd   :  { %v2434_v49 = vmul.f32 %v5159_v24, %v5159_v24  ;;  %v2435_v46 = vmul.f32 %v5161_v7, %v5161_v7  ;;  %2455 = vadd.xlane.f32.xlu1 %v2454_v15 }
 0xebf   :  { %v2457_v33 = vadd.f32 %v2435_v46, %v2434_v49 }
 0xec1   :  { %2458 = vadd.xlane.f32.xlu0 %v2457_v33 }
 0xece   :  { %2534 = vperm.xlu1 %3892, %v2524_v5  }
 0xed2   :  { %2544 = vperm.xlu1 %3892, %v2526_v36  }
 0xed6   :  { %2549 = vperm.xlu1 %3892, %v2527_v19  }
 0xed7   :  { %2539 = vperm.xlu0 %3891, %v2525_v52  }
 0xeda   :  { %2559 = vperm.xlu1 %3892, %v2529_v37  }
 0xedb   :  { %2554 = vperm.xlu0 %3891, %v2528_v43  }
 0xede   :  { %2569 = vperm.xlu1 %3892, %v2531_v0  }
 0xedf   :  { %2564 = vperm.xlu0 %3891, %v2530_v53  }
 0xf32   :  { %v2438_v18 = vpop.xlane.xlu1 %2437 }
 0xf33   :  { %v2460_v17 = vmul.f32 0.00390625, %v2438_v18 }
 0xf35   :  { %v2468_v25 = vadd.f32 1e-05, %v2460_v17 }
 0xf36   :  { %v2441_v56 = vpop.xlane.xlu0 %2440 }
 0xf37   :  { %3991 = vrsqrt.f32 %v2468_v25  ;;  %v2461_v39 = vmul.f32 0.00390625, %v2441_v56 }
 0xf39   :  { %v2469_v44 = vadd.f32 1e-05, %v2461_v39 }
 0xf3a   :  { %v2444_v50 = vpop.xlane.xlu1 %2443 }
 0xf3b   :  { %3993 = vrsqrt.f32 %v2469_v44  ;;  %v2462_v51 = vmul.f32 0.00390625, %v2444_v50 }
 0xf3d   :  { %v2470_v54 = vadd.f32 1e-05, %v2462_v51 }
 0xf3e   :  { %v2447_v11 = vpop.xlane.xlu0 %2446 }
 0xf3f   :  { %3995 = vrsqrt.f32 %v2470_v54  ;;  %v2463_v12 = vmul.f32 0.00390625, %v2447_v11 }
 0xf41   :  { %v3992_v13 = vpop.eup %3991  ;;  %v2471_v30 = vadd.f32 1e-05, %v2463_v12 }
 0xf42   :  { %v2450_v42 = vpop.xlane.xlu1 %2449  ;;  %v2485_v31 = vmul.f32 %v3992_v13, %v5105_v62  ;;  %v2484_v1 = vmul.f32 %v3992_v13, %v5103_v41 }
 0xf43   :  { %3997 = vrsqrt.f32 %v2471_v30  ;;  %v2464_v63 = vmul.f32 0.00390625, %v2450_v42 }
 0xf44   :  { %v2501_v10 = vmax.f32 %v2485_v31, 0.0  ;;  %v2500_v35 = vmax.f32 %v2484_v1, 0.0  ;;  %v2520_v31 = vld [vmem:[%s5643_s5 + $0x20] sm:$0xff]  ;;  %v2521_v1 = vld [vmem:[%s5643_s5 + $0x28] sm:$0xff] }
 0xf45   :  { %v3994_v23 = vpop.eup %3993  ;;  %v2472_v48 = vadd.f32 1e-05, %v2464_v63 }
 0xf46   :  { %v2453_v58 = vpop.xlane.xlu0 %2452  ;;  %v2487_v4 = vmul.f32 %v3994_v23, %v5113_v61  ;;  %v2486_v45 = vmul.f32 %v3994_v23, %v5111_v20  ;;  %v2522_v23 = vld [vmem:[%s5643_s5 + $0x30] sm:$0xff] }
 0xf47   :  { %3999 = vrsqrt.f32 %v2472_v48  ;;  %v2465_v57 = vmul.f32 0.00390625, %v2453_v58  ;;  %v2523_v48 = vld [vmem:[%s5643_s5 + $0x38] sm:$0xff] }
 0xf48   :  { %v2503_v32 = vmax.f32 %v2487_v4, 0.0  ;;  %v2502_v27 = vmax.f32 %v2486_v45, 0.0 }
 0xf49   :  { %v3996_v29 = vpop.eup %3995  ;;  %v2473_v60 = vadd.f32 1e-05, %v2465_v57 }
 0xf4a   :  { %v2456_v3 = vpop.xlane.xlu1 %2455  ;;  %v3822_v38 = vpack.c.bf16 %v2503_v32, %v2501_v10  ;;  %v3824_v62 = vpack.c.bf16 %v2502_v27, %v2500_v35  ;;  %v2489_v34 = vmul.f32 %v3996_v29, %v5121_v16  ;;  %v2488_v61 = vmul.f32 %v3996_v29, %v5119_v14 }
 0xf4b   :  { %4001 = vrsqrt.f32 %v2473_v60  ;;  %v2466_v41 = vmul.f32 0.00390625, %v2456_v3 }
 0xf4c   :  { %3823 = vmatprep.subr.bf16.mxu1 %v3822_v38  ;;  %v2505_v5 = vmax.f32 %v2489_v34, 0.0  ;;  %v2504_v19 = vmax.f32 %v2488_v61, 0.0 }
 0xf4d   :  { %v3998_v6 = vpop.eup %3997  ;;  %v2474_v20 = vadd.f32 1e-05, %v2466_v41  ;;  %3825 = vmatpush1.bf16.msra.mxu1 %v3824_v62 }
 0xf4e   :  { %v2459_v15 = vpop.xlane.xlu0 %2458  ;;  %v2491_v49 = vmul.f32 %v3998_v6, %v5129_v21  ;;  %v2490_v46 = vmul.f32 %v3998_v6, %v5127_v59  ;;  %v2535_v58 = vpop.permute.xlu1 %2534 }
 0xf4f   :  { %4003 = vrsqrt.f32 %v2474_v20  ;;  %v2467_v33 = vmul.f32 0.00390625, %v2459_v15 }
 0xf50   :  { %v2507_v36 = vmax.f32 %v2491_v49, 0.0  ;;  %v2506_v52 = vmax.f32 %v2490_v46, 0.0 }
 0xf51   :  { %v4000_v37 = vpop.eup %3999  ;;  %v2475_v43 = vadd.f32 1e-05, %v2467_v33 }
 0xf52   :  { %v3826_v0 = vpack.c.bf16 %v2507_v36, %v2505_v5  ;;  %v3828_v16 = vpack.c.bf16 %v2506_v52, %v2504_v19  ;;  %v2493_v14 = vmul.f32 %v4000_v37, %v5137_v22  ;;  %v2492_v53 = vmul.f32 %v4000_v37, %v5135_v55  ;;  %v2545_v3 = vpop.permute.xlu1 %2544 }
 0xf53   :  { %4005 = vrsqrt.f32 %v2475_v43 }
 0xf54   :  { %3827 = vmatprep.subr.bf16.mxu1 %v3826_v0  ;;  %v2509_v17 = vmax.f32 %v2493_v14, 0.0  ;;  %v2508_v56 = vmax.f32 %v2492_v53, 0.0 }
 0xf55   :  { %v4002_v18 = vpop.eup %4001  ;;  %3829 = vmatpush1.bf16.msra.mxu1 %v3828_v16 }
 0xf56   :  { %v2495_v59 = vmul.f32 %v4002_v18, %v5145_v9  ;;  %v2494_v21 = vmul.f32 %v4002_v18, %v5143_v8  ;;  %v2540_v32 = vpop.permute.xlu0 %2539  ;;  %v2550_v20 = vpop.permute.xlu1 %2549 }
 0xf58   :  { %v2511_v25 = vmax.f32 %v2495_v59, 0.0  ;;  %v2510_v39 = vmax.f32 %v2494_v21, 0.0 }
 0xf59   :  { %v4004_v44 = vpop.eup %4003 }
 0xf5a   :  { %v3830_v50 = vpack.c.bf16 %v2511_v25, %v2509_v17  ;;  %v3832_v51 = vpack.c.bf16 %v2510_v39, %v2508_v56  ;;  %v2497_v54 = vmul.f32 %v4004_v44, %v5153_v28  ;;  %v2496_v22 = vmul.f32 %v4004_v44, %v5151_v26  ;;  %v2516_v28 = vld [vmem:[%s5643_s5] sm:$0xff]  ;;  %v2517_v26 = vld [vmem:[%s5643_s5 + $0x8] sm:$0xff]  ;;  %v2555_v36 = vpop.permute.xlu0 %2554  ;;  %v2560_v16 = vpop.permute.xlu1 %2559 }
 0xf5c   :  { %3831 = vmatprep.subr.bf16.mxu1 %v3830_v50  ;;  %v2513_v12 = vmax.f32 %v2497_v54, 0.0  ;;  %v2512_v13 = vmax.f32 %v2496_v22, 0.0 }
 0xf5d   :  { %v4006_v11 = vpop.eup %4005  ;;  %3833 = vmatpush1.bf16.msra.mxu1 %v3832_v51 }
 0xf5e   :  { %v2499_v55 = vmul.f32 %v4006_v11, %v5161_v7  ;;  %v2498_v9 = vmul.f32 %v4006_v11, %v5159_v24  ;;  %v2518_v24 = vld [vmem:[%s5643_s5 + $0x10] sm:$0xff]  ;;  %v2519_v7 = vld [vmem:[%s5643_s5 + $0x18] sm:$0xff]  ;;  %v2565_v17 = vpop.permute.xlu0 %2564  ;;  %v2570_v51 = vpop.permute.xlu1 %2569 }
 0xf60   :  { %v2515_v8 = vmax.f32 %v2499_v55, 0.0  ;;  %v2514_v30 = vmax.f32 %v2498_v9, 0.0 }
 0xf62   :  { %v3834_v42 = vpack.c.bf16 %v2515_v8, %v2513_v12  ;;  %v3836_v63 = vpack.c.bf16 %v2514_v30, %v2512_v13 }
 0xf64   :  { %3835 = vmatprep.subr.bf16.mxu1 %v3834_v42 }
 0xf65   :  { %3837 = vmatpush1.bf16.msra.mxu1 %v3836_v63 }
 0xf68   :  { %3700 = vmatmul.mubr.msk.f32.vlgmr.msra.gmra.mrb[50].mxu1 %vm448_vm2, %v2516_v28 }
 0xf69   :  { %2666 = vmatprep.mubr.f32.mxu1 %v4079_v2 }
 0xf6c   :  { %3701 = vmatmul.mubr.msk.f32.gmra.mrb[52].mxu1 %vm448_vm2, %v2517_v26 }
 0xf6d   :  { %2672 = vmatprep.mubr.f32.mxu1 %v4079_v2 }
 0xf70   :  { %3702 = vmatmul.mubr.msk.f32.gmra.mrb[54].mxu1 %vm448_vm2, %v2518_v24 }
 0xf71   :  { %2678 = vmatprep.mubr.f32.mxu1 %v4079_v2 }
 0xf74   :  { %3703 = vmatmul.mubr.msk.f32.gmra.mrb[56].mxu1 %vm448_vm2, %v2519_v7 }
 0xf75   :  { %2684 = vmatprep.mubr.f32.mxu1 %v4079_v2 }
 0xf78   :  { %3704 = vmatmul.mubr.msk.f32.gmra.mrb[58].mxu1 %vm448_vm2, %v2520_v31 }
 0xf79   :  { %2690 = vmatprep.mubr.f32.mxu1 %v4079_v2 }
 0xf7c   :  { %3705 = vmatmul.mubr.msk.f32.gmra.mrb[60].mxu1 %vm448_vm2, %v2521_v1 }
 0xf7d   :  { %2696 = vmatprep.mubr.f32.mxu1 %v4079_v2 }
 0xf80   :  { %3706 = vmatmul.mubr.msk.f32.gmra.mrb[62].mxu1 %vm448_vm2, %v2522_v23 }
 0xf81   :  { %2702 = vmatprep.mubr.f32.mxu1 %v4079_v2 }
 0xf84   :  { %3707 = vmatmul.mubr.msk.f32.gmra.mrb[64].mxu1 %vm448_vm2, %v2523_v48 }
 0xf85   :  { %3334 = vmatprep.mubr.f32.mxu1 %v4079_v2 }
0x103b   :  { %v2662_v4 = vpop.f32.mrb[50].mxu1 }
0x103c   :  { %v2663_v45 = vadd.f32 %v2662_v4, %v2535_v58  ;;  %v2664_v57 = vpop.f32.mrb[51].mxu1 }
0x103d   :  { %v2665_v10 = vadd.f32 %v2664_v57, %v2535_v58 }
0x103f   :  { %v2709_v35 = vadd.f32 %v2665_v10, %v2663_v45  ;;  %v2668_v27 = vpop.f32.mrb[52].mxu1 }
0x1040   :  { %v2669_v29 = vadd.f32 %v2668_v27, %v2540_v32  ;;  %v2670_v60 = vpop.f32.mrb[53].mxu1 }
0x1041   :  { %v2671_v38 = vadd.f32 %v2670_v60, %v2540_v32  ;;  %2710 = vadd.xlane.f32.xlu0 %v2709_v35 }
0x1043   :  { %v2712_v62 = vadd.f32 %v2671_v38, %v2669_v29  ;;  %v2674_v41 = vpop.f32.mrb[54].mxu1 }
0x1044   :  { %v2675_v34 = vadd.f32 %v2674_v41, %v2545_v3  ;;  %v2676_v61 = vpop.f32.mrb[55].mxu1 }
0x1045   :  { %v2677_v6 = vadd.f32 %v2676_v61, %v2545_v3  ;;  %2713 = vadd.xlane.f32.xlu1 %v2712_v62 }
0x1047   :  { %v2715_v15 = vadd.f32 %v2677_v6, %v2675_v34  ;;  %v2680_v49 = vpop.f32.mrb[56].mxu1 }
0x1048   :  { %v2681_v46 = vadd.f32 %v2680_v49, %v2550_v20  ;;  %v2682_v33 = vpop.f32.mrb[57].mxu1 }
0x1049   :  { %v2683_v5 = vadd.f32 %v2682_v33, %v2550_v20  ;;  %2716 = vadd.xlane.f32.xlu0 %v2715_v15 }
0x104b   :  { %v2718_v19 = vadd.f32 %v2683_v5, %v2681_v46  ;;  %v2686_v52 = vpop.f32.mrb[58].mxu1 }
0x104c   :  { %v2687_v37 = vadd.f32 %v2686_v52, %v2555_v36  ;;  %v2688_v43 = vpop.f32.mrb[59].mxu1 }
0x104d   :  { %v2689_v0 = vadd.f32 %v2688_v43, %v2555_v36  ;;  %2719 = vadd.xlane.f32.xlu0 %v2718_v19 }
0x104f   :  { %v2721_v14 = vadd.f32 %v2689_v0, %v2687_v37  ;;  %v2692_v53 = vpop.f32.mrb[60].mxu1 }
0x1050   :  { %v2693_v18 = vadd.f32 %v2692_v53, %v2560_v16  ;;  %v2694_v59 = vpop.f32.mrb[61].mxu1 }
0x1051   :  { %v2695_v21 = vadd.f32 %v2694_v59, %v2560_v16  ;;  %2722 = vadd.xlane.f32.xlu1 %v2721_v14 }
0x1053   :  { %v2724_v25 = vadd.f32 %v2695_v21, %v2693_v18  ;;  %v2698_v56 = vpop.f32.mrb[62].mxu1 }
0x1054   :  { %v2699_v39 = vadd.f32 %v2698_v56, %v2565_v17  ;;  %v2700_v44 = vpop.f32.mrb[63].mxu1 }
0x1055   :  { %v2701_v50 = vadd.f32 %v2700_v44, %v2565_v17  ;;  %2725 = vadd.xlane.f32.xlu0 %v2724_v25 }
0x1057   :  { %v2727_v54 = vadd.f32 %v2701_v50, %v2699_v39  ;;  %v2704_v22 = vpop.f32.mrb[64].mxu1 }
0x1058   :  { %v2705_v11 = vadd.f32 %v2704_v22, %v2570_v51  ;;  %v2706_v55 = vpop.f32.mrb[65].mxu1  ;;  %v2861_v22 = vld [vmem:[%s5646_s8] sm:$0xff] }
0x1059   :  { %v2707_v9 = vadd.f32 %v2706_v55, %v2570_v51  ;;  %2728 = vadd.xlane.f32.xlu1 %v2727_v54  ;;  %v2864_v55 = vld [vmem:[%s5646_s8 + $0x18] sm:$0xff] }
0x105b   :  { %v2730_v12 = vadd.f32 %v2707_v9, %v2705_v11 }
0x105d   :  { %2731 = vadd.xlane.f32.xlu0 %v2730_v12  ;;  %v2866_v12 = vld [vmem:[%s5646_s8 + $0x28] sm:$0xff] }
0x10ce   :  { %v2711_v8 = vpop.xlane.xlu0 %2710 }
0x10cf   :  { %v2733_v13 = vmul.f32 0.00390625, %v2711_v8  ;;  %v2865_v8 = vld [vmem:[%s5646_s8 + $0x20] sm:$0xff] }
0x10d1   :  { %v5247_v30 = vsub.f32 %v2663_v45, %v2733_v13  ;;  %v5249_v42 = vsub.f32 %v2665_v10, %v2733_v13  ;;  %v2868_v13 = vld [vmem:[%s5646_s8 + $0x38] sm:$0xff] }
0x10d2   :  { %v2714_v63 = vpop.xlane.xlu1 %2713 }
0x10d3   :  { %v2757_v28 = vmul.f32 %v5247_v30, %v5247_v30  ;;  %v2758_v26 = vmul.f32 %v5249_v42, %v5249_v42  ;;  %v2734_v24 = vmul.f32 0.00390625, %v2714_v63  ;;  %v2867_v63 = vld [vmem:[%s5646_s8 + $0x30] sm:$0xff] }
0x10d5   :  { %v5255_v7 = vsub.f32 %v2669_v29, %v2734_v24  ;;  %v5257_v31 = vsub.f32 %v2671_v38, %v2734_v24  ;;  %v2773_v1 = vadd.f32 %v2758_v26, %v2757_v28 }
0x10d6   :  { %v2717_v23 = vpop.xlane.xlu0 %2716 }
0x10d7   :  { %v2759_v48 = vmul.f32 %v5255_v7, %v5255_v7  ;;  %v2760_v58 = vmul.f32 %v5257_v31, %v5257_v31  ;;  %v2735_v4 = vmul.f32 0.00390625, %v2717_v23  ;;  %2774 = vadd.xlane.f32.xlu1 %v2773_v1 }
0x10d9   :  { %v5263_v45 = vsub.f32 %v2675_v34, %v2735_v4  ;;  %v5265_v57 = vsub.f32 %v2677_v6, %v2735_v4  ;;  %v2776_v10 = vadd.f32 %v2760_v58, %v2759_v48 }
0x10da   :  { %v2720_v32 = vpop.xlane.xlu0 %2719 }
0x10db   :  { %v2761_v35 = vmul.f32 %v5263_v45, %v5263_v45  ;;  %v2762_v27 = vmul.f32 %v5265_v57, %v5265_v57  ;;  %v2736_v29 = vmul.f32 0.00390625, %v2720_v32  ;;  %2777 = vadd.xlane.f32.xlu0 %v2776_v10 }
0x10dd   :  { %v5271_v60 = vsub.f32 %v2681_v46, %v2736_v29  ;;  %v5273_v3 = vsub.f32 %v2683_v5, %v2736_v29  ;;  %v2779_v38 = vadd.f32 %v2762_v27, %v2761_v35 }
0x10de   :  { %v2723_v62 = vpop.xlane.xlu1 %2722 }
0x10df   :  { %v2763_v41 = vmul.f32 %v5271_v60, %v5271_v60  ;;  %v2764_v34 = vmul.f32 %v5273_v3, %v5273_v3  ;;  %v2737_v61 = vmul.f32 0.00390625, %v2723_v62  ;;  %2780 = vadd.xlane.f32.xlu1 %v2779_v38 }
0x10e1   :  { %v5279_v6 = vsub.f32 %v2687_v37, %v2737_v61  ;;  %v5281_v20 = vsub.f32 %v2689_v0, %v2737_v61  ;;  %v2782_v15 = vadd.f32 %v2764_v34, %v2763_v41 }
0x10e2   :  { %v2726_v49 = vpop.xlane.xlu0 %2725 }
0x10e3   :  { %v2765_v46 = vmul.f32 %v5279_v6, %v5279_v6  ;;  %v2766_v33 = vmul.f32 %v5281_v20, %v5281_v20  ;;  %v2738_v5 = vmul.f32 0.00390625, %v2726_v49  ;;  %2783 = vadd.xlane.f32.xlu0 %v2782_v15 }
0x10e5   :  { %v5287_v36 = vsub.f32 %v2693_v18, %v2738_v5  ;;  %v5289_v19 = vsub.f32 %v2695_v21, %v2738_v5  ;;  %v2785_v52 = vadd.f32 %v2766_v33, %v2765_v46 }
0x10e6   :  { %v2729_v43 = vpop.xlane.xlu1 %2728 }
0x10e7   :  { %v2767_v37 = vmul.f32 %v5287_v36, %v5287_v36  ;;  %v2768_v0 = vmul.f32 %v5289_v19, %v5289_v19  ;;  %v2739_v16 = vmul.f32 0.00390625, %v2729_v43  ;;  %2786 = vadd.xlane.f32.xlu1 %v2785_v52 }
0x10e9   :  { %v5295_v14 = vsub.f32 %v2699_v39, %v2739_v16  ;;  %v5297_v53 = vsub.f32 %v2701_v50, %v2739_v16  ;;  %v2788_v59 = vadd.f32 %v2768_v0, %v2767_v37 }
0x10ea   :  { %v2732_v17 = vpop.xlane.xlu0 %2731 }
0x10eb   :  { %v2769_v18 = vmul.f32 %v5295_v14, %v5295_v14  ;;  %v2770_v21 = vmul.f32 %v5297_v53, %v5297_v53  ;;  %v2740_v25 = vmul.f32 0.00390625, %v2732_v17  ;;  %2789 = vadd.xlane.f32.xlu0 %v2788_v59 }
0x10ed   :  { %v5303_v56 = vsub.f32 %v2705_v11, %v2740_v25  ;;  %v5305_v44 = vsub.f32 %v2707_v9, %v2740_v25  ;;  %v2791_v51 = vadd.f32 %v2770_v21, %v2769_v18  ;;  %v2863_v11 = vld [vmem:[%s5646_s8 + $0x10] sm:$0xff]  ;;  %v2862_v9 = vld [vmem:[%s5646_s8 + $0x8] sm:$0xff]  ;;  %s3626_s8 = sshll.u32 %s4081_s3, 4  ;;  %s3627_s8 = int_to_ptr.vmem [resolvable:$true] %s3626_s8 }
0x10ee   :  { %s4055_s25 = scalar_lea.vmem %s3627_s8, 128  ;;  %p4060_p1 = scmp.lt.s32.totalorder %s3627_s8, %s3627_s8 }
0x10ef   :  { %v2771_v39 = vmul.f32 %v5303_v56, %v5303_v56  ;;  %v2772_v50 = vmul.f32 %v5305_v44, %v5305_v44  ;;  %2792 = vadd.xlane.f32.xlu1 %v2791_v51  ;;  %p4056_p0 = scmp.ne.s32.totalorder %s3627_s8, %s4055_s25  ;;  %p4061_p2 = scmp.lt.s32.totalorder %s4055_s25, %s4055_s25 }
0x10f1   :  { %v2794_v54 = vadd.f32 %v2772_v50, %v2771_v39  ;;  %p4062_p3 = por %p4061_p2, %p4060_p1 }
0x10f3   :  { %2795 = vadd.xlane.f32.xlu0 %v2794_v54  ;;  %p4063_p4 = pnand %p4062_p3, %p4056_p0 }
0x1100   :  { %2871 = vperm.xlu1 %3892, %v2861_v22  }
0x1104   :  { %2881 = vperm.xlu1 %3892, %v2863_v11  }
0x1108   :  { %2886 = vperm.xlu1 %3892, %v2864_v55  }
0x1109   :  { %2876 = vperm.xlu0 %3891, %v2862_v9  }
0x110c   :  { %2896 = vperm.xlu1 %3892, %v2866_v12  }
0x110d   :  { %2891 = vperm.xlu0 %3891, %v2865_v8  }
0x1110   :  { %2906 = vperm.xlu1 %3892, %v2868_v13  }
0x1111   :  { %2901 = vperm.xlu0 %3891, %v2867_v63  }
0x1164   :  { %v2775_v28 = vpop.xlane.xlu1 %2774 }
0x1165   :  { %v2797_v26 = vmul.f32 0.00390625, %v2775_v28 }
0x1167   :  { %v2805_v24 = vadd.f32 1e-05, %v2797_v26 }
0x1168   :  { %v2778_v1 = vpop.xlane.xlu0 %2777 }
0x1169   :  { %4007 = vrsqrt.f32 %v2805_v24  ;;  %v2798_v23 = vmul.f32 0.00390625, %v2778_v1 }
0x116b   :  { %v2806_v48 = vadd.f32 1e-05, %v2798_v23 }
0x116c   :  { %v2781_v58 = vpop.xlane.xlu1 %2780 }
0x116d   :  { %4009 = vrsqrt.f32 %v2806_v48  ;;  %v2799_v4 = vmul.f32 0.00390625, %v2781_v58 }
0x116f   :  { %v2807_v10 = vadd.f32 1e-05, %v2799_v4 }
0x1170   :  { %v2784_v32 = vpop.xlane.xlu0 %2783 }
0x1171   :  { %4011 = vrsqrt.f32 %v2807_v10  ;;  %v2800_v35 = vmul.f32 0.00390625, %v2784_v32 }
0x1173   :  { %v4008_v27 = vpop.eup %4007  ;;  %v2808_v29 = vadd.f32 1e-05, %v2800_v35 }
0x1174   :  { %v2787_v38 = vpop.xlane.xlu1 %2786  ;;  %v2822_v41 = vmul.f32 %v4008_v27, %v5249_v42  ;;  %v2821_v34 = vmul.f32 %v4008_v27, %v5247_v30 }
0x1175   :  { %4013 = vrsqrt.f32 %v2808_v29  ;;  %v2801_v62 = vmul.f32 0.00390625, %v2787_v38 }
0x1176   :  { %v2838_v52 = vmax.f32 %v2822_v41, 0.0  ;;  %v2837_v37 = vmax.f32 %v2821_v34, 0.0  ;;  %v2857_v41 = vld [vmem:[%s5645_s7 + $0x20] sm:$0xff]  ;;  %v2858_v34 = vld [vmem:[%s5645_s7 + $0x28] sm:$0xff] }
0x1177   :  { %v4010_v61 = vpop.eup %4009  ;;  %v2809_v15 = vadd.f32 1e-05, %v2801_v62 }
0x1178   :  { %v2790_v49 = vpop.xlane.xlu0 %2789  ;;  %v2824_v46 = vmul.f32 %v4010_v61, %v5257_v31  ;;  %v2823_v33 = vmul.f32 %v4010_v61, %v5255_v7  ;;  %v2859_v61 = vld [vmem:[%s5645_s7 + $0x30] sm:$0xff] }
0x1179   :  { %4015 = vrsqrt.f32 %v2809_v15  ;;  %v2802_v5 = vmul.f32 0.00390625, %v2790_v49  ;;  %v2860_v15 = vld [vmem:[%s5645_s7 + $0x38] sm:$0xff] }
0x117a   :  { %v2840_v43 = vmax.f32 %v2824_v46, 0.0  ;;  %v2839_v0 = vmax.f32 %v2823_v33, 0.0 }
0x117b   :  { %v4012_v16 = vpop.eup %4011  ;;  %v2810_v59 = vadd.f32 1e-05, %v2802_v5 }
0x117c   :  { %v2793_v17 = vpop.xlane.xlu1 %2792  ;;  %v3838_v18 = vpack.c.bf16 %v2840_v43, %v2838_v52  ;;  %v3840_v42 = vpack.c.bf16 %v2839_v0, %v2837_v37  ;;  %v2826_v21 = vmul.f32 %v4012_v16, %v5265_v57  ;;  %v2825_v31 = vmul.f32 %v4012_v16, %v5263_v45 }
0x117d   :  { %4017 = vrsqrt.f32 %v2810_v59  ;;  %v2803_v30 = vmul.f32 0.00390625, %v2793_v17 }
0x117e   :  { %3839 = vmatprep.subr.bf16.mxu0 %v3838_v18  ;;  %v2842_v22 = vmax.f32 %v2826_v21, 0.0  ;;  %v2841_v55 = vmax.f32 %v2825_v31, 0.0 }
0x117f   :  { %v4014_v25 = vpop.eup %4013  ;;  %v2811_v7 = vadd.f32 1e-05, %v2803_v30  ;;  %3841 = vmatpush1.bf16.msra.mxu0 %v3840_v42 }
0x1180   :  { %v2796_v51 = vpop.xlane.xlu0 %2795  ;;  %v2828_v39 = vmul.f32 %v4014_v25, %v5273_v3  ;;  %v2827_v50 = vmul.f32 %v4014_v25, %v5271_v60  ;;  %v2872_v49 = vpop.permute.xlu1 %2871 }
0x1181   :  { %4019 = vrsqrt.f32 %v2811_v7  ;;  %v2804_v54 = vmul.f32 0.00390625, %v2796_v51 }
0x1182   :  { %v2844_v11 = vmax.f32 %v2828_v39, 0.0  ;;  %v2843_v9 = vmax.f32 %v2827_v50, 0.0 }
0x1183   :  { %v4016_v12 = vpop.eup %4015  ;;  %v2812_v8 = vadd.f32 1e-05, %v2804_v54 }
0x1184   :  { %v3842_v13 = vpack.c.bf16 %v2844_v11, %v2842_v22  ;;  %v3844_v57 = vpack.c.bf16 %v2843_v9, %v2841_v55  ;;  %v2830_v45 = vmul.f32 %v4016_v12, %v5281_v20  ;;  %v2829_v63 = vmul.f32 %v4016_v12, %v5279_v6  ;;  %v2882_v17 = vpop.permute.xlu1 %2881 }
0x1185   :  { %4021 = vrsqrt.f32 %v2812_v8 }
0x1186   :  { %3843 = vmatprep.subr.bf16.mxu0 %v3842_v13  ;;  %v2846_v26 = vmax.f32 %v2830_v45, 0.0  ;;  %v2845_v1 = vmax.f32 %v2829_v63, 0.0 }
0x1187   :  { %v4018_v28 = vpop.eup %4017  ;;  %3845 = vmatpush1.bf16.msra.mxu0 %v3844_v57 }
0x1188   :  { %v2832_v60 = vmul.f32 %v4018_v28, %v5289_v19  ;;  %v2831_v3 = vmul.f32 %v4018_v28, %v5287_v36  ;;  %v2877_v43 = vpop.permute.xlu0 %2876  ;;  %v2887_v7 = vpop.permute.xlu1 %2886 }
0x118a   :  { %v2848_v24 = vmax.f32 %v2832_v60, 0.0  ;;  %v2847_v23 = vmax.f32 %v2831_v3, 0.0 }
0x118b   :  { %v4020_v48 = vpop.eup %4019 }
0x118c   :  { %v3846_v58 = vpack.c.bf16 %v2848_v24, %v2846_v26  ;;  %v3848_v4 = vpack.c.bf16 %v2847_v23, %v2845_v1  ;;  %v2834_v10 = vmul.f32 %v4020_v48, %v5297_v53  ;;  %v2833_v20 = vmul.f32 %v4020_v48, %v5295_v14  ;;  %v2853_v53 = vld [vmem:[%s5645_s7] sm:$0xff]  ;;  %v2854_v14 = vld [vmem:[%s5645_s7 + $0x8] sm:$0xff]  ;;  %v2892_v11 = vpop.permute.xlu0 %2891  ;;  %v2897_v57 = vpop.permute.xlu1 %2896 }
0x118e   :  { %3847 = vmatprep.subr.bf16.mxu0 %v3846_v58  ;;  %v2850_v35 = vmax.f32 %v2834_v10, 0.0  ;;  %v2849_v27 = vmax.f32 %v2833_v20, 0.0 }
0x118f   :  { %v4022_v32 = vpop.eup %4021  ;;  %3849 = vmatpush1.bf16.msra.mxu0 %v3848_v4 }
0x1190   :  { %v2836_v6 = vmul.f32 %v4022_v32, %v5305_v44  ;;  %v2835_v19 = vmul.f32 %v4022_v32, %v5303_v56  ;;  %v2855_v56 = vld [vmem:[%s5645_s7 + $0x10] sm:$0xff]  ;;  %v2856_v44 = vld [vmem:[%s5645_s7 + $0x18] sm:$0xff]  ;;  %v2902_v26 = vpop.permute.xlu0 %2901  ;;  %v2907_v4 = vpop.permute.xlu1 %2906 }
0x1192   :  { %v2852_v36 = vmax.f32 %v2836_v6, 0.0  ;;  %v2851_v29 = vmax.f32 %v2835_v19, 0.0 }
0x1194   :  { %v3850_v38 = vpack.c.bf16 %v2852_v36, %v2850_v35  ;;  %v3852_v62 = vpack.c.bf16 %v2851_v29, %v2849_v27 }
0x1196   :  { %3851 = vmatprep.subr.bf16.mxu0 %v3850_v38 }
0x1197   :  { %3853 = vmatpush1.bf16.msra.mxu0 %v3852_v62 }
0x119a   :  { %3708 = vmatmul.mubr.msk.f32.vlgmr.msra.gmra.mrb[64].mxu0 %vm448_vm2, %v2853_v53 }
0x119b   :  { %3003 = vmatprep.mubr.f32.mxu0 %v4079_v2 }
0x119e   :  { %3709 = vmatmul.mubr.msk.f32.gmra.mrb[66].mxu0 %vm448_vm2, %v2854_v14 }
0x119f   :  { %3009 = vmatprep.mubr.f32.mxu0 %v4079_v2 }
0x11a2   :  { %3710 = vmatmul.mubr.msk.f32.gmra.mrb[68].mxu0 %vm448_vm2, %v2855_v56 }
0x11a3   :  { %3015 = vmatprep.mubr.f32.mxu0 %v4079_v2 }
0x11a6   :  { %3711 = vmatmul.mubr.msk.f32.gmra.mrb[70].mxu0 %vm448_vm2, %v2856_v44 }
0x11a7   :  { %3021 = vmatprep.mubr.f32.mxu0 %v4079_v2 }
0x11aa   :  { %3712 = vmatmul.mubr.msk.f32.gmra.mrb[72].mxu0 %vm448_vm2, %v2857_v41 }
0x11ab   :  { %3027 = vmatprep.mubr.f32.mxu0 %v4079_v2 }
0x11ae   :  { %3713 = vmatmul.mubr.msk.f32.gmra.mrb[74].mxu0 %vm448_vm2, %v2858_v34 }
0x11af   :  { %3033 = vmatprep.mubr.f32.mxu0 %v4079_v2 }
0x11b2   :  { %3714 = vmatmul.mubr.msk.f32.gmra.mrb[76].mxu0 %vm448_vm2, %v2859_v61 }
0x11b3   :  { %3039 = vmatprep.mubr.f32.mxu0 %v4079_v2 }
0x11b6   :  { %3715 = vmatmul.mubr.msk.f32.gmra.mrb[78].mxu0 %vm448_vm2, %v2860_v15 }
0x11b7   :  { %3601 = vmatprep.mubr.f32.mxu0 %v4079_v2 }
0x126d   :  { %v2999_v46 = vpop.f32.mrb[64].mxu0 }
0x126e   :  { %v3000_v33 = vadd.f32 %v2999_v46, %v2872_v49  ;;  %v3001_v5 = vpop.f32.mrb[65].mxu0 }
0x126f   :  { %v3002_v52 = vadd.f32 %v3001_v5, %v2872_v49 }
0x1271   :  { %v3046_v37 = vadd.f32 %v3002_v52, %v3000_v33  ;;  %v3005_v0 = vpop.f32.mrb[66].mxu0 }
0x1272   :  { %v3006_v16 = vadd.f32 %v3005_v0, %v2877_v43  ;;  %v3007_v59 = vpop.f32.mrb[67].mxu0 }
0x1273   :  { %v3008_v18 = vadd.f32 %v3007_v59, %v2877_v43  ;;  %3047 = vadd.xlane.f32.xlu0 %v3046_v37 }
0x1275   :  { %v3049_v42 = vadd.f32 %v3008_v18, %v3006_v16  ;;  %v3011_v30 = vpop.f32.mrb[68].mxu0 }
0x1276   :  { %v3012_v21 = vadd.f32 %v3011_v30, %v2882_v17  ;;  %v3013_v31 = vpop.f32.mrb[69].mxu0 }
0x1277   :  { %v3014_v25 = vadd.f32 %v3013_v31, %v2882_v17  ;;  %3050 = vadd.xlane.f32.xlu1 %v3049_v42 }
0x1279   :  { %v3052_v51 = vadd.f32 %v3014_v25, %v3012_v21  ;;  %v3017_v39 = vpop.f32.mrb[70].mxu0 }
0x127a   :  { %v3018_v50 = vadd.f32 %v3017_v39, %v2887_v7  ;;  %v3019_v54 = vpop.f32.mrb[71].mxu0 }
0x127b   :  { %v3020_v22 = vadd.f32 %v3019_v54, %v2887_v7  ;;  %3053 = vadd.xlane.f32.xlu0 %v3052_v51 }
0x127d   :  { %v3055_v55 = vadd.f32 %v3020_v22, %v3018_v50  ;;  %v3023_v9 = vpop.f32.mrb[72].mxu0 }
0x127e   :  { %v3024_v12 = vadd.f32 %v3023_v9, %v2892_v11  ;;  %v3025_v8 = vpop.f32.mrb[73].mxu0 }
0x127f   :  { %v3026_v13 = vadd.f32 %v3025_v8, %v2892_v11  ;;  %3056 = vadd.xlane.f32.xlu0 %v3055_v55 }
0x1281   :  { %v3058_v45 = vadd.f32 %v3026_v13, %v3024_v12  ;;  %v3029_v63 = vpop.f32.mrb[74].mxu0 }
0x1282   :  { %v3030_v28 = vadd.f32 %v3029_v63, %v2897_v57  ;;  %v3031_v60 = vpop.f32.mrb[75].mxu0 }
0x1283   :  { %v3032_v3 = vadd.f32 %v3031_v60, %v2897_v57  ;;  %3059 = vadd.xlane.f32.xlu1 %v3058_v45 }
0x1285   :  { %v3061_v24 = vadd.f32 %v3032_v3, %v3030_v28  ;;  %v3035_v1 = vpop.f32.mrb[76].mxu0 }
0x1286   :  { %v3036_v23 = vadd.f32 %v3035_v1, %v2902_v26  ;;  %v3037_v48 = vpop.f32.mrb[77].mxu0 }
0x1287   :  { %v3038_v58 = vadd.f32 %v3037_v48, %v2902_v26  ;;  %3062 = vadd.xlane.f32.xlu0 %v3061_v24 }
0x1289   :  { %v3064_v10 = vadd.f32 %v3038_v58, %v3036_v23  ;;  %v3041_v20 = vpop.f32.mrb[78].mxu0 }
0x128a   :  { %v3042_v32 = vadd.f32 %v3041_v20, %v2907_v4  ;;  %v3043_v6 = vpop.f32.mrb[79].mxu0  ;;  %v3198_v20 = vld [vmem:[%s5648_s10] sm:$0xff] }
0x128b   :  { %v3044_v19 = vadd.f32 %v3043_v6, %v2907_v4  ;;  %3065 = vadd.xlane.f32.xlu1 %v3064_v10  ;;  %v3201_v6 = vld [vmem:[%s5648_s10 + $0x18] sm:$0xff] }
0x128d   :  { %v3067_v35 = vadd.f32 %v3044_v19, %v3042_v32 }
0x128f   :  { %3068 = vadd.xlane.f32.xlu0 %v3067_v35  ;;  %v3203_v35 = vld [vmem:[%s5648_s10 + $0x28] sm:$0xff] }
0x1300   :  { %v3048_v36 = vpop.xlane.xlu0 %3047 }
0x1301   :  { %v3070_v27 = vmul.f32 0.00390625, %v3048_v36  ;;  %v3202_v36 = vld [vmem:[%s5648_s10 + $0x20] sm:$0xff] }
0x1303   :  { %v5391_v29 = vsub.f32 %v3000_v33, %v3070_v27  ;;  %v5393_v38 = vsub.f32 %v3002_v52, %v3070_v27  ;;  %v3205_v27 = vld [vmem:[%s5648_s10 + $0x38] sm:$0xff] }
0x1304   :  { %v3051_v62 = vpop.xlane.xlu1 %3050 }
0x1305   :  { %v3094_v53 = vmul.f32 %v5391_v29, %v5391_v29  ;;  %v3095_v14 = vmul.f32 %v5393_v38, %v5393_v38  ;;  %v3071_v56 = vmul.f32 0.00390625, %v3051_v62  ;;  %v3204_v62 = vld [vmem:[%s5648_s10 + $0x30] sm:$0xff] }
0x1307   :  { %v5399_v44 = vsub.f32 %v3006_v16, %v3071_v56  ;;  %v5401_v41 = vsub.f32 %v3008_v18, %v3071_v56  ;;  %v3110_v34 = vadd.f32 %v3095_v14, %v3094_v53 }
0x1308   :  { %v3054_v61 = vpop.xlane.xlu0 %3053 }
0x1309   :  { %v3096_v15 = vmul.f32 %v5399_v44, %v5399_v44  ;;  %v3097_v49 = vmul.f32 %v5401_v41, %v5401_v41  ;;  %v3072_v46 = vmul.f32 0.00390625, %v3054_v61  ;;  %3111 = vadd.xlane.f32.xlu1 %v3110_v34 }
0x130b   :  { %v5407_v33 = vsub.f32 %v3012_v21, %v3072_v46  ;;  %v5409_v5 = vsub.f32 %v3014_v25, %v3072_v46  ;;  %v3113_v52 = vadd.f32 %v3097_v49, %v3096_v15 }
0x130c   :  { %v3057_v43 = vpop.xlane.xlu0 %3056 }
0x130d   :  { %v3098_v37 = vmul.f32 %v5407_v33, %v5407_v33  ;;  %v3099_v0 = vmul.f32 %v5409_v5, %v5409_v5  ;;  %v3073_v16 = vmul.f32 0.00390625, %v3057_v43  ;;  %3114 = vadd.xlane.f32.xlu0 %v3113_v52 }
0x130f   :  { %v5415_v59 = vsub.f32 %v3018_v50, %v3073_v16  ;;  %v5417_v17 = vsub.f32 %v3020_v22, %v3073_v16  ;;  %v3116_v18 = vadd.f32 %v3099_v0, %v3098_v37 }
0x1310   :  { %v3060_v42 = vpop.xlane.xlu1 %3059 }
0x1311   :  { %v3100_v30 = vmul.f32 %v5415_v59, %v5415_v59  ;;  %v3101_v21 = vmul.f32 %v5417_v17, %v5417_v17  ;;  %v3074_v31 = vmul.f32 0.00390625, %v3060_v42  ;;  %3117 = vadd.xlane.f32.xlu1 %v3116_v18 }
0x1313   :  { %v5423_v25 = vsub.f32 %v3024_v12, %v3074_v31  ;;  %v5425_v7 = vsub.f32 %v3026_v13, %v3074_v31  ;;  %v3119_v51 = vadd.f32 %v3101_v21, %v3100_v30 }
0x1314   :  { %v3063_v39 = vpop.xlane.xlu0 %3062 }
0x1315   :  { %v3102_v50 = vmul.f32 %v5423_v25, %v5423_v25  ;;  %v3103_v54 = vmul.f32 %v5425_v7, %v5425_v7  ;;  %v3075_v22 = vmul.f32 0.00390625, %v3063_v39  ;;  %3120 = vadd.xlane.f32.xlu0 %v3119_v51 }
0x1317   :  { %v5431_v11 = vsub.f32 %v3030_v28, %v3075_v22  ;;  %v5433_v55 = vsub.f32 %v3032_v3, %v3075_v22  ;;  %v3122_v9 = vadd.f32 %v3103_v54, %v3102_v50 }
0x1318   :  { %v3066_v8 = vpop.xlane.xlu1 %3065 }
0x1319   :  { %v3104_v12 = vmul.f32 %v5431_v11, %v5431_v11  ;;  %v3105_v13 = vmul.f32 %v5433_v55, %v5433_v55  ;;  %v3076_v57 = vmul.f32 0.00390625, %v3066_v8  ;;  %3123 = vadd.xlane.f32.xlu1 %v3122_v9 }
0x131b   :  { %v5439_v45 = vsub.f32 %v3036_v23, %v3076_v57  ;;  %v5441_v63 = vsub.f32 %v3038_v58, %v3076_v57  ;;  %v3125_v60 = vadd.f32 %v3105_v13, %v3104_v12 }
0x131c   :  { %v3069_v26 = vpop.xlane.xlu0 %3068 }
0x131d   :  { %v3106_v28 = vmul.f32 %v5439_v45, %v5439_v45  ;;  %v3107_v3 = vmul.f32 %v5441_v63, %v5441_v63  ;;  %v3077_v24 = vmul.f32 0.00390625, %v3069_v26  ;;  %3126 = vadd.xlane.f32.xlu0 %v3125_v60 }
0x131f   :  { %v5447_v1 = vsub.f32 %v3042_v32, %v3077_v24  ;;  %v5449_v48 = vsub.f32 %v3044_v19, %v3077_v24  ;;  %v3128_v4 = vadd.f32 %v3107_v3, %v3106_v28  ;;  %v3200_v32 = vld [vmem:[%s5648_s10 + $0x10] sm:$0xff]  ;;  %v3199_v19 = vld [vmem:[%s5648_s10 + $0x8] sm:$0xff] }
0x1321   :  { %v3108_v23 = vmul.f32 %v5447_v1, %v5447_v1  ;;  %v3109_v58 = vmul.f32 %v5449_v48, %v5449_v48  ;;  %3129 = vadd.xlane.f32.xlu1 %v3128_v4 }
0x1323   :  { %v3131_v10 = vadd.f32 %v3109_v58, %v3108_v23 }
0x1325   :  { %3132 = vadd.xlane.f32.xlu0 %v3131_v10 }
0x1332   :  { %3208 = vperm.xlu1 %3892, %v3198_v20  }
0x1336   :  { %3218 = vperm.xlu1 %3892, %v3200_v32  }
0x133a   :  { %3223 = vperm.xlu1 %3892, %v3201_v6  }
0x133b   :  { %3213 = vperm.xlu0 %3891, %v3199_v19  }
0x133e   :  { %3233 = vperm.xlu1 %3892, %v3203_v35  }
0x133f   :  { %3228 = vperm.xlu0 %3891, %v3202_v36  }
0x1342   :  { %3243 = vperm.xlu1 %3892, %v3205_v27  }
0x1343   :  { %3238 = vperm.xlu0 %3891, %v3204_v62  }
0x1396   :  { %v3112_v53 = vpop.xlane.xlu1 %3111 }
0x1397   :  { %v3134_v14 = vmul.f32 0.00390625, %v3112_v53 }
0x1399   :  { %v3142_v56 = vadd.f32 1e-05, %v3134_v14 }
0x139a   :  { %v3115_v34 = vpop.xlane.xlu0 %3114 }
0x139b   :  { %4023 = vrsqrt.f32 %v3142_v56  ;;  %v3135_v61 = vmul.f32 0.00390625, %v3115_v34 }
0x139d   :  { %v3143_v15 = vadd.f32 1e-05, %v3135_v61 }
0x139e   :  { %v3118_v49 = vpop.xlane.xlu1 %3117 }
0x139f   :  { %4025 = vrsqrt.f32 %v3143_v15  ;;  %v3136_v46 = vmul.f32 0.00390625, %v3118_v49 }
0x13a1   :  { %v3144_v52 = vadd.f32 1e-05, %v3136_v46 }
0x13a2   :  { %v3121_v43 = vpop.xlane.xlu0 %3120 }
0x13a3   :  { %4027 = vrsqrt.f32 %v3144_v52  ;;  %v3137_v37 = vmul.f32 0.00390625, %v3121_v43 }
0x13a5   :  { %v4024_v0 = vpop.eup %4023  ;;  %v3145_v16 = vadd.f32 1e-05, %v3137_v37 }
0x13a6   :  { %v3124_v18 = vpop.xlane.xlu1 %3123  ;;  %v3159_v30 = vmul.f32 %v4024_v0, %v5393_v38  ;;  %v3158_v21 = vmul.f32 %v4024_v0, %v5391_v29 }
0x13a7   :  { %4029 = vrsqrt.f32 %v3145_v16  ;;  %v3138_v42 = vmul.f32 0.00390625, %v3124_v18 }
0x13a8   :  { %v3175_v9 = vmax.f32 %v3159_v30, 0.0  ;;  %v3174_v12 = vmax.f32 %v3158_v21, 0.0  ;;  %v3194_v30 = vld [vmem:[%s5647_s9 + $0x20] sm:$0xff]  ;;  %v3195_v21 = vld [vmem:[%s5647_s9 + $0x28] sm:$0xff] }
0x13a9   :  { %v4026_v31 = vpop.eup %4025  ;;  %v3146_v51 = vadd.f32 1e-05, %v3138_v42 }
0x13aa   :  { %v3127_v39 = vpop.xlane.xlu0 %3126  ;;  %v3161_v50 = vmul.f32 %v4026_v31, %v5401_v41  ;;  %v3160_v54 = vmul.f32 %v4026_v31, %v5399_v44  ;;  %v3196_v31 = vld [vmem:[%s5647_s9 + $0x30] sm:$0xff] }
0x13ab   :  { %4031 = vrsqrt.f32 %v3146_v51  ;;  %v3139_v22 = vmul.f32 0.00390625, %v3127_v39  ;;  %v3197_v51 = vld [vmem:[%s5647_s9 + $0x38] sm:$0xff] }
0x13ac   :  { %v3177_v8 = vmax.f32 %v3161_v50, 0.0  ;;  %v3176_v13 = vmax.f32 %v3160_v54, 0.0 }
0x13ad   :  { %v4028_v57 = vpop.eup %4027  ;;  %v3147_v60 = vadd.f32 1e-05, %v3139_v22 }
0x13ae   :  { %v3130_v26 = vpop.xlane.xlu1 %3129  ;;  %v3854_v28 = vpack.c.bf16 %v3177_v8, %v3175_v9  ;;  %v3856_v38 = vpack.c.bf16 %v3176_v13, %v3174_v12  ;;  %v3163_v3 = vmul.f32 %v4028_v57, %v5409_v5  ;;  %v3162_v41 = vmul.f32 %v4028_v57, %v5407_v33 }
0x13af   :  { %4033 = vrsqrt.f32 %v3147_v60  ;;  %v3140_v29 = vmul.f32 0.00390625, %v3130_v26 }
0x13b0   :  { %3855 = vmatprep.subr.bf16.mxu1 %v3854_v28  ;;  %v3179_v20 = vmax.f32 %v3163_v3, 0.0  ;;  %v3178_v6 = vmax.f32 %v3162_v41, 0.0 }
0x13b1   :  { %v4030_v24 = vpop.eup %4029  ;;  %v3148_v44 = vadd.f32 1e-05, %v3140_v29  ;;  %3857 = vmatpush1.bf16.msra.mxu1 %v3856_v38 }
0x13b2   :  { %v3133_v4 = vpop.xlane.xlu0 %3132  ;;  %v3165_v23 = vmul.f32 %v4030_v24, %v5417_v17  ;;  %v3164_v58 = vmul.f32 %v4030_v24, %v5415_v59  ;;  %v3209_v39 = vpop.permute.xlu1 %3208 }
0x13b3   :  { %4035 = vrsqrt.f32 %v3148_v44  ;;  %v3141_v10 = vmul.f32 0.00390625, %v3133_v4 }
0x13b4   :  { %v3181_v32 = vmax.f32 %v3165_v23, 0.0  ;;  %v3180_v19 = vmax.f32 %v3164_v58, 0.0 }
0x13b5   :  { %v4032_v35 = vpop.eup %4031  ;;  %v3149_v36 = vadd.f32 1e-05, %v3141_v10 }
0x13b6   :  { %v3858_v27 = vpack.c.bf16 %v3181_v32, %v3179_v20  ;;  %v3860_v5 = vpack.c.bf16 %v3180_v19, %v3178_v6  ;;  %v3167_v33 = vmul.f32 %v4032_v35, %v5425_v7  ;;  %v3166_v62 = vmul.f32 %v4032_v35, %v5423_v25  ;;  %v3219_v26 = vpop.permute.xlu1 %3218 }
0x13b7   :  { %4037 = vrsqrt.f32 %v3149_v36 }
0x13b8   :  { %3859 = vmatprep.subr.bf16.mxu1 %v3858_v27  ;;  %v3183_v14 = vmax.f32 %v3167_v33, 0.0  ;;  %v3182_v34 = vmax.f32 %v3166_v62, 0.0 }
0x13b9   :  { %v4034_v53 = vpop.eup %4033  ;;  %3861 = vmatpush1.bf16.msra.mxu1 %v3860_v5 }
0x13ba   :  { %v3169_v59 = vmul.f32 %v4034_v53, %v5433_v55  ;;  %v3168_v17 = vmul.f32 %v4034_v53, %v5431_v11  ;;  %v3214_v8 = vpop.permute.xlu0 %3213  ;;  %v3224_v24 = vpop.permute.xlu1 %3223 }
0x13bc   :  { %v3185_v56 = vmax.f32 %v3169_v59, 0.0  ;;  %v3184_v61 = vmax.f32 %v3168_v17, 0.0 }
0x13bd   :  { %v4036_v15 = vpop.eup %4035 }
0x13be   :  { %v3862_v49 = vpack.c.bf16 %v3185_v56, %v3183_v14  ;;  %v3864_v46 = vpack.c.bf16 %v3184_v61, %v3182_v34  ;;  %v3171_v52 = vmul.f32 %v4036_v15, %v5441_v63  ;;  %v3170_v7 = vmul.f32 %v4036_v15, %v5439_v45  ;;  %v3190_v63 = vld [vmem:[%s5647_s9] sm:$0xff]  ;;  %v3191_v45 = vld [vmem:[%s5647_s9 + $0x8] sm:$0xff]  ;;  %v3229_v20 = vpop.permute.xlu0 %3228  ;;  %v3234_v27 = vpop.permute.xlu1 %3233 }
0x13c0   :  { %3863 = vmatprep.subr.bf16.mxu1 %v3862_v49  ;;  %v3187_v37 = vmax.f32 %v3171_v52, 0.0  ;;  %v3186_v0 = vmax.f32 %v3170_v7, 0.0 }
0x13c1   :  { %v4038_v43 = vpop.eup %4037  ;;  %3865 = vmatpush1.bf16.msra.mxu1 %v3864_v46 }
0x13c2   :  { %v3173_v25 = vmul.f32 %v4038_v43, %v5449_v48  ;;  %v3172_v55 = vmul.f32 %v4038_v43, %v5447_v1  ;;  %v3192_v1 = vld [vmem:[%s5647_s9 + $0x10] sm:$0xff]  ;;  %v3193_v48 = vld [vmem:[%s5647_s9 + $0x18] sm:$0xff]  ;;  %v3239_v17 = vpop.permute.xlu0 %3238  ;;  %v3244_v49 = vpop.permute.xlu1 %3243 }
0x13c4   :  { %v3189_v11 = vmax.f32 %v3173_v25, 0.0  ;;  %v3188_v16 = vmax.f32 %v3172_v55, 0.0 }
0x13c6   :  { %v3866_v18 = vpack.c.bf16 %v3189_v11, %v3187_v37  ;;  %v3868_v42 = vpack.c.bf16 %v3188_v16, %v3186_v0 }
0x13c8   :  { %3867 = vmatprep.subr.bf16.mxu1 %v3866_v18 }
0x13c9   :  { %3869 = vmatpush1.bf16.msra.mxu1 %v3868_v42 }
0x13cc   :  { %3716 = vmatmul.mubr.msk.f32.vlgmr.msra.gmra.mrb[66].mxu1 %vm448_vm2, %v3190_v63 }
0x13cd   :  { %3340 = vmatprep.mubr.f32.mxu1 %v4079_v2 }
0x13d0   :  { %3717 = vmatmul.mubr.msk.f32.gmra.mrb[68].mxu1 %vm448_vm2, %v3191_v45 }
0x13d1   :  { %3346 = vmatprep.mubr.f32.mxu1 %v4079_v2 }
0x13d4   :  { %3718 = vmatmul.mubr.msk.f32.gmra.mrb[70].mxu1 %vm448_vm2, %v3192_v1 }
0x13d5   :  { %3352 = vmatprep.mubr.f32.mxu1 %v4079_v2 }
0x13d8   :  { %3719 = vmatmul.mubr.msk.f32.gmra.mrb[72].mxu1 %vm448_vm2, %v3193_v48 }
0x13d9   :  { %3358 = vmatprep.mubr.f32.mxu1 %v4079_v2 }
0x13dc   :  { %3720 = vmatmul.mubr.msk.f32.gmra.mrb[74].mxu1 %vm448_vm2, %v3194_v30 }
0x13dd   :  { %3364 = vmatprep.mubr.f32.mxu1 %v4079_v2 }
0x13e0   :  { %3721 = vmatmul.mubr.msk.f32.gmra.mrb[76].mxu1 %vm448_vm2, %v3195_v21 }
0x13e1   :  { %3370 = vmatprep.mubr.f32.mxu1 %v4079_v2 }
0x13e4   :  { %3722 = vmatmul.mubr.msk.f32.gmra.mrb[78].mxu1 %vm448_vm2, %v3196_v31 }
0x13e5   :  { %3376 = vmatprep.mubr.f32.mxu1 %v4079_v2 }
0x13e8   :  { %3723 = vmatmul.mubr.msk.f32.gmra.mrb[80].mxu1 %vm448_vm2, %v3197_v51 }
0x149f   :  { %v3336_v50 = vpop.f32.mrb[66].mxu1 }
0x14a0   :  { %v3337_v54 = vadd.f32 %v3336_v50, %v3209_v39  ;;  %v3338_v22 = vpop.f32.mrb[67].mxu1 }
0x14a1   :  { %v3339_v9 = vadd.f32 %v3338_v22, %v3209_v39 }
0x14a3   :  { %v3383_v12 = vadd.f32 %v3339_v9, %v3337_v54  ;;  %v3342_v13 = vpop.f32.mrb[68].mxu1 }
0x14a4   :  { %v3343_v57 = vadd.f32 %v3342_v13, %v3214_v8  ;;  %v3344_v60 = vpop.f32.mrb[69].mxu1 }
0x14a5   :  { %v3345_v28 = vadd.f32 %v3344_v60, %v3214_v8  ;;  %3384 = vadd.xlane.f32.xlu0 %v3383_v12 }
0x14a7   :  { %v3386_v2 = vadd.f32 %v3345_v28, %v3343_v57  ;;  %v3348_v38 = vpop.f32.mrb[70].mxu1 }
0x14a8   :  { %v3349_v29 = vadd.f32 %v3348_v38, %v3219_v26  ;;  %v3350_v3 = vpop.f32.mrb[71].mxu1 }
0x14a9   :  { %v3351_v41 = vadd.f32 %v3350_v3, %v3219_v26  ;;  %3387 = vadd.xlane.f32.xlu1 %v3386_v2 }
0x14ab   :  { %v3389_v44 = vadd.f32 %v3351_v41, %v3349_v29  ;;  %v3354_v4 = vpop.f32.mrb[72].mxu1 }
0x14ac   :  { %v3355_v23 = vadd.f32 %v3354_v4, %v3224_v24  ;;  %v3356_v58 = vpop.f32.mrb[73].mxu1 }
0x14ad   :  { %v3357_v10 = vadd.f32 %v3356_v58, %v3224_v24  ;;  %3390 = vadd.xlane.f32.xlu0 %v3389_v44 }
0x14af   :  { %v3392_v32 = vadd.f32 %v3357_v10, %v3355_v23  ;;  %v3360_v6 = vpop.f32.mrb[74].mxu1 }
0x14b0   :  { %v3361_v19 = vadd.f32 %v3360_v6, %v3229_v20  ;;  %v3362_v35 = vpop.f32.mrb[75].mxu1 }
0x14b1   :  { %v3363_v36 = vadd.f32 %v3362_v35, %v3229_v20  ;;  %3393 = vadd.xlane.f32.xlu0 %v3392_v32 }
0x14b3   :  { %v3395_v5 = vadd.f32 %v3363_v36, %v3361_v19  ;;  %v3366_v33 = vpop.f32.mrb[76].mxu1 }
0x14b4   :  { %v3367_v62 = vadd.f32 %v3366_v33, %v3234_v27  ;;  %v3368_v53 = vpop.f32.mrb[77].mxu1 }
0x14b5   :  { %v3369_v59 = vadd.f32 %v3368_v53, %v3234_v27  ;;  %3396 = vadd.xlane.f32.xlu1 %v3395_v5 }
0x14b7   :  { %v3398_v14 = vadd.f32 %v3369_v59, %v3367_v62  ;;  %v3372_v56 = vpop.f32.mrb[78].mxu1 }
0x14b8   :  { %v3373_v34 = vadd.f32 %v3372_v56, %v3239_v17  ;;  %v3374_v61 = vpop.f32.mrb[79].mxu1 }
0x14b9   :  { %v3375_v15 = vadd.f32 %v3374_v61, %v3239_v17  ;;  %3399 = vadd.xlane.f32.xlu0 %v3398_v14 }
0x14bb   :  { %v3401_v46 = vadd.f32 %v3375_v15, %v3373_v34  ;;  %v3378_v52 = vpop.f32.mrb[80].mxu1 }
0x14bc   :  { %v3379_v7 = vadd.f32 %v3378_v52, %v3244_v49  ;;  %v3380_v43 = vpop.f32.mrb[81].mxu1  ;;  %v3528_v52 = vld [vmem:[%s5650_s12] sm:$0x3] }
0x14bd   :  { %v3381_v25 = vadd.f32 %v3380_v43, %v3244_v49  ;;  %3402 = vadd.xlane.f32.xlu1 %v3401_v46  ;;  %v1742_v46 = vld [vmem:[%s5650_s12] sm:$0x3] }
0x14bf   :  { %v3404_v55 = vadd.f32 %v3381_v25, %v3379_v7 }
0x14c1   :  { %3405 = vadd.xlane.f32.xlu0 %v3404_v55 }
0x1532   :  { %v3385_v37 = vpop.xlane.xlu0 %3384 }
0x1533   :  { %v3407_v11 = vmul.f32 0.00390625, %v3385_v37 }
0x1535   :  { %v5534_v0 = vsub.f32 %v3337_v54, %v3407_v11  ;;  %v5536_v16 = vsub.f32 %v3339_v9, %v3407_v11 }
0x1536   :  { %v3388_v18 = vpop.xlane.xlu1 %3387 }
0x1537   :  { %v3431_v42 = vmul.f32 %v5534_v0, %v5534_v0  ;;  %v3432_v63 = vmul.f32 %v5536_v16, %v5536_v16  ;;  %v3408_v45 = vmul.f32 0.00390625, %v3388_v18 }
0x1539   :  { %v5542_v1 = vsub.f32 %v3343_v57, %v3408_v45  ;;  %v5544_v48 = vsub.f32 %v3345_v28, %v3408_v45  ;;  %v3447_v30 = vadd.f32 %v3432_v63, %v3431_v42 }
0x153a   :  { %v3391_v21 = vpop.xlane.xlu0 %3390 }
0x153b   :  { %v3433_v31 = vmul.f32 %v5542_v1, %v5542_v1  ;;  %v3434_v51 = vmul.f32 %v5544_v48, %v5544_v48  ;;  %v3409_v39 = vmul.f32 0.00390625, %v3391_v21  ;;  %3448 = vadd.xlane.f32.xlu1 %v3447_v30 }
0x153d   :  { %v5550_v50 = vsub.f32 %v3349_v29, %v3409_v39  ;;  %v5552_v54 = vsub.f32 %v3351_v41, %v3409_v39  ;;  %v3450_v22 = vadd.f32 %v3434_v51, %v3433_v31 }
0x153e   :  { %v3394_v9 = vpop.xlane.xlu0 %3393 }
0x153f   :  { %v3435_v8 = vmul.f32 %v5550_v50, %v5550_v50  ;;  %v3436_v12 = vmul.f32 %v5552_v54, %v5552_v54  ;;  %v3410_v13 = vmul.f32 0.00390625, %v3394_v9  ;;  %3451 = vadd.xlane.f32.xlu0 %v3450_v22 }
0x1541   :  { %v5558_v57 = vsub.f32 %v3355_v23, %v3410_v13  ;;  %v5560_v60 = vsub.f32 %v3357_v10, %v3410_v13  ;;  %v3453_v26 = vadd.f32 %v3436_v12, %v3435_v8 }
0x1542   :  { %v3397_v28 = vpop.xlane.xlu1 %3396 }
0x1543   :  { %v3437_v2 = vmul.f32 %v5558_v57, %v5558_v57  ;;  %v3438_v38 = vmul.f32 %v5560_v60, %v5560_v60  ;;  %v3411_v29 = vmul.f32 0.00390625, %v3397_v28  ;;  %3454 = vadd.xlane.f32.xlu1 %v3453_v26 }
0x1545   :  { %v5566_v3 = vsub.f32 %v3361_v19, %v3411_v29  ;;  %v5568_v41 = vsub.f32 %v3363_v36, %v3411_v29  ;;  %v3456_v24 = vadd.f32 %v3438_v38, %v3437_v2 }
0x1546   :  { %v3400_v44 = vpop.xlane.xlu0 %3399 }
0x1547   :  { %v3439_v4 = vmul.f32 %v5566_v3, %v5566_v3  ;;  %v3440_v23 = vmul.f32 %v5568_v41, %v5568_v41  ;;  %v3412_v58 = vmul.f32 0.00390625, %v3400_v44  ;;  %3457 = vadd.xlane.f32.xlu0 %v3456_v24 }
0x1549   :  { %v5574_v10 = vsub.f32 %v3367_v62, %v3412_v58  ;;  %v5576_v20 = vsub.f32 %v3369_v59, %v3412_v58  ;;  %v3459_v32 = vadd.f32 %v3440_v23, %v3439_v4 }
0x154a   :  { %v3403_v6 = vpop.xlane.xlu1 %3402 }
0x154b   :  { %v3441_v19 = vmul.f32 %v5574_v10, %v5574_v10  ;;  %v3442_v35 = vmul.f32 %v5576_v20, %v5576_v20  ;;  %v3413_v36 = vmul.f32 0.00390625, %v3403_v6  ;;  %3460 = vadd.xlane.f32.xlu1 %v3459_v32 }
0x154d   :  { %v5582_v27 = vsub.f32 %v3373_v34, %v3413_v36  ;;  %v5584_v5 = vsub.f32 %v3375_v15, %v3413_v36  ;;  %v3462_v33 = vadd.f32 %v3442_v35, %v3441_v19 }
0x154e   :  { %v3406_v53 = vpop.xlane.xlu0 %3405 }
0x154f   :  { %v3443_v62 = vmul.f32 %v5582_v27, %v5582_v27  ;;  %v3444_v59 = vmul.f32 %v5584_v5, %v5584_v5  ;;  %v3414_v17 = vmul.f32 0.00390625, %v3406_v53  ;;  %3463 = vadd.xlane.f32.xlu0 %v3462_v33 }
0x1551   :  { %v5590_v14 = vsub.f32 %v3379_v7, %v3414_v17  ;;  %v5592_v56 = vsub.f32 %v3381_v25, %v3414_v17  ;;  %v3465_v61 = vadd.f32 %v3444_v59, %v3443_v62 }
0x1553   :  { %v3445_v34 = vmul.f32 %v5590_v14, %v5590_v14  ;;  %v3446_v15 = vmul.f32 %v5592_v56, %v5592_v56  ;;  %3466 = vadd.xlane.f32.xlu1 %v3465_v61 }
0x1555   :  { %v3468_v49 = vadd.f32 %v3446_v15, %v3445_v34 }
0x1557   :  { %3469 = vadd.xlane.f32.xlu0 %v3468_v49 }
0x1564   :  { %1745 = vperm.xlu1 %3892, %v1742_v46  }
0x156d   :  { %3531 = vperm.xlu0 %3891, %v3528_v52  }
0x15c8   :  { %v3449_v7 = vpop.xlane.xlu1 %3448 }
0x15c9   :  { %v3471_v43 = vmul.f32 0.00390625, %v3449_v7 }
0x15cb   :  { %v3479_v25 = vadd.f32 1e-05, %v3471_v43 }
0x15cc   :  { %v3452_v55 = vpop.xlane.xlu0 %3451 }
0x15cd   :  { %4039 = vrsqrt.f32 %v3479_v25  ;;  %v3472_v37 = vmul.f32 0.00390625, %v3452_v55 }
0x15cf   :  { %v3480_v11 = vadd.f32 1e-05, %v3472_v37 }
0x15d0   :  { %v3455_v18 = vpop.xlane.xlu1 %3454 }
0x15d1   :  { %4041 = vrsqrt.f32 %v3480_v11  ;;  %v3473_v42 = vmul.f32 0.00390625, %v3455_v18 }
0x15d3   :  { %v3481_v63 = vadd.f32 1e-05, %v3473_v42 }
0x15d4   :  { %v3458_v45 = vpop.xlane.xlu0 %3457 }
0x15d5   :  { %4043 = vrsqrt.f32 %v3481_v63  ;;  %v3474_v30 = vmul.f32 0.00390625, %v3458_v45 }
0x15d7   :  { %v4040_v21 = vpop.eup %4039  ;;  %v3482_v31 = vadd.f32 1e-05, %v3474_v30 }
0x15d8   :  { %v3461_v51 = vpop.xlane.xlu1 %3460  ;;  %v3496_v22 = vmul.f32 %v4040_v21, %v5536_v16  ;;  %v3495_v9 = vmul.f32 %v4040_v21, %v5534_v0 }
0x15d9   :  { %4045 = vrsqrt.f32 %v3482_v31  ;;  %v3475_v39 = vmul.f32 0.00390625, %v3461_v51 }
0x15da   :  { %v3512_v38 = vmax.f32 %v3496_v22, 0.0  ;;  %v3511_v24 = vmax.f32 %v3495_v9, 0.0 }
0x15db   :  { %v4042_v8 = vpop.eup %4041  ;;  %v3483_v12 = vadd.f32 1e-05, %v3475_v39 }
0x15dc   :  { %v3464_v13 = vpop.xlane.xlu0 %3463  ;;  %v3498_v26 = vmul.f32 %v4042_v8, %v5544_v48  ;;  %v3497_v28 = vmul.f32 %v4042_v8, %v5542_v1 }
0x15dd   :  { %4047 = vrsqrt.f32 %v3483_v12  ;;  %v3476_v2 = vmul.f32 0.00390625, %v3464_v13 }
0x15de   :  { %v3514_v29 = vmax.f32 %v3498_v26, 0.0  ;;  %v3513_v44 = vmax.f32 %v3497_v28, 0.0 }
0x15df   :  { %v4044_v4 = vpop.eup %4043  ;;  %v3484_v23 = vadd.f32 1e-05, %v3476_v2 }
0x15e0   :  { %v3467_v58 = vpop.xlane.xlu1 %3466  ;;  %v3870_v32 = vpack.c.bf16 %v3514_v29, %v3512_v38  ;;  %v3872_v16 = vpack.c.bf16 %v3513_v44, %v3511_v24  ;;  %v3500_v6 = vmul.f32 %v4044_v4, %v5552_v54  ;;  %v3499_v48 = vmul.f32 %v4044_v4, %v5550_v50 }
0x15e1   :  { %4049 = vrsqrt.f32 %v3484_v23  ;;  %v3477_v0 = vmul.f32 0.00390625, %v3467_v58 }
0x15e2   :  { %3871 = vmatprep.subr.bf16.mxu0 %v3870_v32  ;;  %v3516_v61 = vmax.f32 %v3500_v6, 0.0  ;;  %v3515_v54 = vmax.f32 %v3499_v48, 0.0 }
0x15e3   :  { %v4046_v19 = vpop.eup %4045  ;;  %v3485_v1 = vadd.f32 1e-05, %v3477_v0  ;;  %3873 = vmatpush1.bf16.msra.mxu0 %v3872_v16 }
0x15e4   :  { %v1746_v35 = vpop.permute.xlu1 %1745  ;;  %v3470_v36 = vpop.xlane.xlu0 %3469  ;;  %v3502_v33 = vmul.f32 %v4046_v19, %v5560_v60  ;;  %v3501_v53 = vmul.f32 %v4046_v19, %v5558_v57 }
0x15e5   :  { %4051 = vrsqrt.f32 %v3485_v1  ;;  %v1818_v62 = vadd.f32 %v4955_v47, %v1746_v35  ;;  %v1820_v59 = vadd.f32 %v4957_v40, %v1746_v35  ;;  %v3478_v17 = vmul.f32 0.00390625, %v3470_v36 }
0x15e6   :  { %v3518_v34 = vmax.f32 %v3502_v33, 0.0  ;;  %v3517_v15 = vmax.f32 %v3501_v53, 0.0 }
0x15e7   :  { %v4048_v50 = vpop.eup %4047  ;;  %v1824_v49 = vcombine.low %v1818_v62, %v1820_v59  ;;  %v3486_v46 = vadd.f32 1e-05, %v3478_v17 }
0x15e8   :  { %v3874_v52 = vpack.c.bf16 %v3518_v34, %v3516_v61  ;;  %v3876_v7 = vpack.c.bf16 %v3517_v15, %v3515_v54  ;;  %v3504_v57 = vmul.f32 %v4048_v50, %v5568_v41  ;;  %v3503_v60 = vmul.f32 %v4048_v50, %v5566_v3 }
0x15e9   :  { %3680 = vst.sshfl [vmem:[#allocation2] sm:$0x33 pattern:$0x76325410] %v1824_v49  ;;  %4053 = vrsqrt.f32 %v3486_v46 }
0x15ea   :  { %3875 = vmatprep.subr.bf16.mxu0 %v3874_v52  ;;  %v3520_v25 = vmax.f32 %v3504_v57, 0.0  ;;  %v3519_v37 = vmax.f32 %v3503_v60, 0.0 }
0x15eb   :  { %v4050_v47 = vpop.eup %4049  ;;  %3877 = vmatpush1.bf16.msra.mxu0 %v3876_v7 }
0x15ec   :  { %v3506_v40 = vmul.f32 %v4050_v47, %v5576_v20  ;;  %v3505_v43 = vmul.f32 %v4050_v47, %v5574_v10 }
0x15ee   :  { %v3522_v55 = vmax.f32 %v3506_v40, 0.0  ;;  %v3521_v11 = vmax.f32 %v3505_v43, 0.0 }
0x15ef   :  { %v4052_v18 = vpop.eup %4051 }
0x15f0   :  { %v3878_v42 = vpack.c.bf16 %v3522_v55, %v3520_v25  ;;  %v3880_v63 = vpack.c.bf16 %v3521_v11, %v3519_v37  ;;  %v3508_v45 = vmul.f32 %v4052_v18, %v5584_v5  ;;  %v3507_v41 = vmul.f32 %v4052_v18, %v5582_v27  ;;  %v3527_v5 = vld [vmem:[%s5649_s11] sm:$0x3]  ;;  %v3532_v27 = vpop.permute.xlu0 %3531 }
0x15f2   :  { %3879 = vmatprep.subr.bf16.mxu0 %v3878_v42  ;;  %v3524_v21 = vmax.f32 %v3508_v45, 0.0  ;;  %v3523_v31 = vmax.f32 %v3507_v41, 0.0 }
0x15f3   :  { %v4054_v30 = vpop.eup %4053  ;;  %3881 = vmatpush1.bf16.msra.mxu0 %v3880_v63 }
0x15f4   :  { %v3510_v3 = vmul.f32 %v4054_v30, %v5592_v56  ;;  %v3509_v20 = vmul.f32 %v4054_v30, %v5590_v14 }
0x15f6   :  { %v3526_v10 = vmax.f32 %v3510_v3, 0.0  ;;  %v3525_v51 = vmax.f32 %v3509_v20, 0.0 }
0x15f8   :  { %v3882_v39 = vpack.c.bf16 %v3526_v10, %v3524_v21  ;;  %v3884_v22 = vpack.c.bf16 %v3525_v51, %v3523_v31 }
0x15fa   :  { %3883 = vmatprep.subr.bf16.mxu0 %v3882_v39 }
0x15fb   :  { %3885 = vmatpush1.bf16.msra.mxu0 %v3884_v22 }
0x15fe   :  { %3724 = vmatmul.mubr.msk.f32.vlgmr.msra.gmra.mrb[80].mxu0 %vm448_vm2, %v3527_v5 }
0x16d1   :  { %v3603_v9 = vpop.f32.mrb[80].mxu0 }
0x16d2   :  { %v3604_v56 = vadd.f32 %v3603_v9, %v3532_v27  ;;  %v3605_v14 = vpop.f32.mrb[81].mxu0 }
0x16d3   :  { %v3606_v8 = vadd.f32 %v3605_v14, %v3532_v27 }
0x16d5   :  { %v3610_v12 = vcombine.low %v3604_v56, %v3606_v8 }
0x16d7   :  { %3725 = vst.sshfl [vmem:[#allocation2 + $0x4] sm:$0x33 pattern:$0x76325410] %v3610_v12 }
0x16d8   :  { %4066 = shalt.err (!%p4063_p4)
}
0x16d9   :  { %s4067_s27 = scalar_lea.hbm %s5651_s13, 128 }
0x16da   :  { %p4068_p5 = scmp.ne.s32.totalorder %s5651_s13, %s4067_s27  ;;  %p4071_p6 = scmp.lt.u32.totalorder %s4067_s27, %s5651_s13 }
0x16dc   :  { %p4073_p7 = pnand %p4071_p6, %p4068_p5 }
0x16de   :  { %4076 = shalt.err (!%p4073_p7)
}
0x16df   :  { %s4082_s30 = smov 64   ;;  %s4083_s14 = smov 4  }
0x16e0   :  { %3632 = dma.vmem_to_hbm [thread:$0]  %s3627_s8, 128, %s5651_s13, [#allocation3], %s4082_s30, %s4082_s30, %s4083_s14  }
0x16e1   :  { %4077 = dma.done.wait [#allocation3], 128  }
0x16e2   :  { %4078 = vsyncadd [#allocation3], 4294967168 }
0x16e3   :  { %3636 = vsyncpa [#allocation3], 1 }

</bundles_post_ra>
